<compile_context>
chip_gen: v6e
topology: v6e:2x2x1
jax: 0.10.0
libtpu: 0.0.40
codegen_flags: <defaults>
</compile_context>

<pallas_src>
import jax
import jax.numpy as jnp
from jax.experimental import pallas as pl
from jax.experimental.pallas import tpu as pltpu

# ----------------------------- model hyper-parameters -----------------------------
B = 4                       # real batch
BP = 8                      # batch padded to one sublane group
T = 8                       # max history length
E = 4                       # embed_size
N_HIST_FEATS = 2            # features per (target / hist) item
D = N_HIST_FEATS * E        # input_size = 8
SPARSE_LEN = 3
DENSE_LEN = 1
OTHER = E * SPARSE_LEN + DENSE_LEN     # 13  (sparse emb ++ dense)
FEAT_NUM = 100
ATT_H = (64, 16)            # att_hidden_units
DNN_H = (256, 128)          # dnn_hidden_units
DNN_IN = D + OTHER          # 21


def _mm(a, b):
    return jnp.dot(a, b, preferred_element_type=jnp.float32)


# --------------------------------- fused Pallas kernel ----------------------------
def dien_fused_kernel(
    # data
    keys_ref,        # (T*BP, D)  time-major flattened history embeddings, row = t*BP + b
    q_ref,           # (BP, D)    target-item embedding
    other_ref,       # (BP, OTHER) sparse emb ++ dense feature
    len_ref,         # (BP, 1)    int32 valid lengths
    # InterestExtractor GRU, gate-split & stacked [r, z, n]
    g_wih_ref, g_whh_ref, g_bih_ref, g_bhh_ref,    # (3,D,D),(3,D,D),(3,1,D),(3,1,D)
    # attention local-activation MLP (W1 pre-combined in the wrapper)
    a_w1q_ref, a_w1k_ref, a_w1p_ref, a_b1_ref,     # (D,H1)x3, (1,H1)
    a_w2_ref, a_b2_ref, a_w3_ref, a_b3_ref,        # (H1,H2),(1,H2),(H2,1),(1,1)
    # AUGRU (interest evolution), gate-split & stacked [r, z, n]
    u_wih_ref, u_whh_ref, u_bih_ref, u_bhh_ref,
    # BN + DNN head, split into hist / other column groups
    bn_gh_ref, bn_go_ref, bn_bh_ref, bn_bo_ref,    # (1,D),(1,OTHER),(1,D),(1,OTHER)
    d_w1h_ref, d_w1o_ref, d_b1_ref,                # (D,H_1),(OTHER,H_1),(1,H_1)
    d_w2_ref, d_b2_ref, d_w3_ref, d_b3_ref,        # (H_1,H_2),(1,H_2),(H_2,1),(1,1)
    # output
    out_ref,                                       # (BP, 1)
    # scratch
    gi_r_ref, gi_z_ref, gi_n_ref,                  # (T*BP, D) hoisted GRU input projections
    ints_ref,                                      # (T*BP, D) GRU interests (padded with 0)
    agi_r_ref, agi_z_ref, agi_n_ref,               # (T*BP, D) hoisted AUGRU input projections
    att_ref,                                       # (T*BP, 1) attention weights
):
    f32 = jnp.float32
    lens = len_ref[...]                            # (BP, 1) int32
    keys = keys_ref[...]                           # (T*BP, D)

    # ---------------- 1) InterestExtractor GRU ----------------
    # Hoist x @ W_ih out of the recurrent loop (one M = T*BP matmul per gate).
    gi_r_ref[...] = _mm(keys, g_wih_ref[0]) + g_bih_ref[0]
    gi_z_ref[...] = _mm(keys, g_wih_ref[1]) + g_bih_ref[1]
    gi_n_ref[...] = _mm(keys, g_wih_ref[2]) + g_bih_ref[2]

    g_whh_r, g_whh_z, g_whh_n = g_whh_ref[0], g_whh_ref[1], g_whh_ref[2]
    g_bhh_r, g_bhh_z, g_bhh_n = g_bhh_ref[0], g_bhh_ref[1], g_bhh_ref[2]

    def gru_step(t, h):
        off = pl.multiple_of(t * BP, BP)
        gh_r = _mm(h, g_whh_r) + g_bhh_r
        gh_z = _mm(h, g_whh_z) + g_bhh_z
        gh_n = _mm(h, g_whh_n) + g_bhh_n
        r = jax.nn.sigmoid(gi_r_ref[pl.ds(off, BP), :] + gh_r)
        z = jax.nn.sigmoid(gi_z_ref[pl.ds(off, BP), :] + gh_z)
        n = jnp.tanh(gi_n_ref[pl.ds(off, BP), :] + r * gh_n)
        h_new = (1.0 - z) * n + z * h              # PyTorch GRU update
        valid = t < lens                           # (BP, 1) bool
        ints_ref[pl.ds(off, BP), :] = jnp.where(valid, h_new, 0.0)   # pad_packed pad=0
        return jnp.where(valid, h_new, h)

    jax.lax.fori_loop(0, T, gru_step, jnp.zeros((BP, D), f32), unroll=True)

    # ---------------- 2) Attention (LocalActivationUnit + masked softmax) ----------------
    ints = ints_ref[...]                           # (T*BP, D)
    q_rep = jnp.concatenate([q_ref[...]] * T, axis=0)    # (T*BP, D), aligned tile copies
    h1 = jnp.maximum(_mm(ints, a_w1k_ref[...])
                     + _mm(ints * q_rep, a_w1p_ref[...])
                     + _mm(q_rep, a_w1q_ref[...]) + a_b1_ref[...], 0.0)   # relu
    h2 = jnp.maximum(_mm(h1, a_w2_ref[...]) + a_b2_ref[...], 0.0)
    s = _mm(h2, a_w3_ref[...]) + a_b3_ref[...]     # (T*BP, 1)

    neg = f32(-(2.0 ** 32) + 1.0)                  # weight_normalization=True mask value
    parts = []
    m = None
    for k in range(T):                             # static unroll at trace time
        pk = jnp.where(k < lens, s[k * BP:(k + 1) * BP], neg)
        parts.append(pk)
        m = pk if m is None else jnp.maximum(m, pk)
    es = [jnp.exp(p - m) for p in parts]
    den = es[0]
    for e in es[1:]:
        den = den + e
    inv = pl.reciprocal(den, approx=True)          # EUP reciprocal
    for k in range(T):
        att_ref[pl.ds(k * BP, BP), :] = es[k] * inv

    # ---------------- 3) AUGRU interest evolution ----------------
    agi_r_ref[...] = _mm(ints, u_wih_ref[0]) + u_bih_ref[0]
    agi_z_ref[...] = _mm(ints, u_wih_ref[1]) + u_bih_ref[1]
    agi_n_ref[...] = _mm(ints, u_wih_ref[2]) + u_bih_ref[2]

    u_whh_r, u_whh_z, u_whh_n = u_whh_ref[0], u_whh_ref[1], u_whh_ref[2]
    u_bhh_r, u_bhh_z, u_bhh_n = u_bhh_ref[0], u_bhh_ref[1], u_bhh_ref[2]

    def augru_step(t, h):
        off = pl.multiple_of(t * BP, BP)
        a = att_ref[pl.ds(off, BP), :]             # (BP, 1)
        gh_r = _mm(h, u_whh_r) + u_bhh_r
        gh_z = _mm(h, u_whh_z) + u_bhh_z
        gh_n = _mm(h, u_whh_n) + u_bhh_n
        r = jax.nn.sigmoid(agi_r_ref[pl.ds(off, BP), :] + gh_r)
        uu = jax.nn.sigmoid(agi_z_ref[pl.ds(off, BP), :] + gh_z)
        n = jnp.tanh(agi_n_ref[pl.ds(off, BP), :] + r * gh_n)
        uu = a * uu                                # attention-scaled update gate
        h_new = (1.0 - uu) * h + uu * n            # AUGRUCell update
        valid = t < lens
        return jnp.where(valid, h_new, h)          # final h == state at step len-1 (0 if len==0)

    hist = jax.lax.fori_loop(0, T, augru_step, jnp.zeros((BP, D), f32), unroll=True)

    # ---------------- 4) BatchNorm1d (train-mode batch stats) + DNN head ----------------
    other = other_ref[...]                         # (BP, OTHER)
    rmask = (jax.lax.broadcasted_iota(jnp.int32, (BP, 1), 0) < B).astype(f32)
    inv_b = f32(1.0 / B)

    def bn(x, g, be):                              # stats over the B real rows only
        mean = jnp.sum(x * rmask, axis=0, keepdims=True) * inv_b
        xc = x - mean
        var = jnp.sum(xc * xc * rmask, axis=0, keepdims=True) * inv_b
        return xc * jax.lax.rsqrt(var + 1e-5) * g + be

    hn = bn(hist, bn_gh_ref[...], bn_bh_ref[...])
    on = bn(other, bn_go_ref[...], bn_bo_ref[...])
    d1 = jnp.maximum(_mm(hn, d_w1h_ref[...]) + _mm(on, d_w1o_ref[...]) + d_b1_ref[...], 0.0)
    d2 = jnp.maximum(_mm(d1, d_w2_ref[...]) + d_b2_ref[...], 0.0)
    out_ref[...] = _mm(d2, d_w3_ref[...]) + d_b3_ref[...]


# ----------------------------------- forward ---------------------------------------
def dien_forward(params, target_item, hist_item, neg_hist_item, hist_valid_lens,
                 dense_feature, sparse_feature):
    del neg_hist_item  # only used when use_negsampling=True (aux loss == zeros here)
    emb = params["embedding"]

    target_emb = jnp.take(emb, target_item, axis=0).reshape(B, -1).astype(jnp.float32)     # (B, D)
    hist_emb = jnp.take(emb, hist_item, axis=0).reshape(B, T, -1).astype(jnp.float32)      # (B, T, D)
    sparse_emb = jnp.take(emb, sparse_feature, axis=0).reshape(B, -1).astype(jnp.float32)  # (B, SL*E)

    # time-major, batch padded to BP (one sublane group), flattened to (T*BP, D)
    keys_tm = jnp.transpose(hist_emb, (1, 0, 2))                                           # (T, B, D)
    keys_tm = jnp.pad(keys_tm, ((0, 0), (0, BP - B), (0, 0)))
    keys_flat = keys_tm.reshape(T * BP, D)

    q_pad = jnp.pad(target_emb, ((0, BP - B), (0, 0)))
    if DENSE_LEN != 0:
        other = jnp.concatenate([sparse_emb, dense_feature.reshape(-1, 1)], axis=-1)       # (B, OTHER)
    else:
        other = sparse_emb
    other_pad = jnp.pad(other, ((0, BP - B), (0, 0)))
    lens_pad = jnp.pad(hist_valid_lens.astype(jnp.int32), (0, BP - B)).reshape(BP, 1)

    # ---- trace-time weight re-layout (done by XLA outside the kernel; zero kernel cost) ----
    def split_gates_w(w):   # (D, 3D) -> (3, D, D), PyTorch gate order [r, z, n]
        return jnp.stack(jnp.split(w, 3, axis=1), axis=0)

    def split_gates_b(b):   # (1, 3D) -> (3, 1, D)
        return jnp.stack(jnp.split(b, 3, axis=1), axis=0)

    g_wih = split_gates_w(params["gru_wih"]);   g_whh = split_gates_w(params["gru_whh"])
    g_bih = split_gates_b(params["gru_bih"]);   g_bhh = split_gates_b(params["gru_bhh"])
    u_wih = split_gates_w(params["augru_wih"]); u_whh = split_gates_w(params["augru_whh"])
    u_bih = split_gates_b(params["augru_bih"]); u_bhh = split_gates_b(params["augru_bhh"])

    # concat([q, k, q-k, q*k]) @ W1 == q@(W1q+W1d) + k@(W1k-W1d) + (q*k)@W1p
    w1q, w1k, w1d, w1p = jnp.split(params["att_w1"], 4, axis=0)
    a_w1q = w1q + w1d
    a_w1k = w1k - w1d
    a_w1p = w1p

    bn_gh = params["bn_gamma"][:, :D];  bn_go = params["bn_gamma"][:, D:]
    bn_bh = params["bn_beta"][:, :D];   bn_bo = params["bn_beta"][:, D:]
    d_w1h = params["dnn_w1"][:D];       d_w1o = params["dnn_w1"][D:]

    n_in = 31
    y_pad = pl.pallas_call(
        dien_fused_kernel,
        out_shape=jax.ShapeDtypeStruct((BP, 1), jnp.float32),
        in_specs=[pl.BlockSpec(memory_space=pltpu.MemorySpace.VMEM)] * n_in,
        out_specs=pl.BlockSpec(memory_space=pltpu.MemorySpace.VMEM),
        scratch_shapes=(
            [pltpu.VMEM((T * BP, D), jnp.float32) for _ in range(7)]
            + [pltpu.VMEM((T * BP, 1), jnp.float32)]
        ),
    )(keys_flat, q_pad, other_pad, lens_pad,
      g_wih, g_whh, g_bih, g_bhh,
      a_w1q, a_w1k, a_w1p, params["att_b1"], params["att_w2"], params["att_b2"],
      params["att_w3"], params["att_b3"],
      u_wih, u_whh, u_bih, u_bhh,
      bn_gh, bn_go, bn_bh, bn_bo,
      d_w1h, d_w1o, params["dnn_b1"], params["dnn_w2"], params["dnn_b2"],
      params["out_w"], params["out_b"])

    y_pred = y_pad[:B]                              # drop padded batch rows
    aux_loss = jnp.zeros((1,), jnp.float32)         # use_negsampling=False path
    return y_pred, aux_loss


# --------------------------------- parameter init ----------------------------------
def init_params(key):
    def nrm(k, shape, std=0.05):
        return (std * jax.random.normal(k, shape)).astype(jnp.float32)

    ks = iter(jax.random.split(key, 24))
    return {
        "embedding": nrm(next(ks), (FEAT_NUM, E), 0.1),
        # InterestExtractor GRU (PyTorch layout transposed: x @ W_ih^T -> (D, 3D))
        "gru_wih": nrm(next(ks), (D, 3 * D)), "gru_whh": nrm(next(ks), (D, 3 * D)),
        "gru_bih": nrm(next(ks), (1, 3 * D), 0.01), "gru_bhh": nrm(next(ks), (1, 3 * D), 0.01),
        # Attention local-activation MLP: Linear(4D,64)+relu, Linear(64,16)+relu, Linear(16,1)
        "att_w1": nrm(next(ks), (4 * D, ATT_H[0])), "att_b1": nrm(next(ks), (1, ATT_H[0]), 0.01),
        "att_w2": nrm(next(ks), (ATT_H[0], ATT_H[1])), "att_b2": nrm(next(ks), (1, ATT_H[1]), 0.01),
        "att_w3": nrm(next(ks), (ATT_H[1], 1)), "att_b3": nrm(next(ks), (1, 1), 0.01),
        # AUGRU cell
        "augru_wih": nrm(next(ks), (D, 3 * D)), "augru_whh": nrm(next(ks), (D, 3 * D)),
        "augru_bih": nrm(next(ks), (1, 3 * D), 0.01), "augru_bhh": nrm(next(ks), (1, 3 * D), 0.01),
        # DNN head: BatchNorm1d + Linear(21,256)/ReLU + Linear(256,128)/ReLU + Linear(128,1)
        "bn_gamma": jnp.ones((1, DNN_IN), jnp.float32),
        "bn_beta": jnp.zeros((1, DNN_IN), jnp.float32),
        "dnn_w1": nrm(next(ks), (DNN_IN, DNN_H[0])), "dnn_b1": nrm(next(ks), (1, DNN_H[0]), 0.01),
        "dnn_w2": nrm(next(ks), (DNN_H[0], DNN_H[1])), "dnn_b2": nrm(next(ks), (1, DNN_H[1]), 0.01),
        "out_w": nrm(next(ks), (DNN_H[1], 1)), "out_b": nrm(next(ks), (1, 1), 0.01),
    }


# ------------------------------------- main -----------------------------------------
if __name__ == "__main__":
    key = jax.random.PRNGKey(0)
    k_par, k_in = jax.random.split(key)
    params = init_params(k_par)

    ks = jax.random.split(k_in, 5)
    target_item = jax.random.randint(ks[0], (B, N_HIST_FEATS), 0, FEAT_NUM, dtype=jnp.int32)
    hist_item = jax.random.randint(ks[1], (B, T, N_HIST_FEATS), 0, FEAT_NUM, dtype=jnp.int32)
    neg_hist_item = jax.random.randint(ks[2], (B, T, N_HIST_FEATS), 0, FEAT_NUM, dtype=jnp.int32)
    hist_valid_lens = jnp.array([5, T, 0, 3], dtype=jnp.int32)   # includes an empty history row
    dense_feature = jax.random.normal(ks[3], (B,), dtype=jnp.float32)
    sparse_feature = jax.random.randint(ks[4], (B, SPARSE_LEN), 0, FEAT_NUM, dtype=jnp.int32)

    fwd = jax.jit(dien_forward)
    y_pred, aux_loss = fwd(params, target_item, hist_item, neg_hist_item,
                           hist_valid_lens, dense_feature, sparse_feature)
    jax.block_until_ready((y_pred, aux_loss))
    assert y_pred.shape == (B, 1) and aux_loss.shape == (1,)
    assert bool(jnp.all(jnp.isfinite(y_pred)))
    # TODO(synk): auxiliary (negative-sampling) loss branch of InterestExtractor is not
    # implemented since use_negsampling=False (module returns zeros, reproduced here).
    print("KERNEL_OK")
</pallas_src>

<mosaic_0001>
module attributes {stable_mosaic.version = 11 : i64} {
  func.func @dien_fused_kernel(%arg0: memref<64x8xf32, #tpu.memory_space<vmem>>, %arg1: memref<8x8xf32, #tpu.memory_space<vmem>>, %arg2: memref<8x13xf32, #tpu.memory_space<vmem>>, %arg3: memref<8x1xi32, #tpu.memory_space<vmem>>, %arg4: memref<3x8x8xf32, #tpu.memory_space<vmem>>, %arg5: memref<3x8x8xf32, #tpu.memory_space<vmem>>, %arg6: memref<3x1x8xf32, #tpu.memory_space<vmem>>, %arg7: memref<3x1x8xf32, #tpu.memory_space<vmem>>, %arg8: memref<8x64xf32, #tpu.memory_space<vmem>>, %arg9: memref<8x64xf32, #tpu.memory_space<vmem>>, %arg10: memref<8x64xf32, #tpu.memory_space<vmem>>, %arg11: memref<1x64xf32, #tpu.memory_space<vmem>>, %arg12: memref<64x16xf32, #tpu.memory_space<vmem>>, %arg13: memref<1x16xf32, #tpu.memory_space<vmem>>, %arg14: memref<16x1xf32, #tpu.memory_space<vmem>>, %arg15: memref<1x1xf32, #tpu.memory_space<vmem>>, %arg16: memref<3x8x8xf32, #tpu.memory_space<vmem>>, %arg17: memref<3x8x8xf32, #tpu.memory_space<vmem>>, %arg18: memref<3x1x8xf32, #tpu.memory_space<vmem>>, %arg19: memref<3x1x8xf32, #tpu.memory_space<vmem>>, %arg20: memref<1x8xf32, #tpu.memory_space<vmem>>, %arg21: memref<1x13xf32, #tpu.memory_space<vmem>>, %arg22: memref<1x8xf32, #tpu.memory_space<vmem>>, %arg23: memref<1x13xf32, #tpu.memory_space<vmem>>, %arg24: memref<8x256xf32, #tpu.memory_space<vmem>>, %arg25: memref<13x256xf32, #tpu.memory_space<vmem>>, %arg26: memref<1x256xf32, #tpu.memory_space<vmem>>, %arg27: memref<256x128xf32, #tpu.memory_space<vmem>>, %arg28: memref<1x128xf32, #tpu.memory_space<vmem>>, %arg29: memref<128x1xf32, #tpu.memory_space<vmem>>, %arg30: memref<1x1xf32, #tpu.memory_space<vmem>>, %arg31: memref<8x1xf32, #tpu.memory_space<vmem>>, %arg32: memref<64x8xf32, #tpu.memory_space<vmem>>, %arg33: memref<64x8xf32, #tpu.memory_space<vmem>>, %arg34: memref<64x8xf32, #tpu.memory_space<vmem>>, %arg35: memref<64x8xf32, #tpu.memory_space<vmem>>, %arg36: memref<64x8xf32, #tpu.memory_space<vmem>>, %arg37: memref<64x8xf32, #tpu.memory_space<vmem>>, %arg38: memref<64x8xf32, #tpu.memory_space<vmem>>, %arg39: memref<64x1xf32, #tpu.memory_space<vmem>>) attributes {dimension_semantics = [], scalar_prefetch = 0 : i64, scratch_operands = 8 : i64, tpu.core_type = #tpu.core_type<tc>} {
    %c0 = arith.constant 0 : index
    %c0_0 = arith.constant 0 : index
    %0 = vector.load %arg3[%c0, %c0_0] : memref<8x1xi32, #tpu.memory_space<vmem>>, vector<8x1xi32>
    %c0_1 = arith.constant 0 : index
    %c0_2 = arith.constant 0 : index
    %1 = vector.load %arg0[%c0_1, %c0_2] : memref<64x8xf32, #tpu.memory_space<vmem>>, vector<64x8xf32>
    %c0_3 = arith.constant 0 : index
    %c0_4 = arith.constant 0 : index
    %c0_5 = arith.constant 0 : index
    %2 = vector.load %arg4[%c0_3, %c0_4, %c0_5] : memref<3x8x8xf32, #tpu.memory_space<vmem>>, vector<1x8x8xf32>
    %3 = vector.shape_cast %2 : vector<1x8x8xf32> to vector<8x8xf32>
    %cst = arith.constant dense<0.000000e+00> : vector<64x8xf32>
    %4 = tpu.matmul %1, %3, %cst {dimension_numbers = #tpu.dot_dimension_numbers<[1], [0], [0], [1], [0, 0, 1, 1], [], []>} : vector<64x8xf32>, vector<8x8xf32>, vector<64x8xf32> -> vector<64x8xf32>
    %c0_6 = arith.constant 0 : index
    %c0_7 = arith.constant 0 : index
    %c0_8 = arith.constant 0 : index
    %5 = vector.load %arg6[%c0_6, %c0_7, %c0_8] : memref<3x1x8xf32, #tpu.memory_space<vmem>>, vector<1x1x8xf32>
    %6 = vector.shape_cast %5 : vector<1x1x8xf32> to vector<1x8xf32>
    %7 = vector.broadcast %6 : vector<1x8xf32> to vector<64x8xf32>
    %8 = arith.addf %4, %7 : vector<64x8xf32>
    %c0_9 = arith.constant 0 : index
    %c0_10 = arith.constant 0 : index
    %9 = vector.load %arg32[%c0_9, %c0_10] : memref<64x8xf32, #tpu.memory_space<vmem>>, vector<64x8xf32>
    tpu.vector_store %arg32[%c0_9, %c0_10], %8 {strides = array<i32>} : memref<64x8xf32, #tpu.memory_space<vmem>>, vector<64x8xf32>,
    %c1 = arith.constant 1 : index
    %c0_11 = arith.constant 0 : index
    %c0_12 = arith.constant 0 : index
    %10 = vector.load %arg4[%c1, %c0_11, %c0_12] : memref<3x8x8xf32, #tpu.memory_space<vmem>>, vector<1x8x8xf32>
    %11 = vector.shape_cast %10 : vector<1x8x8xf32> to vector<8x8xf32>
    %cst_13 = arith.constant dense<0.000000e+00> : vector<64x8xf32>
    %12 = tpu.matmul %1, %11, %cst_13 {dimension_numbers = #tpu.dot_dimension_numbers<[1], [0], [0], [1], [0, 0, 1, 1], [], []>} : vector<64x8xf32>, vector<8x8xf32>, vector<64x8xf32> -> vector<64x8xf32>
    %c1_14 = arith.constant 1 : index
    %c0_15 = arith.constant 0 : index
    %c0_16 = arith.constant 0 : index
    %13 = vector.load %arg6[%c1_14, %c0_15, %c0_16] : memref<3x1x8xf32, #tpu.memory_space<vmem>>, vector<1x1x8xf32>
    %14 = vector.shape_cast %13 : vector<1x1x8xf32> to vector<1x8xf32>
    %15 = vector.broadcast %14 : vector<1x8xf32> to vector<64x8xf32>
    %16 = arith.addf %12, %15 : vector<64x8xf32>
    %c0_17 = arith.constant 0 : index
    %c0_18 = arith.constant 0 : index
    %17 = vector.load %arg33[%c0_17, %c0_18] : memref<64x8xf32, #tpu.memory_space<vmem>>, vector<64x8xf32>
    tpu.vector_store %arg33[%c0_17, %c0_18], %16 {strides = array<i32>} : memref<64x8xf32, #tpu.memory_space<vmem>>, vector<64x8xf32>,
    %c2 = arith.constant 2 : index
    %c0_19 = arith.constant 0 : index
    %c0_20 = arith.constant 0 : index
    %18 = vector.load %arg4[%c2, %c0_19, %c0_20] : memref<3x8x8xf32, #tpu.memory_space<vmem>>, vector<1x8x8xf32>
    %19 = vector.shape_cast %18 : vector<1x8x8xf32> to vector<8x8xf32>
    %cst_21 = arith.constant dense<0.000000e+00> : vector<64x8xf32>
    %20 = tpu.matmul %1, %19, %cst_21 {dimension_numbers = #tpu.dot_dimension_numbers<[1], [0], [0], [1], [0, 0, 1, 1], [], []>} : vector<64x8xf32>, vector<8x8xf32>, vector<64x8xf32> -> vector<64x8xf32>
    %c2_22 = arith.constant 2 : index
    %c0_23 = arith.constant 0 : index
    %c0_24 = arith.constant 0 : index
    %21 = vector.load %arg6[%c2_22, %c0_23, %c0_24] : memref<3x1x8xf32, #tpu.memory_space<vmem>>, vector<1x1x8xf32>
    %22 = vector.shape_cast %21 : vector<1x1x8xf32> to vector<1x8xf32>
    %23 = vector.broadcast %22 : vector<1x8xf32> to vector<64x8xf32>
    %24 = arith.addf %20, %23 : vector<64x8xf32>
    %c0_25 = arith.constant 0 : index
    %c0_26 = arith.constant 0 : index
    %25 = vector.load %arg34[%c0_25, %c0_26] : memref<64x8xf32, #tpu.memory_space<vmem>>, vector<64x8xf32>
    tpu.vector_store %arg34[%c0_25, %c0_26], %24 {strides = array<i32>} : memref<64x8xf32, #tpu.memory_space<vmem>>, vector<64x8xf32>,
    %c0_27 = arith.constant 0 : index
    %c0_28 = arith.constant 0 : index
    %c0_29 = arith.constant 0 : index
    %26 = vector.load %arg5[%c0_27, %c0_28, %c0_29] : memref<3x8x8xf32, #tpu.memory_space<vmem>>, vector<1x8x8xf32>
    %27 = vector.shape_cast %26 : vector<1x8x8xf32> to vector<8x8xf32>
    %c1_30 = arith.constant 1 : index
    %c0_31 = arith.constant 0 : index
    %c0_32 = arith.constant 0 : index
    %28 = vector.load %arg5[%c1_30, %c0_31, %c0_32] : memref<3x8x8xf32, #tpu.memory_space<vmem>>, vector<1x8x8xf32>
    %29 = vector.shape_cast %28 : vector<1x8x8xf32> to vector<8x8xf32>
    %c2_33 = arith.constant 2 : index
    %c0_34 = arith.constant 0 : index
    %c0_35 = arith.constant 0 : index
    %30 = vector.load %arg5[%c2_33, %c0_34, %c0_35] : memref<3x8x8xf32, #tpu.memory_space<vmem>>, vector<1x8x8xf32>
    %31 = vector.shape_cast %30 : vector<1x8x8xf32> to vector<8x8xf32>
    %c0_36 = arith.constant 0 : index
    %c0_37 = arith.constant 0 : index
    %c0_38 = arith.constant 0 : index
    %32 = vector.load %arg7[%c0_36, %c0_37, %c0_38] : memref<3x1x8xf32, #tpu.memory_space<vmem>>, vector<1x1x8xf32>
    %33 = vector.shape_cast %32 : vector<1x1x8xf32> to vector<1x8xf32>
    %c1_39 = arith.constant 1 : index
    %c0_40 = arith.constant 0 : index
    %c0_41 = arith.constant 0 : index
    %34 = vector.load %arg7[%c1_39, %c0_40, %c0_41] : memref<3x1x8xf32, #tpu.memory_space<vmem>>, vector<1x1x8xf32>
    %35 = vector.shape_cast %34 : vector<1x1x8xf32> to vector<1x8xf32>
    %c2_42 = arith.constant 2 : index
    %c0_43 = arith.constant 0 : index
    %c0_44 = arith.constant 0 : index
    %36 = vector.load %arg7[%c2_42, %c0_43, %c0_44] : memref<3x1x8xf32, #tpu.memory_space<vmem>>, vector<1x1x8xf32>
    %37 = vector.shape_cast %36 : vector<1x1x8xf32> to vector<1x8xf32>
    %cst_45 = arith.constant 0.000000e+00 : f32
    %38 = vector.broadcast %cst_45 : f32 to vector<8x8xf32>
    %c0_i32 = arith.constant 0 : i32
    %c8_i32 = arith.constant 8 : i32
    %39 = arith.muli %c0_i32, %c8_i32 : i32
    %40 = tpu.assume_multiple %39, 8 : i32
    %cst_46 = arith.constant dense<0.000000e+00> : vector<8x8xf32>
    %41 = tpu.matmul %38, %27, %cst_46 {dimension_numbers = #tpu.dot_dimension_numbers<[1], [0], [0], [1], [0, 0, 1, 1], [], []>} : vector<8x8xf32>, vector<8x8xf32>, vector<8x8xf32> -> vector<8x8xf32>
    %42 = vector.broadcast %33 : vector<1x8xf32> to vector<8x8xf32>
    %43 = arith.addf %41, %42 : vector<8x8xf32>
    %cst_47 = arith.constant dense<0.000000e+00> : vector<8x8xf32>
    %44 = tpu.matmul %38, %29, %cst_47 {dimension_numbers = #tpu.dot_dimension_numbers<[1], [0], [0], [1], [0, 0, 1, 1], [], []>} : vector<8x8xf32>, vector<8x8xf32>, vector<8x8xf32> -> vector<8x8xf32>
    %45 = vector.broadcast %35 : vector<1x8xf32> to vector<8x8xf32>
    %46 = arith.addf %44, %45 : vector<8x8xf32>
    %cst_48 = arith.constant dense<0.000000e+00> : vector<8x8xf32>
    %47 = tpu.matmul %38, %31, %cst_48 {dimension_numbers = #tpu.dot_dimension_numbers<[1], [0], [0], [1], [0, 0, 1, 1], [], []>} : vector<8x8xf32>, vector<8x8xf32>, vector<8x8xf32> -> vector<8x8xf32>
    %48 = vector.broadcast %37 : vector<1x8xf32> to vector<8x8xf32>
    %49 = arith.addf %47, %48 : vector<8x8xf32>
    %50 = arith.index_cast %40 : i32 to index
    %c0_49 = arith.constant 0 : index
    %51 = vector.load %arg32[%50, %c0_49] : memref<64x8xf32, #tpu.memory_space<vmem>>, vector<8x8xf32>
    %52 = arith.addf %51, %43 : vector<8x8xf32>
    %53 = arith.negf %52 : vector<8x8xf32>
    %54 = math.exp %53 : vector<8x8xf32>
    %cst_50 = arith.constant 1.000000e+00 : f32
    %55 = vector.broadcast %cst_50 : f32 to vector<8x8xf32>
    %56 = arith.addf %55, %54 : vector<8x8xf32>
    %57 = arith.divf %55, %56 : vector<8x8xf32>
    %58 = arith.index_cast %40 : i32 to index
    %c0_51 = arith.constant 0 : index
    %59 = vector.load %arg33[%58, %c0_51] : memref<64x8xf32, #tpu.memory_space<vmem>>, vector<8x8xf32>
    %60 = arith.addf %59, %46 : vector<8x8xf32>
    %61 = arith.negf %60 : vector<8x8xf32>
    %62 = math.exp %61 : vector<8x8xf32>
    %cst_52 = arith.constant 1.000000e+00 : f32
    %63 = vector.broadcast %cst_52 : f32 to vector<8x8xf32>
    %64 = arith.addf %63, %62 : vector<8x8xf32>
    %65 = arith.divf %63, %64 : vector<8x8xf32>
    %66 = arith.index_cast %40 : i32 to index
    %c0_53 = arith.constant 0 : index
    %67 = vector.load %arg34[%66, %c0_53] : memref<64x8xf32, #tpu.memory_space<vmem>>, vector<8x8xf32>
    %68 = arith.mulf %57, %49 : vector<8x8xf32>
    %69 = arith.addf %67, %68 : vector<8x8xf32>
    %70 = math.tanh %69 : vector<8x8xf32>
    %cst_54 = arith.constant 1.000000e+00 : f32
    %71 = vector.broadcast %cst_54 : f32 to vector<8x8xf32>
    %72 = arith.subf %71, %65 : vector<8x8xf32>
    %73 = arith.mulf %72, %70 : vector<8x8xf32>
    %74 = arith.mulf %65, %38 : vector<8x8xf32>
    %75 = arith.addf %73, %74 : vector<8x8xf32>
    %76 = vector.broadcast %c0_i32 : i32 to vector<8x1xi32>
    %77 = arith.cmpi slt, %76, %0 : vector<8x1xi32>
    %cst_55 = arith.constant 0.000000e+00 : f32
    %78 = vector.shape_cast %77 : vector<8x1xi1> to vector<8x1xi1>
    %79 = vector.broadcast %78 : vector<8x1xi1> to vector<8x8xi1>
    %80 = vector.broadcast %cst_55 : f32 to vector<8x8xf32>
    %81 = arith.select %79, %75, %80 : vector<8x8xi1>, vector<8x8xf32>
    %82 = arith.index_cast %40 : i32 to index
    %c0_56 = arith.constant 0 : index
    %83 = vector.load %arg35[%82, %c0_56] : memref<64x8xf32, #tpu.memory_space<vmem>>, vector<8x8xf32>
    tpu.vector_store %arg35[%82, %c0_56], %81 {strides = array<i32>} : memref<64x8xf32, #tpu.memory_space<vmem>>, vector<8x8xf32>,
    %84 = vector.shape_cast %77 : vector<8x1xi1> to vector<8x1xi1>
    %85 = vector.broadcast %84 : vector<8x1xi1> to vector<8x8xi1>
    %86 = arith.select %85, %75, %38 : vector<8x8xi1>, vector<8x8xf32>
    %c1_i32 = arith.constant 1 : i32
    %c8_i32_57 = arith.constant 8 : i32
    %87 = arith.muli %c1_i32, %c8_i32_57 : i32
    %88 = tpu.assume_multiple %87, 8 : i32
    %cst_58 = arith.constant dense<0.000000e+00> : vector<8x8xf32>
    %89 = tpu.matmul %86, %27, %cst_58 {dimension_numbers = #tpu.dot_dimension_numbers<[1], [0], [0], [1], [0, 0, 1, 1], [], []>} : vector<8x8xf32>, vector<8x8xf32>, vector<8x8xf32> -> vector<8x8xf32>
    %90 = vector.broadcast %33 : vector<1x8xf32> to vector<8x8xf32>
    %91 = arith.addf %89, %90 : vector<8x8xf32>
    %cst_59 = arith.constant dense<0.000000e+00> : vector<8x8xf32>
    %92 = tpu.matmul %86, %29, %cst_59 {dimension_numbers = #tpu.dot_dimension_numbers<[1], [0], [0], [1], [0, 0, 1, 1], [], []>} : vector<8x8xf32>, vector<8x8xf32>, vector<8x8xf32> -> vector<8x8xf32>
    %93 = vector.broadcast %35 : vector<1x8xf32> to vector<8x8xf32>
    %94 = arith.addf %92, %93 : vector<8x8xf32>
    %cst_60 = arith.constant dense<0.000000e+00> : vector<8x8xf32>
    %95 = tpu.matmul %86, %31, %cst_60 {dimension_numbers = #tpu.dot_dimension_numbers<[1], [0], [0], [1], [0, 0, 1, 1], [], []>} : vector<8x8xf32>, vector<8x8xf32>, vector<8x8xf32> -> vector<8x8xf32>
    %96 = vector.broadcast %37 : vector<1x8xf32> to vector<8x8xf32>
    %97 = arith.addf %95, %96 : vector<8x8xf32>
    %98 = arith.index_cast %88 : i32 to index
    %c0_61 = arith.constant 0 : index
    %99 = vector.load %arg32[%98, %c0_61] : memref<64x8xf32, #tpu.memory_space<vmem>>, vector<8x8xf32>
    %100 = arith.addf %99, %91 : vector<8x8xf32>
    %101 = arith.negf %100 : vector<8x8xf32>
    %102 = math.exp %101 : vector<8x8xf32>
    %cst_62 = arith.constant 1.000000e+00 : f32
    %103 = vector.broadcast %cst_62 : f32 to vector<8x8xf32>
    %104 = arith.addf %103, %102 : vector<8x8xf32>
    %105 = arith.divf %103, %104 : vector<8x8xf32>
    %106 = arith.index_cast %88 : i32 to index
    %c0_63 = arith.constant 0 : index
    %107 = vector.load %arg33[%106, %c0_63] : memref<64x8xf32, #tpu.memory_space<vmem>>, vector<8x8xf32>
    %108 = arith.addf %107, %94 : vector<8x8xf32>
    %109 = arith.negf %108 : vector<8x8xf32>
    %110 = math.exp %109 : vector<8x8xf32>
    %cst_64 = arith.constant 1.000000e+00 : f32
    %111 = vector.broadcast %cst_64 : f32 to vector<8x8xf32>
    %112 = arith.addf %111, %110 : vector<8x8xf32>
    %113 = arith.divf %111, %112 : vector<8x8xf32>
    %114 = arith.index_cast %88 : i32 to index
    %c0_65 = arith.constant 0 : index
    %115 = vector.load %arg34[%114, %c0_65] : memref<64x8xf32, #tpu.memory_space<vmem>>, vector<8x8xf32>
    %116 = arith.mulf %105, %97 : vector<8x8xf32>
    %117 = arith.addf %115, %116 : vector<8x8xf32>
    %118 = math.tanh %117 : vector<8x8xf32>
    %cst_66 = arith.constant 1.000000e+00 : f32
    %119 = vector.broadcast %cst_66 : f32 to vector<8x8xf32>
    %120 = arith.subf %119, %113 : vector<8x8xf32>
    %121 = arith.mulf %120, %118 : vector<8x8xf32>
    %122 = arith.mulf %113, %86 : vector<8x8xf32>
    %123 = arith.addf %121, %122 : vector<8x8xf32>
    %124 = vector.broadcast %c1_i32 : i32 to vector<8x1xi32>
    %125 = arith.cmpi slt, %124, %0 : vector<8x1xi32>
    %cst_67 = arith.constant 0.000000e+00 : f32
    %126 = vector.shape_cast %125 : vector<8x1xi1> to vector<8x1xi1>
    %127 = vector.broadcast %126 : vector<8x1xi1> to vector<8x8xi1>
    %128 = vector.broadcast %cst_67 : f32 to vector<8x8xf32>
    %129 = arith.select %127, %123, %128 : vector<8x8xi1>, vector<8x8xf32>
    %130 = arith.index_cast %88 : i32 to index
    %c0_68 = arith.constant 0 : index
    %131 = vector.load %arg35[%130, %c0_68] : memref<64x8xf32, #tpu.memory_space<vmem>>, vector<8x8xf32>
    tpu.vector_store %arg35[%130, %c0_68], %129 {strides = array<i32>} : memref<64x8xf32, #tpu.memory_space<vmem>>, vector<8x8xf32>,
    %132 = vector.shape_cast %125 : vector<8x1xi1> to vector<8x1xi1>
    %133 = vector.broadcast %132 : vector<8x1xi1> to vector<8x8xi1>
    %134 = arith.select %133, %123, %86 : vector<8x8xi1>, vector<8x8xf32>
    %c2_i32 = arith.constant 2 : i32
    %c8_i32_69 = arith.constant 8 : i32
    %135 = arith.muli %c2_i32, %c8_i32_69 : i32
    %136 = tpu.assume_multiple %135, 8 : i32
    %cst_70 = arith.constant dense<0.000000e+00> : vector<8x8xf32>
    %137 = tpu.matmul %134, %27, %cst_70 {dimension_numbers = #tpu.dot_dimension_numbers<[1], [0], [0], [1], [0, 0, 1, 1], [], []>} : vector<8x8xf32>, vector<8x8xf32>, vector<8x8xf32> -> vector<8x8xf32>
    %138 = vector.broadcast %33 : vector<1x8xf32> to vector<8x8xf32>
    %139 = arith.addf %137, %138 : vector<8x8xf32>
    %cst_71 = arith.constant dense<0.000000e+00> : vector<8x8xf32>
    %140 = tpu.matmul %134, %29, %cst_71 {dimension_numbers = #tpu.dot_dimension_numbers<[1], [0], [0], [1], [0, 0, 1, 1], [], []>} : vector<8x8xf32>, vector<8x8xf32>, vector<8x8xf32> -> vector<8x8xf32>
    %141 = vector.broadcast %35 : vector<1x8xf32> to vector<8x8xf32>
    %142 = arith.addf %140, %141 : vector<8x8xf32>
    %cst_72 = arith.constant dense<0.000000e+00> : vector<8x8xf32>
    %143 = tpu.matmul %134, %31, %cst_72 {dimension_numbers = #tpu.dot_dimension_numbers<[1], [0], [0], [1], [0, 0, 1, 1], [], []>} : vector<8x8xf32>, vector<8x8xf32>, vector<8x8xf32> -> vector<8x8xf32>
    %144 = vector.broadcast %37 : vector<1x8xf32> to vector<8x8xf32>
    %145 = arith.addf %143, %144 : vector<8x8xf32>
    %146 = arith.index_cast %136 : i32 to index
    %c0_73 = arith.constant 0 : index
    %147 = vector.load %arg32[%146, %c0_73] : memref<64x8xf32, #tpu.memory_space<vmem>>, vector<8x8xf32>
    %148 = arith.addf %147, %139 : vector<8x8xf32>
    %149 = arith.negf %148 : vector<8x8xf32>
    %150 = math.exp %149 : vector<8x8xf32>
    %cst_74 = arith.constant 1.000000e+00 : f32
    %151 = vector.broadcast %cst_74 : f32 to vector<8x8xf32>
    %152 = arith.addf %151, %150 : vector<8x8xf32>
    %153 = arith.divf %151, %152 : vector<8x8xf32>
    %154 = arith.index_cast %136 : i32 to index
    %c0_75 = arith.constant 0 : index
    %155 = vector.load %arg33[%154, %c0_75] : memref<64x8xf32, #tpu.memory_space<vmem>>, vector<8x8xf32>
    %156 = arith.addf %155, %142 : vector<8x8xf32>
    %157 = arith.negf %156 : vector<8x8xf32>
    %158 = math.exp %157 : vector<8x8xf32>
    %cst_76 = arith.constant 1.000000e+00 : f32
    %159 = vector.broadcast %cst_76 : f32 to vector<8x8xf32>
    %160 = arith.addf %159, %158 : vector<8x8xf32>
    %161 = arith.divf %159, %160 : vector<8x8xf32>
    %162 = arith.index_cast %136 : i32 to index
    %c0_77 = arith.constant 0 : index
    %163 = vector.load %arg34[%162, %c0_77] : memref<64x8xf32, #tpu.memory_space<vmem>>, vector<8x8xf32>
    %164 = arith.mulf %153, %145 : vector<8x8xf32>
    %165 = arith.addf %163, %164 : vector<8x8xf32>
    %166 = math.tanh %165 : vector<8x8xf32>
    %cst_78 = arith.constant 1.000000e+00 : f32
    %167 = vector.broadcast %cst_78 : f32 to vector<8x8xf32>
    %168 = arith.subf %167, %161 : vector<8x8xf32>
    %169 = arith.mulf %168, %166 : vector<8x8xf32>
    %170 = arith.mulf %161, %134 : vector<8x8xf32>
    %171 = arith.addf %169, %170 : vector<8x8xf32>
    %172 = vector.broadcast %c2_i32 : i32 to vector<8x1xi32>
    %173 = arith.cmpi slt, %172, %0 : vector<8x1xi32>
    %cst_79 = arith.constant 0.000000e+00 : f32
    %174 = vector.shape_cast %173 : vector<8x1xi1> to vector<8x1xi1>
    %175 = vector.broadcast %174 : vector<8x1xi1> to vector<8x8xi1>
    %176 = vector.broadcast %cst_79 : f32 to vector<8x8xf32>
    %177 = arith.select %175, %171, %176 : vector<8x8xi1>, vector<8x8xf32>
    %178 = arith.index_cast %136 : i32 to index
    %c0_80 = arith.constant 0 : index
    %179 = vector.load %arg35[%178, %c0_80] : memref<64x8xf32, #tpu.memory_space<vmem>>, vector<8x8xf32>
    tpu.vector_store %arg35[%178, %c0_80], %177 {strides = array<i32>} : memref<64x8xf32, #tpu.memory_space<vmem>>, vector<8x8xf32>,
    %180 = vector.shape_cast %173 : vector<8x1xi1> to vector<8x1xi1>
    %181 = vector.broadcast %180 : vector<8x1xi1> to vector<8x8xi1>
    %182 = arith.select %181, %171, %134 : vector<8x8xi1>, vector<8x8xf32>
    %c3_i32 = arith.constant 3 : i32
    %c8_i32_81 = arith.constant 8 : i32
    %183 = arith.muli %c3_i32, %c8_i32_81 : i32
    %184 = tpu.assume_multiple %183, 8 : i32
    %cst_82 = arith.constant dense<0.000000e+00> : vector<8x8xf32>
    %185 = tpu.matmul %182, %27, %cst_82 {dimension_numbers = #tpu.dot_dimension_numbers<[1], [0], [0], [1], [0, 0, 1, 1], [], []>} : vector<8x8xf32>, vector<8x8xf32>, vector<8x8xf32> -> vector<8x8xf32>
    %186 = vector.broadcast %33 : vector<1x8xf32> to vector<8x8xf32>
    %187 = arith.addf %185, %186 : vector<8x8xf32>
    %cst_83 = arith.constant dense<0.000000e+00> : vector<8x8xf32>
    %188 = tpu.matmul %182, %29, %cst_83 {dimension_numbers = #tpu.dot_dimension_numbers<[1], [0], [0], [1], [0, 0, 1, 1], [], []>} : vector<8x8xf32>, vector<8x8xf32>, vector<8x8xf32> -> vector<8x8xf32>
    %189 = vector.broadcast %35 : vector<1x8xf32> to vector<8x8xf32>
    %190 = arith.addf %188, %189 : vector<8x8xf32>
    %cst_84 = arith.constant dense<0.000000e+00> : vector<8x8xf32>
    %191 = tpu.matmul %182, %31, %cst_84 {dimension_numbers = #tpu.dot_dimension_numbers<[1], [0], [0], [1], [0, 0, 1, 1], [], []>} : vector<8x8xf32>, vector<8x8xf32>, vector<8x8xf32> -> vector<8x8xf32>
    %192 = vector.broadcast %37 : vector<1x8xf32> to vector<8x8xf32>
    %193 = arith.addf %191, %192 : vector<8x8xf32>
    %194 = arith.index_cast %184 : i32 to index
    %c0_85 = arith.constant 0 : index
    %195 = vector.load %arg32[%194, %c0_85] : memref<64x8xf32, #tpu.memory_space<vmem>>, vector<8x8xf32>
    %196 = arith.addf %195, %187 : vector<8x8xf32>
    %197 = arith.negf %196 : vector<8x8xf32>
    %198 = math.exp %197 : vector<8x8xf32>
    %cst_86 = arith.constant 1.000000e+00 : f32
    %199 = vector.broadcast %cst_86 : f32 to vector<8x8xf32>
    %200 = arith.addf %199, %198 : vector<8x8xf32>
    %201 = arith.divf %199, %200 : vector<8x8xf32>
    %202 = arith.index_cast %184 : i32 to index
    %c0_87 = arith.constant 0 : index
    %203 = vector.load %arg33[%202, %c0_87] : memref<64x8xf32, #tpu.memory_space<vmem>>, vector<8x8xf32>
    %204 = arith.addf %203, %190 : vector<8x8xf32>
    %205 = arith.negf %204 : vector<8x8xf32>
    %206 = math.exp %205 : vector<8x8xf32>
    %cst_88 = arith.constant 1.000000e+00 : f32
    %207 = vector.broadcast %cst_88 : f32 to vector<8x8xf32>
    %208 = arith.addf %207, %206 : vector<8x8xf32>
    %209 = arith.divf %207, %208 : vector<8x8xf32>
    %210 = arith.index_cast %184 : i32 to index
    %c0_89 = arith.constant 0 : index
    %211 = vector.load %arg34[%210, %c0_89] : memref<64x8xf32, #tpu.memory_space<vmem>>, vector<8x8xf32>
    %212 = arith.mulf %201, %193 : vector<8x8xf32>
    %213 = arith.addf %211, %212 : vector<8x8xf32>
    %214 = math.tanh %213 : vector<8x8xf32>
    %cst_90 = arith.constant 1.000000e+00 : f32
    %215 = vector.broadcast %cst_90 : f32 to vector<8x8xf32>
    %216 = arith.subf %215, %209 : vector<8x8xf32>
    %217 = arith.mulf %216, %214 : vector<8x8xf32>
    %218 = arith.mulf %209, %182 : vector<8x8xf32>
    %219 = arith.addf %217, %218 : vector<8x8xf32>
    %220 = vector.broadcast %c3_i32 : i32 to vector<8x1xi32>
    %221 = arith.cmpi slt, %220, %0 : vector<8x1xi32>
    %cst_91 = arith.constant 0.000000e+00 : f32
    %222 = vector.shape_cast %221 : vector<8x1xi1> to vector<8x1xi1>
    %223 = vector.broadcast %222 : vector<8x1xi1> to vector<8x8xi1>
    %224 = vector.broadcast %cst_91 : f32 to vector<8x8xf32>
    %225 = arith.select %223, %219, %224 : vector<8x8xi1>, vector<8x8xf32>
    %226 = arith.index_cast %184 : i32 to index
    %c0_92 = arith.constant 0 : index
    %227 = vector.load %arg35[%226, %c0_92] : memref<64x8xf32, #tpu.memory_space<vmem>>, vector<8x8xf32>
    tpu.vector_store %arg35[%226, %c0_92], %225 {strides = array<i32>} : memref<64x8xf32, #tpu.memory_space<vmem>>, vector<8x8xf32>,
    %228 = vector.shape_cast %221 : vector<8x1xi1> to vector<8x1xi1>
    %229 = vector.broadcast %228 : vector<8x1xi1> to vector<8x8xi1>
    %230 = arith.select %229, %219, %182 : vector<8x8xi1>, vector<8x8xf32>
    %c4_i32 = arith.constant 4 : i32
    %c8_i32_93 = arith.constant 8 : i32
    %231 = arith.muli %c4_i32, %c8_i32_93 : i32
    %232 = tpu.assume_multiple %231, 8 : i32
    %cst_94 = arith.constant dense<0.000000e+00> : vector<8x8xf32>
    %233 = tpu.matmul %230, %27, %cst_94 {dimension_numbers = #tpu.dot_dimension_numbers<[1], [0], [0], [1], [0, 0, 1, 1], [], []>} : vector<8x8xf32>, vector<8x8xf32>, vector<8x8xf32> -> vector<8x8xf32>
    %234 = vector.broadcast %33 : vector<1x8xf32> to vector<8x8xf32>
    %235 = arith.addf %233, %234 : vector<8x8xf32>
    %cst_95 = arith.constant dense<0.000000e+00> : vector<8x8xf32>
    %236 = tpu.matmul %230, %29, %cst_95 {dimension_numbers = #tpu.dot_dimension_numbers<[1], [0], [0], [1], [0, 0, 1, 1], [], []>} : vector<8x8xf32>, vector<8x8xf32>, vector<8x8xf32> -> vector<8x8xf32>
    %237 = vector.broadcast %35 : vector<1x8xf32> to vector<8x8xf32>
    %238 = arith.addf %236, %237 : vector<8x8xf32>
    %cst_96 = arith.constant dense<0.000000e+00> : vector<8x8xf32>
    %239 = tpu.matmul %230, %31, %cst_96 {dimension_numbers = #tpu.dot_dimension_numbers<[1], [0], [0], [1], [0, 0, 1, 1], [], []>} : vector<8x8xf32>, vector<8x8xf32>, vector<8x8xf32> -> vector<8x8xf32>
    %240 = vector.broadcast %37 : vector<1x8xf32> to vector<8x8xf32>
    %241 = arith.addf %239, %240 : vector<8x8xf32>
    %242 = arith.index_cast %232 : i32 to index
    %c0_97 = arith.constant 0 : index
    %243 = vector.load %arg32[%242, %c0_97] : memref<64x8xf32, #tpu.memory_space<vmem>>, vector<8x8xf32>
    %244 = arith.addf %243, %235 : vector<8x8xf32>
    %245 = arith.negf %244 : vector<8x8xf32>
    %246 = math.exp %245 : vector<8x8xf32>
    %cst_98 = arith.constant 1.000000e+00 : f32
    %247 = vector.broadcast %cst_98 : f32 to vector<8x8xf32>
    %248 = arith.addf %247, %246 : vector<8x8xf32>
    %249 = arith.divf %247, %248 : vector<8x8xf32>
    %250 = arith.index_cast %232 : i32 to index
    %c0_99 = arith.constant 0 : index
    %251 = vector.load %arg33[%250, %c0_99] : memref<64x8xf32, #tpu.memory_space<vmem>>, vector<8x8xf32>
    %252 = arith.addf %251, %238 : vector<8x8xf32>
    %253 = arith.negf %252 : vector<8x8xf32>
    %254 = math.exp %253 : vector<8x8xf32>
    %cst_100 = arith.constant 1.000000e+00 : f32
    %255 = vector.broadcast %cst_100 : f32 to vector<8x8xf32>
    %256 = arith.addf %255, %254 : vector<8x8xf32>
    %257 = arith.divf %255, %256 : vector<8x8xf32>
    %258 = arith.index_cast %232 : i32 to index
    %c0_101 = arith.constant 0 : index
    %259 = vector.load %arg34[%258, %c0_101] : memref<64x8xf32, #tpu.memory_space<vmem>>, vector<8x8xf32>
    %260 = arith.mulf %249, %241 : vector<8x8xf32>
    %261 = arith.addf %259, %260 : vector<8x8xf32>
    %262 = math.tanh %261 : vector<8x8xf32>
    %cst_102 = arith.constant 1.000000e+00 : f32
    %263 = vector.broadcast %cst_102 : f32 to vector<8x8xf32>
    %264 = arith.subf %263, %257 : vector<8x8xf32>
    %265 = arith.mulf %264, %262 : vector<8x8xf32>
    %266 = arith.mulf %257, %230 : vector<8x8xf32>
    %267 = arith.addf %265, %266 : vector<8x8xf32>
    %268 = vector.broadcast %c4_i32 : i32 to vector<8x1xi32>
    %269 = arith.cmpi slt, %268, %0 : vector<8x1xi32>
    %cst_103 = arith.constant 0.000000e+00 : f32
    %270 = vector.shape_cast %269 : vector<8x1xi1> to vector<8x1xi1>
    %271 = vector.broadcast %270 : vector<8x1xi1> to vector<8x8xi1>
    %272 = vector.broadcast %cst_103 : f32 to vector<8x8xf32>
    %273 = arith.select %271, %267, %272 : vector<8x8xi1>, vector<8x8xf32>
    %274 = arith.index_cast %232 : i32 to index
    %c0_104 = arith.constant 0 : index
    %275 = vector.load %arg35[%274, %c0_104] : memref<64x8xf32, #tpu.memory_space<vmem>>, vector<8x8xf32>
    tpu.vector_store %arg35[%274, %c0_104], %273 {strides = array<i32>} : memref<64x8xf32, #tpu.memory_space<vmem>>, vector<8x8xf32>,
    %276 = vector.shape_cast %269 : vector<8x1xi1> to vector<8x1xi1>
    %277 = vector.broadcast %276 : vector<8x1xi1> to vector<8x8xi1>
    %278 = arith.select %277, %267, %230 : vector<8x8xi1>, vector<8x8xf32>
    %c5_i32 = arith.constant 5 : i32
    %c8_i32_105 = arith.constant 8 : i32
    %279 = arith.muli %c5_i32, %c8_i32_105 : i32
    %280 = tpu.assume_multiple %279, 8 : i32
    %cst_106 = arith.constant dense<0.000000e+00> : vector<8x8xf32>
    %281 = tpu.matmul %278, %27, %cst_106 {dimension_numbers = #tpu.dot_dimension_numbers<[1], [0], [0], [1], [0, 0, 1, 1], [], []>} : vector<8x8xf32>, vector<8x8xf32>, vector<8x8xf32> -> vector<8x8xf32>
    %282 = vector.broadcast %33 : vector<1x8xf32> to vector<8x8xf32>
    %283 = arith.addf %281, %282 : vector<8x8xf32>
    %cst_107 = arith.constant dense<0.000000e+00> : vector<8x8xf32>
    %284 = tpu.matmul %278, %29, %cst_107 {dimension_numbers = #tpu.dot_dimension_numbers<[1], [0], [0], [1], [0, 0, 1, 1], [], []>} : vector<8x8xf32>, vector<8x8xf32>, vector<8x8xf32> -> vector<8x8xf32>
    %285 = vector.broadcast %35 : vector<1x8xf32> to vector<8x8xf32>
    %286 = arith.addf %284, %285 : vector<8x8xf32>
    %cst_108 = arith.constant dense<0.000000e+00> : vector<8x8xf32>
    %287 = tpu.matmul %278, %31, %cst_108 {dimension_numbers = #tpu.dot_dimension_numbers<[1], [0], [0], [1], [0, 0, 1, 1], [], []>} : vector<8x8xf32>, vector<8x8xf32>, vector<8x8xf32> -> vector<8x8xf32>
    %288 = vector.broadcast %37 : vector<1x8xf32> to vector<8x8xf32>
    %289 = arith.addf %287, %288 : vector<8x8xf32>
    %290 = arith.index_cast %280 : i32 to index
    %c0_109 = arith.constant 0 : index
    %291 = vector.load %arg32[%290, %c0_109] : memref<64x8xf32, #tpu.memory_space<vmem>>, vector<8x8xf32>
    %292 = arith.addf %291, %283 : vector<8x8xf32>
    %293 = arith.negf %292 : vector<8x8xf32>
    %294 = math.exp %293 : vector<8x8xf32>
    %cst_110 = arith.constant 1.000000e+00 : f32
    %295 = vector.broadcast %cst_110 : f32 to vector<8x8xf32>
    %296 = arith.addf %295, %294 : vector<8x8xf32>
    %297 = arith.divf %295, %296 : vector<8x8xf32>
    %298 = arith.index_cast %280 : i32 to index
    %c0_111 = arith.constant 0 : index
    %299 = vector.load %arg33[%298, %c0_111] : memref<64x8xf32, #tpu.memory_space<vmem>>, vector<8x8xf32>
    %300 = arith.addf %299, %286 : vector<8x8xf32>
    %301 = arith.negf %300 : vector<8x8xf32>
    %302 = math.exp %301 : vector<8x8xf32>
    %cst_112 = arith.constant 1.000000e+00 : f32
    %303 = vector.broadcast %cst_112 : f32 to vector<8x8xf32>
    %304 = arith.addf %303, %302 : vector<8x8xf32>
    %305 = arith.divf %303, %304 : vector<8x8xf32>
    %306 = arith.index_cast %280 : i32 to index
    %c0_113 = arith.constant 0 : index
    %307 = vector.load %arg34[%306, %c0_113] : memref<64x8xf32, #tpu.memory_space<vmem>>, vector<8x8xf32>
    %308 = arith.mulf %297, %289 : vector<8x8xf32>
    %309 = arith.addf %307, %308 : vector<8x8xf32>
    %310 = math.tanh %309 : vector<8x8xf32>
    %cst_114 = arith.constant 1.000000e+00 : f32
    %311 = vector.broadcast %cst_114 : f32 to vector<8x8xf32>
    %312 = arith.subf %311, %305 : vector<8x8xf32>
    %313 = arith.mulf %312, %310 : vector<8x8xf32>
    %314 = arith.mulf %305, %278 : vector<8x8xf32>
    %315 = arith.addf %313, %314 : vector<8x8xf32>
    %316 = vector.broadcast %c5_i32 : i32 to vector<8x1xi32>
    %317 = arith.cmpi slt, %316, %0 : vector<8x1xi32>
    %cst_115 = arith.constant 0.000000e+00 : f32
    %318 = vector.shape_cast %317 : vector<8x1xi1> to vector<8x1xi1>
    %319 = vector.broadcast %318 : vector<8x1xi1> to vector<8x8xi1>
    %320 = vector.broadcast %cst_115 : f32 to vector<8x8xf32>
    %321 = arith.select %319, %315, %320 : vector<8x8xi1>, vector<8x8xf32>
    %322 = arith.index_cast %280 : i32 to index
    %c0_116 = arith.constant 0 : index
    %323 = vector.load %arg35[%322, %c0_116] : memref<64x8xf32, #tpu.memory_space<vmem>>, vector<8x8xf32>
    tpu.vector_store %arg35[%322, %c0_116], %321 {strides = array<i32>} : memref<64x8xf32, #tpu.memory_space<vmem>>, vector<8x8xf32>,
    %324 = vector.shape_cast %317 : vector<8x1xi1> to vector<8x1xi1>
    %325 = vector.broadcast %324 : vector<8x1xi1> to vector<8x8xi1>
    %326 = arith.select %325, %315, %278 : vector<8x8xi1>, vector<8x8xf32>
    %c6_i32 = arith.constant 6 : i32
    %c8_i32_117 = arith.constant 8 : i32
    %327 = arith.muli %c6_i32, %c8_i32_117 : i32
    %328 = tpu.assume_multiple %327, 8 : i32
    %cst_118 = arith.constant dense<0.000000e+00> : vector<8x8xf32>
    %329 = tpu.matmul %326, %27, %cst_118 {dimension_numbers = #tpu.dot_dimension_numbers<[1], [0], [0], [1], [0, 0, 1, 1], [], []>} : vector<8x8xf32>, vector<8x8xf32>, vector<8x8xf32> -> vector<8x8xf32>
    %330 = vector.broadcast %33 : vector<1x8xf32> to vector<8x8xf32>
    %331 = arith.addf %329, %330 : vector<8x8xf32>
    %cst_119 = arith.constant dense<0.000000e+00> : vector<8x8xf32>
    %332 = tpu.matmul %326, %29, %cst_119 {dimension_numbers = #tpu.dot_dimension_numbers<[1], [0], [0], [1], [0, 0, 1, 1], [], []>} : vector<8x8xf32>, vector<8x8xf32>, vector<8x8xf32> -> vector<8x8xf32>
    %333 = vector.broadcast %35 : vector<1x8xf32> to vector<8x8xf32>
    %334 = arith.addf %332, %333 : vector<8x8xf32>
    %cst_120 = arith.constant dense<0.000000e+00> : vector<8x8xf32>
    %335 = tpu.matmul %326, %31, %cst_120 {dimension_numbers = #tpu.dot_dimension_numbers<[1], [0], [0], [1], [0, 0, 1, 1], [], []>} : vector<8x8xf32>, vector<8x8xf32>, vector<8x8xf32> -> vector<8x8xf32>
    %336 = vector.broadcast %37 : vector<1x8xf32> to vector<8x8xf32>
    %337 = arith.addf %335, %336 : vector<8x8xf32>
    %338 = arith.index_cast %328 : i32 to index
    %c0_121 = arith.constant 0 : index
    %339 = vector.load %arg32[%338, %c0_121] : memref<64x8xf32, #tpu.memory_space<vmem>>, vector<8x8xf32>
    %340 = arith.addf %339, %331 : vector<8x8xf32>
    %341 = arith.negf %340 : vector<8x8xf32>
    %342 = math.exp %341 : vector<8x8xf32>
    %cst_122 = arith.constant 1.000000e+00 : f32
    %343 = vector.broadcast %cst_122 : f32 to vector<8x8xf32>
    %344 = arith.addf %343, %342 : vector<8x8xf32>
    %345 = arith.divf %343, %344 : vector<8x8xf32>
    %346 = arith.index_cast %328 : i32 to index
    %c0_123 = arith.constant 0 : index
    %347 = vector.load %arg33[%346, %c0_123] : memref<64x8xf32, #tpu.memory_space<vmem>>, vector<8x8xf32>
    %348 = arith.addf %347, %334 : vector<8x8xf32>
    %349 = arith.negf %348 : vector<8x8xf32>
    %350 = math.exp %349 : vector<8x8xf32>
    %cst_124 = arith.constant 1.000000e+00 : f32
    %351 = vector.broadcast %cst_124 : f32 to vector<8x8xf32>
    %352 = arith.addf %351, %350 : vector<8x8xf32>
    %353 = arith.divf %351, %352 : vector<8x8xf32>
    %354 = arith.index_cast %328 : i32 to index
    %c0_125 = arith.constant 0 : index
    %355 = vector.load %arg34[%354, %c0_125] : memref<64x8xf32, #tpu.memory_space<vmem>>, vector<8x8xf32>
    %356 = arith.mulf %345, %337 : vector<8x8xf32>
    %357 = arith.addf %355, %356 : vector<8x8xf32>
    %358 = math.tanh %357 : vector<8x8xf32>
    %cst_126 = arith.constant 1.000000e+00 : f32
    %359 = vector.broadcast %cst_126 : f32 to vector<8x8xf32>
    %360 = arith.subf %359, %353 : vector<8x8xf32>
    %361 = arith.mulf %360, %358 : vector<8x8xf32>
    %362 = arith.mulf %353, %326 : vector<8x8xf32>
    %363 = arith.addf %361, %362 : vector<8x8xf32>
    %364 = vector.broadcast %c6_i32 : i32 to vector<8x1xi32>
    %365 = arith.cmpi slt, %364, %0 : vector<8x1xi32>
    %cst_127 = arith.constant 0.000000e+00 : f32
    %366 = vector.shape_cast %365 : vector<8x1xi1> to vector<8x1xi1>
    %367 = vector.broadcast %366 : vector<8x1xi1> to vector<8x8xi1>
    %368 = vector.broadcast %cst_127 : f32 to vector<8x8xf32>
    %369 = arith.select %367, %363, %368 : vector<8x8xi1>, vector<8x8xf32>
    %370 = arith.index_cast %328 : i32 to index
    %c0_128 = arith.constant 0 : index
    %371 = vector.load %arg35[%370, %c0_128] : memref<64x8xf32, #tpu.memory_space<vmem>>, vector<8x8xf32>
    tpu.vector_store %arg35[%370, %c0_128], %369 {strides = array<i32>} : memref<64x8xf32, #tpu.memory_space<vmem>>, vector<8x8xf32>,
    %372 = vector.shape_cast %365 : vector<8x1xi1> to vector<8x1xi1>
    %373 = vector.broadcast %372 : vector<8x1xi1> to vector<8x8xi1>
    %374 = arith.select %373, %363, %326 : vector<8x8xi1>, vector<8x8xf32>
    %c7_i32 = arith.constant 7 : i32
    %c8_i32_129 = arith.constant 8 : i32
    %375 = arith.muli %c7_i32, %c8_i32_129 : i32
    %376 = tpu.assume_multiple %375, 8 : i32
    %cst_130 = arith.constant dense<0.000000e+00> : vector<8x8xf32>
    %377 = tpu.matmul %374, %27, %cst_130 {dimension_numbers = #tpu.dot_dimension_numbers<[1], [0], [0], [1], [0, 0, 1, 1], [], []>} : vector<8x8xf32>, vector<8x8xf32>, vector<8x8xf32> -> vector<8x8xf32>
    %378 = vector.broadcast %33 : vector<1x8xf32> to vector<8x8xf32>
    %379 = arith.addf %377, %378 : vector<8x8xf32>
    %cst_131 = arith.constant dense<0.000000e+00> : vector<8x8xf32>
    %380 = tpu.matmul %374, %29, %cst_131 {dimension_numbers = #tpu.dot_dimension_numbers<[1], [0], [0], [1], [0, 0, 1, 1], [], []>} : vector<8x8xf32>, vector<8x8xf32>, vector<8x8xf32> -> vector<8x8xf32>
    %381 = vector.broadcast %35 : vector<1x8xf32> to vector<8x8xf32>
    %382 = arith.addf %380, %381 : vector<8x8xf32>
    %cst_132 = arith.constant dense<0.000000e+00> : vector<8x8xf32>
    %383 = tpu.matmul %374, %31, %cst_132 {dimension_numbers = #tpu.dot_dimension_numbers<[1], [0], [0], [1], [0, 0, 1, 1], [], []>} : vector<8x8xf32>, vector<8x8xf32>, vector<8x8xf32> -> vector<8x8xf32>
    %384 = vector.broadcast %37 : vector<1x8xf32> to vector<8x8xf32>
    %385 = arith.addf %383, %384 : vector<8x8xf32>
    %386 = arith.index_cast %376 : i32 to index
    %c0_133 = arith.constant 0 : index
    %387 = vector.load %arg32[%386, %c0_133] : memref<64x8xf32, #tpu.memory_space<vmem>>, vector<8x8xf32>
    %388 = arith.addf %387, %379 : vector<8x8xf32>
    %389 = arith.negf %388 : vector<8x8xf32>
    %390 = math.exp %389 : vector<8x8xf32>
    %cst_134 = arith.constant 1.000000e+00 : f32
    %391 = vector.broadcast %cst_134 : f32 to vector<8x8xf32>
    %392 = arith.addf %391, %390 : vector<8x8xf32>
    %393 = arith.divf %391, %392 : vector<8x8xf32>
    %394 = arith.index_cast %376 : i32 to index
    %c0_135 = arith.constant 0 : index
    %395 = vector.load %arg33[%394, %c0_135] : memref<64x8xf32, #tpu.memory_space<vmem>>, vector<8x8xf32>
    %396 = arith.addf %395, %382 : vector<8x8xf32>
    %397 = arith.negf %396 : vector<8x8xf32>
    %398 = math.exp %397 : vector<8x8xf32>
    %cst_136 = arith.constant 1.000000e+00 : f32
    %399 = vector.broadcast %cst_136 : f32 to vector<8x8xf32>
    %400 = arith.addf %399, %398 : vector<8x8xf32>
    %401 = arith.divf %399, %400 : vector<8x8xf32>
    %402 = arith.index_cast %376 : i32 to index
    %c0_137 = arith.constant 0 : index
    %403 = vector.load %arg34[%402, %c0_137] : memref<64x8xf32, #tpu.memory_space<vmem>>, vector<8x8xf32>
    %404 = arith.mulf %393, %385 : vector<8x8xf32>
    %405 = arith.addf %403, %404 : vector<8x8xf32>
    %406 = math.tanh %405 : vector<8x8xf32>
    %cst_138 = arith.constant 1.000000e+00 : f32
    %407 = vector.broadcast %cst_138 : f32 to vector<8x8xf32>
    %408 = arith.subf %407, %401 : vector<8x8xf32>
    %409 = arith.mulf %408, %406 : vector<8x8xf32>
    %410 = arith.mulf %401, %374 : vector<8x8xf32>
    %411 = arith.addf %409, %410 : vector<8x8xf32>
    %412 = vector.broadcast %c7_i32 : i32 to vector<8x1xi32>
    %413 = arith.cmpi slt, %412, %0 : vector<8x1xi32>
    %cst_139 = arith.constant 0.000000e+00 : f32
    %414 = vector.shape_cast %413 : vector<8x1xi1> to vector<8x1xi1>
    %415 = vector.broadcast %414 : vector<8x1xi1> to vector<8x8xi1>
    %416 = vector.broadcast %cst_139 : f32 to vector<8x8xf32>
    %417 = arith.select %415, %411, %416 : vector<8x8xi1>, vector<8x8xf32>
    %418 = arith.index_cast %376 : i32 to index
    %c0_140 = arith.constant 0 : index
    %419 = vector.load %arg35[%418, %c0_140] : memref<64x8xf32, #tpu.memory_space<vmem>>, vector<8x8xf32>
    tpu.vector_store %arg35[%418, %c0_140], %417 {strides = array<i32>} : memref<64x8xf32, #tpu.memory_space<vmem>>, vector<8x8xf32>,
    %420 = vector.shape_cast %413 : vector<8x1xi1> to vector<8x1xi1>
    %421 = vector.broadcast %420 : vector<8x1xi1> to vector<8x8xi1>
    %422 = arith.select %421, %411, %374 : vector<8x8xi1>, vector<8x8xf32>
    %c8_i32_141 = arith.constant 8 : i32
    %c0_142 = arith.constant 0 : index
    %c0_143 = arith.constant 0 : index
    %423 = vector.load %arg35[%c0_142, %c0_143] : memref<64x8xf32, #tpu.memory_space<vmem>>, vector<64x8xf32>
    %c0_144 = arith.constant 0 : index
    %c0_145 = arith.constant 0 : index
    %424 = vector.load %arg1[%c0_144, %c0_145] : memref<8x8xf32, #tpu.memory_space<vmem>>, vector<8x8xf32>
    %425 = tpu.concatenate %424, %424, %424, %424, %424, %424, %424, %424 in 0 : vector<8x8xf32>, vector<8x8xf32>, vector<8x8xf32>, vector<8x8xf32>, vector<8x8xf32>, vector<8x8xf32>, vector<8x8xf32>, vector<8x8xf32> -> vector<64x8xf32>
    %c0_146 = arith.constant 0 : index
    %c0_147 = arith.constant 0 : index
    %426 = vector.load %arg9[%c0_146, %c0_147] : memref<8x64xf32, #tpu.memory_space<vmem>>, vector<8x64xf32>
    %cst_148 = arith.constant dense<0.000000e+00> : vector<64x64xf32>
    %427 = tpu.matmul %423, %426, %cst_148 {dimension_numbers = #tpu.dot_dimension_numbers<[1], [0], [0], [1], [0, 0, 1, 1], [], []>} : vector<64x8xf32>, vector<8x64xf32>, vector<64x64xf32> -> vector<64x64xf32>
    %428 = arith.mulf %423, %425 : vector<64x8xf32>
    %c0_149 = arith.constant 0 : index
    %c0_150 = arith.constant 0 : index
    %429 = vector.load %arg10[%c0_149, %c0_150] : memref<8x64xf32, #tpu.memory_space<vmem>>, vector<8x64xf32>
    %cst_151 = arith.constant dense<0.000000e+00> : vector<64x64xf32>
    %430 = tpu.matmul %428, %429, %cst_151 {dimension_numbers = #tpu.dot_dimension_numbers<[1], [0], [0], [1], [0, 0, 1, 1], [], []>} : vector<64x8xf32>, vector<8x64xf32>, vector<64x64xf32> -> vector<64x64xf32>
    %431 = arith.addf %427, %430 : vector<64x64xf32>
    %c0_152 = arith.constant 0 : index
    %c0_153 = arith.constant 0 : index
    %432 = vector.load %arg8[%c0_152, %c0_153] : memref<8x64xf32, #tpu.memory_space<vmem>>, vector<8x64xf32>
    %cst_154 = arith.constant dense<0.000000e+00> : vector<64x64xf32>
    %433 = tpu.matmul %425, %432, %cst_154 {dimension_numbers = #tpu.dot_dimension_numbers<[1], [0], [0], [1], [0, 0, 1, 1], [], []>} : vector<64x8xf32>, vector<8x64xf32>, vector<64x64xf32> -> vector<64x64xf32>
    %434 = arith.addf %431, %433 : vector<64x64xf32>
    %c0_155 = arith.constant 0 : index
    %c0_156 = arith.constant 0 : index
    %435 = vector.load %arg11[%c0_155, %c0_156] : memref<1x64xf32, #tpu.memory_space<vmem>>, vector<1x64xf32>
    %436 = vector.broadcast %435 : vector<1x64xf32> to vector<64x64xf32>
    %437 = arith.addf %434, %436 : vector<64x64xf32>
    %cst_157 = arith.constant 0.000000e+00 : f32
    %438 = vector.broadcast %cst_157 : f32 to vector<64x64xf32>
    %439 = arith.maximumf %437, %438 : vector<64x64xf32>
    %c0_158 = arith.constant 0 : index
    %c0_159 = arith.constant 0 : index
    %440 = vector.load %arg12[%c0_158, %c0_159] : memref<64x16xf32, #tpu.memory_space<vmem>>, vector<64x16xf32>
    %cst_160 = arith.constant dense<0.000000e+00> : vector<64x16xf32>
    %441 = tpu.matmul %439, %440, %cst_160 {dimension_numbers = #tpu.dot_dimension_numbers<[1], [0], [0], [1], [0, 0, 1, 1], [], []>} : vector<64x64xf32>, vector<64x16xf32>, vector<64x16xf32> -> vector<64x16xf32>
    %c0_161 = arith.constant 0 : index
    %c0_162 = arith.constant 0 : index
    %442 = vector.load %arg13[%c0_161, %c0_162] : memref<1x16xf32, #tpu.memory_space<vmem>>, vector<1x16xf32>
    %443 = vector.broadcast %442 : vector<1x16xf32> to vector<64x16xf32>
    %444 = arith.addf %441, %443 : vector<64x16xf32>
    %cst_163 = arith.constant 0.000000e+00 : f32
    %445 = vector.broadcast %cst_163 : f32 to vector<64x16xf32>
    %446 = arith.maximumf %444, %445 : vector<64x16xf32>
    %c0_164 = arith.constant 0 : index
    %c0_165 = arith.constant 0 : index
    %447 = vector.load %arg14[%c0_164, %c0_165] : memref<16x1xf32, #tpu.memory_space<vmem>>, vector<16x1xf32>
    %cst_166 = arith.constant dense<0.000000e+00> : vector<64x1xf32>
    %448 = tpu.matmul %446, %447, %cst_166 {dimension_numbers = #tpu.dot_dimension_numbers<[1], [0], [0], [1], [0, 0, 1, 1], [], []>} : vector<64x16xf32>, vector<16x1xf32>, vector<64x1xf32> -> vector<64x1xf32>
    %c0_167 = arith.constant 0 : index
    %c0_168 = arith.constant 0 : index
    %449 = vector.load %arg15[%c0_167, %c0_168] : memref<1x1xf32, #tpu.memory_space<vmem>>, vector<1x1xf32>
    %450 = vector.broadcast %449 : vector<1x1xf32> to vector<64x1xf32>
    %451 = arith.addf %448, %450 : vector<64x1xf32>
    %c0_i32_169 = arith.constant 0 : i32
    %452 = vector.broadcast %c0_i32_169 : i32 to vector<8x1xi32>
    %453 = arith.cmpi sgt, %0, %452 : vector<8x1xi32>
    %454 = vector.extract_strided_slice %451 {offsets = [0, 0], sizes = [8, 1], strides = [1, 1]} : vector<64x1xf32> to vector<8x1xf32>
    %cst_170 = arith.constant -4.2949673E+9 : f32
    %455 = vector.broadcast %cst_170 : f32 to vector<8x1xf32>
    %456 = arith.select %453, %454, %455 : vector<8x1xi1>, vector<8x1xf32>
    %c1_i32_171 = arith.constant 1 : i32
    %457 = vector.broadcast %c1_i32_171 : i32 to vector<8x1xi32>
    %458 = arith.cmpi sgt, %0, %457 : vector<8x1xi32>
    %459 = vector.extract_strided_slice %451 {offsets = [8, 0], sizes = [8, 1], strides = [1, 1]} : vector<64x1xf32> to vector<8x1xf32>
    %cst_172 = arith.constant -4.2949673E+9 : f32
    %460 = vector.broadcast %cst_172 : f32 to vector<8x1xf32>
    %461 = arith.select %458, %459, %460 : vector<8x1xi1>, vector<8x1xf32>
    %462 = arith.maximumf %456, %461 : vector<8x1xf32>
    %c2_i32_173 = arith.constant 2 : i32
    %463 = vector.broadcast %c2_i32_173 : i32 to vector<8x1xi32>
    %464 = arith.cmpi sgt, %0, %463 : vector<8x1xi32>
    %465 = vector.extract_strided_slice %451 {offsets = [16, 0], sizes = [8, 1], strides = [1, 1]} : vector<64x1xf32> to vector<8x1xf32>
    %cst_174 = arith.constant -4.2949673E+9 : f32
    %466 = vector.broadcast %cst_174 : f32 to vector<8x1xf32>
    %467 = arith.select %464, %465, %466 : vector<8x1xi1>, vector<8x1xf32>
    %468 = arith.maximumf %462, %467 : vector<8x1xf32>
    %c3_i32_175 = arith.constant 3 : i32
    %469 = vector.broadcast %c3_i32_175 : i32 to vector<8x1xi32>
    %470 = arith.cmpi sgt, %0, %469 : vector<8x1xi32>
    %471 = vector.extract_strided_slice %451 {offsets = [24, 0], sizes = [8, 1], strides = [1, 1]} : vector<64x1xf32> to vector<8x1xf32>
    %cst_176 = arith.constant -4.2949673E+9 : f32
    %472 = vector.broadcast %cst_176 : f32 to vector<8x1xf32>
    %473 = arith.select %470, %471, %472 : vector<8x1xi1>, vector<8x1xf32>
    %474 = arith.maximumf %468, %473 : vector<8x1xf32>
    %c4_i32_177 = arith.constant 4 : i32
    %475 = vector.broadcast %c4_i32_177 : i32 to vector<8x1xi32>
    %476 = arith.cmpi sgt, %0, %475 : vector<8x1xi32>
    %477 = vector.extract_strided_slice %451 {offsets = [32, 0], sizes = [8, 1], strides = [1, 1]} : vector<64x1xf32> to vector<8x1xf32>
    %cst_178 = arith.constant -4.2949673E+9 : f32
    %478 = vector.broadcast %cst_178 : f32 to vector<8x1xf32>
    %479 = arith.select %476, %477, %478 : vector<8x1xi1>, vector<8x1xf32>
    %480 = arith.maximumf %474, %479 : vector<8x1xf32>
    %c5_i32_179 = arith.constant 5 : i32
    %481 = vector.broadcast %c5_i32_179 : i32 to vector<8x1xi32>
    %482 = arith.cmpi sgt, %0, %481 : vector<8x1xi32>
    %483 = vector.extract_strided_slice %451 {offsets = [40, 0], sizes = [8, 1], strides = [1, 1]} : vector<64x1xf32> to vector<8x1xf32>
    %cst_180 = arith.constant -4.2949673E+9 : f32
    %484 = vector.broadcast %cst_180 : f32 to vector<8x1xf32>
    %485 = arith.select %482, %483, %484 : vector<8x1xi1>, vector<8x1xf32>
    %486 = arith.maximumf %480, %485 : vector<8x1xf32>
    %c6_i32_181 = arith.constant 6 : i32
    %487 = vector.broadcast %c6_i32_181 : i32 to vector<8x1xi32>
    %488 = arith.cmpi sgt, %0, %487 : vector<8x1xi32>
    %489 = vector.extract_strided_slice %451 {offsets = [48, 0], sizes = [8, 1], strides = [1, 1]} : vector<64x1xf32> to vector<8x1xf32>
    %cst_182 = arith.constant -4.2949673E+9 : f32
    %490 = vector.broadcast %cst_182 : f32 to vector<8x1xf32>
    %491 = arith.select %488, %489, %490 : vector<8x1xi1>, vector<8x1xf32>
    %492 = arith.maximumf %486, %491 : vector<8x1xf32>
    %c7_i32_183 = arith.constant 7 : i32
    %493 = vector.broadcast %c7_i32_183 : i32 to vector<8x1xi32>
    %494 = arith.cmpi sgt, %0, %493 : vector<8x1xi32>
    %495 = vector.extract_strided_slice %451 {offsets = [56, 0], sizes = [8, 1], strides = [1, 1]} : vector<64x1xf32> to vector<8x1xf32>
    %cst_184 = arith.constant -4.2949673E+9 : f32
    %496 = vector.broadcast %cst_184 : f32 to vector<8x1xf32>
    %497 = arith.select %494, %495, %496 : vector<8x1xi1>, vector<8x1xf32>
    %498 = arith.maximumf %492, %497 : vector<8x1xf32>
    %499 = arith.subf %456, %498 : vector<8x1xf32>
    %500 = math.exp %499 : vector<8x1xf32>
    %501 = arith.subf %461, %498 : vector<8x1xf32>
    %502 = math.exp %501 : vector<8x1xf32>
    %503 = arith.subf %467, %498 : vector<8x1xf32>
    %504 = math.exp %503 : vector<8x1xf32>
    %505 = arith.subf %473, %498 : vector<8x1xf32>
    %506 = math.exp %505 : vector<8x1xf32>
    %507 = arith.subf %479, %498 : vector<8x1xf32>
    %508 = math.exp %507 : vector<8x1xf32>
    %509 = arith.subf %485, %498 : vector<8x1xf32>
    %510 = math.exp %509 : vector<8x1xf32>
    %511 = arith.subf %491, %498 : vector<8x1xf32>
    %512 = math.exp %511 : vector<8x1xf32>
    %513 = arith.subf %497, %498 : vector<8x1xf32>
    %514 = math.exp %513 : vector<8x1xf32>
    %515 = arith.addf %500, %502 : vector<8x1xf32>
    %516 = arith.addf %515, %504 : vector<8x1xf32>
    %517 = arith.addf %516, %506 : vector<8x1xf32>
    %518 = arith.addf %517, %508 : vector<8x1xf32>
    %519 = arith.addf %518, %510 : vector<8x1xf32>
    %520 = arith.addf %519, %512 : vector<8x1xf32>
    %521 = arith.addf %520, %514 : vector<8x1xf32>
    %522 = tpu.reciprocal %521 {approx = true} : vector<8x1xf32> -> vector<8x1xf32>
    %523 = arith.mulf %500, %522 : vector<8x1xf32>
    %c0_185 = arith.constant 0 : index
    %c0_186 = arith.constant 0 : index
    %524 = vector.load %arg39[%c0_185, %c0_186] : memref<64x1xf32, #tpu.memory_space<vmem>>, vector<8x1xf32>
    tpu.vector_store %arg39[%c0_185, %c0_186], %523 {strides = array<i32>} : memref<64x1xf32, #tpu.memory_space<vmem>>, vector<8x1xf32>,
    %525 = arith.mulf %502, %522 : vector<8x1xf32>
    %c8 = arith.constant 8 : index
    %c0_187 = arith.constant 0 : index
    %526 = vector.load %arg39[%c8, %c0_187] : memref<64x1xf32, #tpu.memory_space<vmem>>, vector<8x1xf32>
    tpu.vector_store %arg39[%c8, %c0_187], %525 {strides = array<i32>} : memref<64x1xf32, #tpu.memory_space<vmem>>, vector<8x1xf32>,
    %527 = arith.mulf %504, %522 : vector<8x1xf32>
    %c16 = arith.constant 16 : index
    %c0_188 = arith.constant 0 : index
    %528 = vector.load %arg39[%c16, %c0_188] : memref<64x1xf32, #tpu.memory_space<vmem>>, vector<8x1xf32>
    tpu.vector_store %arg39[%c16, %c0_188], %527 {strides = array<i32>} : memref<64x1xf32, #tpu.memory_space<vmem>>, vector<8x1xf32>,
    %529 = arith.mulf %506, %522 : vector<8x1xf32>
    %c24 = arith.constant 24 : index
    %c0_189 = arith.constant 0 : index
    %530 = vector.load %arg39[%c24, %c0_189] : memref<64x1xf32, #tpu.memory_space<vmem>>, vector<8x1xf32>
    tpu.vector_store %arg39[%c24, %c0_189], %529 {strides = array<i32>} : memref<64x1xf32, #tpu.memory_space<vmem>>, vector<8x1xf32>,
    %531 = arith.mulf %508, %522 : vector<8x1xf32>
    %c32 = arith.constant 32 : index
    %c0_190 = arith.constant 0 : index
    %532 = vector.load %arg39[%c32, %c0_190] : memref<64x1xf32, #tpu.memory_space<vmem>>, vector<8x1xf32>
    tpu.vector_store %arg39[%c32, %c0_190], %531 {strides = array<i32>} : memref<64x1xf32, #tpu.memory_space<vmem>>, vector<8x1xf32>,
    %533 = arith.mulf %510, %522 : vector<8x1xf32>
    %c40 = arith.constant 40 : index
    %c0_191 = arith.constant 0 : index
    %534 = vector.load %arg39[%c40, %c0_191] : memref<64x1xf32, #tpu.memory_space<vmem>>, vector<8x1xf32>
    tpu.vector_store %arg39[%c40, %c0_191], %533 {strides = array<i32>} : memref<64x1xf32, #tpu.memory_space<vmem>>, vector<8x1xf32>,
    %535 = arith.mulf %512, %522 : vector<8x1xf32>
    %c48 = arith.constant 48 : index
    %c0_192 = arith.constant 0 : index
    %536 = vector.load %arg39[%c48, %c0_192] : memref<64x1xf32, #tpu.memory_space<vmem>>, vector<8x1xf32>
    tpu.vector_store %arg39[%c48, %c0_192], %535 {strides = array<i32>} : memref<64x1xf32, #tpu.memory_space<vmem>>, vector<8x1xf32>,
    %537 = arith.mulf %514, %522 : vector<8x1xf32>
    %c56 = arith.constant 56 : index
    %c0_193 = arith.constant 0 : index
    %538 = vector.load %arg39[%c56, %c0_193] : memref<64x1xf32, #tpu.memory_space<vmem>>, vector<8x1xf32>
    tpu.vector_store %arg39[%c56, %c0_193], %537 {strides = array<i32>} : memref<64x1xf32, #tpu.memory_space<vmem>>, vector<8x1xf32>,
    %c0_194 = arith.constant 0 : index
    %c0_195 = arith.constant 0 : index
    %c0_196 = arith.constant 0 : index
    %539 = vector.load %arg16[%c0_194, %c0_195, %c0_196] : memref<3x8x8xf32, #tpu.memory_space<vmem>>, vector<1x8x8xf32>
    %540 = vector.shape_cast %539 : vector<1x8x8xf32> to vector<8x8xf32>
    %cst_197 = arith.constant dense<0.000000e+00> : vector<64x8xf32>
    %541 = tpu.matmul %423, %540, %cst_197 {dimension_numbers = #tpu.dot_dimension_numbers<[1], [0], [0], [1], [0, 0, 1, 1], [], []>} : vector<64x8xf32>, vector<8x8xf32>, vector<64x8xf32> -> vector<64x8xf32>
    %c0_198 = arith.constant 0 : index
    %c0_199 = arith.constant 0 : index
    %c0_200 = arith.constant 0 : index
    %542 = vector.load %arg18[%c0_198, %c0_199, %c0_200] : memref<3x1x8xf32, #tpu.memory_space<vmem>>, vector<1x1x8xf32>
    %543 = vector.shape_cast %542 : vector<1x1x8xf32> to vector<1x8xf32>
    %544 = vector.broadcast %543 : vector<1x8xf32> to vector<64x8xf32>
    %545 = arith.addf %541, %544 : vector<64x8xf32>
    %c0_201 = arith.constant 0 : index
    %c0_202 = arith.constant 0 : index
    %546 = vector.load %arg36[%c0_201, %c0_202] : memref<64x8xf32, #tpu.memory_space<vmem>>, vector<64x8xf32>
    tpu.vector_store %arg36[%c0_201, %c0_202], %545 {strides = array<i32>} : memref<64x8xf32, #tpu.memory_space<vmem>>, vector<64x8xf32>,
    %c1_203 = arith.constant 1 : index
    %c0_204 = arith.constant 0 : index
    %c0_205 = arith.constant 0 : index
    %547 = vector.load %arg16[%c1_203, %c0_204, %c0_205] : memref<3x8x8xf32, #tpu.memory_space<vmem>>, vector<1x8x8xf32>
    %548 = vector.shape_cast %547 : vector<1x8x8xf32> to vector<8x8xf32>
    %cst_206 = arith.constant dense<0.000000e+00> : vector<64x8xf32>
    %549 = tpu.matmul %423, %548, %cst_206 {dimension_numbers = #tpu.dot_dimension_numbers<[1], [0], [0], [1], [0, 0, 1, 1], [], []>} : vector<64x8xf32>, vector<8x8xf32>, vector<64x8xf32> -> vector<64x8xf32>
    %c1_207 = arith.constant 1 : index
    %c0_208 = arith.constant 0 : index
    %c0_209 = arith.constant 0 : index
    %550 = vector.load %arg18[%c1_207, %c0_208, %c0_209] : memref<3x1x8xf32, #tpu.memory_space<vmem>>, vector<1x1x8xf32>
    %551 = vector.shape_cast %550 : vector<1x1x8xf32> to vector<1x8xf32>
    %552 = vector.broadcast %551 : vector<1x8xf32> to vector<64x8xf32>
    %553 = arith.addf %549, %552 : vector<64x8xf32>
    %c0_210 = arith.constant 0 : index
    %c0_211 = arith.constant 0 : index
    %554 = vector.load %arg37[%c0_210, %c0_211] : memref<64x8xf32, #tpu.memory_space<vmem>>, vector<64x8xf32>
    tpu.vector_store %arg37[%c0_210, %c0_211], %553 {strides = array<i32>} : memref<64x8xf32, #tpu.memory_space<vmem>>, vector<64x8xf32>,
    %c2_212 = arith.constant 2 : index
    %c0_213 = arith.constant 0 : index
    %c0_214 = arith.constant 0 : index
    %555 = vector.load %arg16[%c2_212, %c0_213, %c0_214] : memref<3x8x8xf32, #tpu.memory_space<vmem>>, vector<1x8x8xf32>
    %556 = vector.shape_cast %555 : vector<1x8x8xf32> to vector<8x8xf32>
    %cst_215 = arith.constant dense<0.000000e+00> : vector<64x8xf32>
    %557 = tpu.matmul %423, %556, %cst_215 {dimension_numbers = #tpu.dot_dimension_numbers<[1], [0], [0], [1], [0, 0, 1, 1], [], []>} : vector<64x8xf32>, vector<8x8xf32>, vector<64x8xf32> -> vector<64x8xf32>
    %c2_216 = arith.constant 2 : index
    %c0_217 = arith.constant 0 : index
    %c0_218 = arith.constant 0 : index
    %558 = vector.load %arg18[%c2_216, %c0_217, %c0_218] : memref<3x1x8xf32, #tpu.memory_space<vmem>>, vector<1x1x8xf32>
    %559 = vector.shape_cast %558 : vector<1x1x8xf32> to vector<1x8xf32>
    %560 = vector.broadcast %559 : vector<1x8xf32> to vector<64x8xf32>
    %561 = arith.addf %557, %560 : vector<64x8xf32>
    %c0_219 = arith.constant 0 : index
    %c0_220 = arith.constant 0 : index
    %562 = vector.load %arg38[%c0_219, %c0_220] : memref<64x8xf32, #tpu.memory_space<vmem>>, vector<64x8xf32>
    tpu.vector_store %arg38[%c0_219, %c0_220], %561 {strides = array<i32>} : memref<64x8xf32, #tpu.memory_space<vmem>>, vector<64x8xf32>,
    %c0_221 = arith.constant 0 : index
    %c0_222 = arith.constant 0 : index
    %c0_223 = arith.constant 0 : index
    %563 = vector.load %arg17[%c0_221, %c0_222, %c0_223] : memref<3x8x8xf32, #tpu.memory_space<vmem>>, vector<1x8x8xf32>
    %564 = vector.shape_cast %563 : vector<1x8x8xf32> to vector<8x8xf32>
    %c1_224 = arith.constant 1 : index
    %c0_225 = arith.constant 0 : index
    %c0_226 = arith.constant 0 : index
    %565 = vector.load %arg17[%c1_224, %c0_225, %c0_226] : memref<3x8x8xf32, #tpu.memory_space<vmem>>, vector<1x8x8xf32>
    %566 = vector.shape_cast %565 : vector<1x8x8xf32> to vector<8x8xf32>
    %c2_227 = arith.constant 2 : index
    %c0_228 = arith.constant 0 : index
    %c0_229 = arith.constant 0 : index
    %567 = vector.load %arg17[%c2_227, %c0_228, %c0_229] : memref<3x8x8xf32, #tpu.memory_space<vmem>>, vector<1x8x8xf32>
    %568 = vector.shape_cast %567 : vector<1x8x8xf32> to vector<8x8xf32>
    %c0_230 = arith.constant 0 : index
    %c0_231 = arith.constant 0 : index
    %c0_232 = arith.constant 0 : index
    %569 = vector.load %arg19[%c0_230, %c0_231, %c0_232] : memref<3x1x8xf32, #tpu.memory_space<vmem>>, vector<1x1x8xf32>
    %570 = vector.shape_cast %569 : vector<1x1x8xf32> to vector<1x8xf32>
    %c1_233 = arith.constant 1 : index
    %c0_234 = arith.constant 0 : index
    %c0_235 = arith.constant 0 : index
    %571 = vector.load %arg19[%c1_233, %c0_234, %c0_235] : memref<3x1x8xf32, #tpu.memory_space<vmem>>, vector<1x1x8xf32>
    %572 = vector.shape_cast %571 : vector<1x1x8xf32> to vector<1x8xf32>
    %c2_236 = arith.constant 2 : index
    %c0_237 = arith.constant 0 : index
    %c0_238 = arith.constant 0 : index
    %573 = vector.load %arg19[%c2_236, %c0_237, %c0_238] : memref<3x1x8xf32, #tpu.memory_space<vmem>>, vector<1x1x8xf32>
    %574 = vector.shape_cast %573 : vector<1x1x8xf32> to vector<1x8xf32>
    %cst_239 = arith.constant 0.000000e+00 : f32
    %575 = vector.broadcast %cst_239 : f32 to vector<8x8xf32>
    %c0_i32_240 = arith.constant 0 : i32
    %c8_i32_241 = arith.constant 8 : i32
    %576 = arith.muli %c0_i32_240, %c8_i32_241 : i32
    %577 = tpu.assume_multiple %576, 8 : i32
    %578 = arith.index_cast %577 : i32 to index
    %c0_242 = arith.constant 0 : index
    %579 = vector.load %arg39[%578, %c0_242] : memref<64x1xf32, #tpu.memory_space<vmem>>, vector<8x1xf32>
    %cst_243 = arith.constant dense<0.000000e+00> : vector<8x8xf32>
    %580 = tpu.matmul %575, %564, %cst_243 {dimension_numbers = #tpu.dot_dimension_numbers<[1], [0], [0], [1], [0, 0, 1, 1], [], []>} : vector<8x8xf32>, vector<8x8xf32>, vector<8x8xf32> -> vector<8x8xf32>
    %581 = vector.broadcast %570 : vector<1x8xf32> to vector<8x8xf32>
    %582 = arith.addf %580, %581 : vector<8x8xf32>
    %cst_244 = arith.constant dense<0.000000e+00> : vector<8x8xf32>
    %583 = tpu.matmul %575, %566, %cst_244 {dimension_numbers = #tpu.dot_dimension_numbers<[1], [0], [0], [1], [0, 0, 1, 1], [], []>} : vector<8x8xf32>, vector<8x8xf32>, vector<8x8xf32> -> vector<8x8xf32>
    %584 = vector.broadcast %572 : vector<1x8xf32> to vector<8x8xf32>
    %585 = arith.addf %583, %584 : vector<8x8xf32>
    %cst_245 = arith.constant dense<0.000000e+00> : vector<8x8xf32>
    %586 = tpu.matmul %575, %568, %cst_245 {dimension_numbers = #tpu.dot_dimension_numbers<[1], [0], [0], [1], [0, 0, 1, 1], [], []>} : vector<8x8xf32>, vector<8x8xf32>, vector<8x8xf32> -> vector<8x8xf32>
    %587 = vector.broadcast %574 : vector<1x8xf32> to vector<8x8xf32>
    %588 = arith.addf %586, %587 : vector<8x8xf32>
    %589 = arith.index_cast %577 : i32 to index
    %c0_246 = arith.constant 0 : index
    %590 = vector.load %arg36[%589, %c0_246] : memref<64x8xf32, #tpu.memory_space<vmem>>, vector<8x8xf32>
    %591 = arith.addf %590, %582 : vector<8x8xf32>
    %592 = arith.negf %591 : vector<8x8xf32>
    %593 = math.exp %592 : vector<8x8xf32>
    %cst_247 = arith.constant 1.000000e+00 : f32
    %594 = vector.broadcast %cst_247 : f32 to vector<8x8xf32>
    %595 = arith.addf %594, %593 : vector<8x8xf32>
    %596 = arith.divf %594, %595 : vector<8x8xf32>
    %597 = arith.index_cast %577 : i32 to index
    %c0_248 = arith.constant 0 : index
    %598 = vector.load %arg37[%597, %c0_248] : memref<64x8xf32, #tpu.memory_space<vmem>>, vector<8x8xf32>
    %599 = arith.addf %598, %585 : vector<8x8xf32>
    %600 = arith.negf %599 : vector<8x8xf32>
    %601 = math.exp %600 : vector<8x8xf32>
    %cst_249 = arith.constant 1.000000e+00 : f32
    %602 = vector.broadcast %cst_249 : f32 to vector<8x8xf32>
    %603 = arith.addf %602, %601 : vector<8x8xf32>
    %604 = arith.divf %602, %603 : vector<8x8xf32>
    %605 = arith.index_cast %577 : i32 to index
    %c0_250 = arith.constant 0 : index
    %606 = vector.load %arg38[%605, %c0_250] : memref<64x8xf32, #tpu.memory_space<vmem>>, vector<8x8xf32>
    %607 = arith.mulf %596, %588 : vector<8x8xf32>
    %608 = arith.addf %606, %607 : vector<8x8xf32>
    %609 = math.tanh %608 : vector<8x8xf32>
    %610 = vector.broadcast %579 : vector<8x1xf32> to vector<8x8xf32>
    %611 = arith.mulf %610, %604 : vector<8x8xf32>
    %cst_251 = arith.constant 1.000000e+00 : f32
    %612 = vector.broadcast %cst_251 : f32 to vector<8x8xf32>
    %613 = arith.subf %612, %611 : vector<8x8xf32>
    %614 = arith.mulf %613, %575 : vector<8x8xf32>
    %615 = arith.mulf %611, %609 : vector<8x8xf32>
    %616 = arith.addf %614, %615 : vector<8x8xf32>
    %617 = vector.broadcast %c0_i32_240 : i32 to vector<8x1xi32>
    %618 = arith.cmpi slt, %617, %0 : vector<8x1xi32>
    %619 = vector.shape_cast %618 : vector<8x1xi1> to vector<8x1xi1>
    %620 = vector.broadcast %619 : vector<8x1xi1> to vector<8x8xi1>
    %621 = arith.select %620, %616, %575 : vector<8x8xi1>, vector<8x8xf32>
    %c1_i32_252 = arith.constant 1 : i32
    %c8_i32_253 = arith.constant 8 : i32
    %622 = arith.muli %c1_i32_252, %c8_i32_253 : i32
    %623 = tpu.assume_multiple %622, 8 : i32
    %624 = arith.index_cast %623 : i32 to index
    %c0_254 = arith.constant 0 : index
    %625 = vector.load %arg39[%624, %c0_254] : memref<64x1xf32, #tpu.memory_space<vmem>>, vector<8x1xf32>
    %cst_255 = arith.constant dense<0.000000e+00> : vector<8x8xf32>
    %626 = tpu.matmul %621, %564, %cst_255 {dimension_numbers = #tpu.dot_dimension_numbers<[1], [0], [0], [1], [0, 0, 1, 1], [], []>} : vector<8x8xf32>, vector<8x8xf32>, vector<8x8xf32> -> vector<8x8xf32>
    %627 = vector.broadcast %570 : vector<1x8xf32> to vector<8x8xf32>
    %628 = arith.addf %626, %627 : vector<8x8xf32>
    %cst_256 = arith.constant dense<0.000000e+00> : vector<8x8xf32>
    %629 = tpu.matmul %621, %566, %cst_256 {dimension_numbers = #tpu.dot_dimension_numbers<[1], [0], [0], [1], [0, 0, 1, 1], [], []>} : vector<8x8xf32>, vector<8x8xf32>, vector<8x8xf32> -> vector<8x8xf32>
    %630 = vector.broadcast %572 : vector<1x8xf32> to vector<8x8xf32>
    %631 = arith.addf %629, %630 : vector<8x8xf32>
    %cst_257 = arith.constant dense<0.000000e+00> : vector<8x8xf32>
    %632 = tpu.matmul %621, %568, %cst_257 {dimension_numbers = #tpu.dot_dimension_numbers<[1], [0], [0], [1], [0, 0, 1, 1], [], []>} : vector<8x8xf32>, vector<8x8xf32>, vector<8x8xf32> -> vector<8x8xf32>
    %633 = vector.broadcast %574 : vector<1x8xf32> to vector<8x8xf32>
    %634 = arith.addf %632, %633 : vector<8x8xf32>
    %635 = arith.index_cast %623 : i32 to index
    %c0_258 = arith.constant 0 : index
    %636 = vector.load %arg36[%635, %c0_258] : memref<64x8xf32, #tpu.memory_space<vmem>>, vector<8x8xf32>
    %637 = arith.addf %636, %628 : vector<8x8xf32>
    %638 = arith.negf %637 : vector<8x8xf32>
    %639 = math.exp %638 : vector<8x8xf32>
    %cst_259 = arith.constant 1.000000e+00 : f32
    %640 = vector.broadcast %cst_259 : f32 to vector<8x8xf32>
    %641 = arith.addf %640, %639 : vector<8x8xf32>
    %642 = arith.divf %640, %641 : vector<8x8xf32>
    %643 = arith.index_cast %623 : i32 to index
    %c0_260 = arith.constant 0 : index
    %644 = vector.load %arg37[%643, %c0_260] : memref<64x8xf32, #tpu.memory_space<vmem>>, vector<8x8xf32>
    %645 = arith.addf %644, %631 : vector<8x8xf32>
    %646 = arith.negf %645 : vector<8x8xf32>
    %647 = math.exp %646 : vector<8x8xf32>
    %cst_261 = arith.constant 1.000000e+00 : f32
    %648 = vector.broadcast %cst_261 : f32 to vector<8x8xf32>
    %649 = arith.addf %648, %647 : vector<8x8xf32>
    %650 = arith.divf %648, %649 : vector<8x8xf32>
    %651 = arith.index_cast %623 : i32 to index
    %c0_262 = arith.constant 0 : index
    %652 = vector.load %arg38[%651, %c0_262] : memref<64x8xf32, #tpu.memory_space<vmem>>, vector<8x8xf32>
    %653 = arith.mulf %642, %634 : vector<8x8xf32>
    %654 = arith.addf %652, %653 : vector<8x8xf32>
    %655 = math.tanh %654 : vector<8x8xf32>
    %656 = vector.broadcast %625 : vector<8x1xf32> to vector<8x8xf32>
    %657 = arith.mulf %656, %650 : vector<8x8xf32>
    %cst_263 = arith.constant 1.000000e+00 : f32
    %658 = vector.broadcast %cst_263 : f32 to vector<8x8xf32>
    %659 = arith.subf %658, %657 : vector<8x8xf32>
    %660 = arith.mulf %659, %621 : vector<8x8xf32>
    %661 = arith.mulf %657, %655 : vector<8x8xf32>
    %662 = arith.addf %660, %661 : vector<8x8xf32>
    %663 = vector.broadcast %c1_i32_252 : i32 to vector<8x1xi32>
    %664 = arith.cmpi slt, %663, %0 : vector<8x1xi32>
    %665 = vector.shape_cast %664 : vector<8x1xi1> to vector<8x1xi1>
    %666 = vector.broadcast %665 : vector<8x1xi1> to vector<8x8xi1>
    %667 = arith.select %666, %662, %621 : vector<8x8xi1>, vector<8x8xf32>
    %c2_i32_264 = arith.constant 2 : i32
    %c8_i32_265 = arith.constant 8 : i32
    %668 = arith.muli %c2_i32_264, %c8_i32_265 : i32
    %669 = tpu.assume_multiple %668, 8 : i32
    %670 = arith.index_cast %669 : i32 to index
    %c0_266 = arith.constant 0 : index
    %671 = vector.load %arg39[%670, %c0_266] : memref<64x1xf32, #tpu.memory_space<vmem>>, vector<8x1xf32>
    %cst_267 = arith.constant dense<0.000000e+00> : vector<8x8xf32>
    %672 = tpu.matmul %667, %564, %cst_267 {dimension_numbers = #tpu.dot_dimension_numbers<[1], [0], [0], [1], [0, 0, 1, 1], [], []>} : vector<8x8xf32>, vector<8x8xf32>, vector<8x8xf32> -> vector<8x8xf32>
    %673 = vector.broadcast %570 : vector<1x8xf32> to vector<8x8xf32>
    %674 = arith.addf %672, %673 : vector<8x8xf32>
    %cst_268 = arith.constant dense<0.000000e+00> : vector<8x8xf32>
    %675 = tpu.matmul %667, %566, %cst_268 {dimension_numbers = #tpu.dot_dimension_numbers<[1], [0], [0], [1], [0, 0, 1, 1], [], []>} : vector<8x8xf32>, vector<8x8xf32>, vector<8x8xf32> -> vector<8x8xf32>
    %676 = vector.broadcast %572 : vector<1x8xf32> to vector<8x8xf32>
    %677 = arith.addf %675, %676 : vector<8x8xf32>
    %cst_269 = arith.constant dense<0.000000e+00> : vector<8x8xf32>
    %678 = tpu.matmul %667, %568, %cst_269 {dimension_numbers = #tpu.dot_dimension_numbers<[1], [0], [0], [1], [0, 0, 1, 1], [], []>} : vector<8x8xf32>, vector<8x8xf32>, vector<8x8xf32> -> vector<8x8xf32>
    %679 = vector.broadcast %574 : vector<1x8xf32> to vector<8x8xf32>
    %680 = arith.addf %678, %679 : vector<8x8xf32>
    %681 = arith.index_cast %669 : i32 to index
    %c0_270 = arith.constant 0 : index
    %682 = vector.load %arg36[%681, %c0_270] : memref<64x8xf32, #tpu.memory_space<vmem>>, vector<8x8xf32>
    %683 = arith.addf %682, %674 : vector<8x8xf32>
    %684 = arith.negf %683 : vector<8x8xf32>
    %685 = math.exp %684 : vector<8x8xf32>
    %cst_271 = arith.constant 1.000000e+00 : f32
    %686 = vector.broadcast %cst_271 : f32 to vector<8x8xf32>
    %687 = arith.addf %686, %685 : vector<8x8xf32>
    %688 = arith.divf %686, %687 : vector<8x8xf32>
    %689 = arith.index_cast %669 : i32 to index
    %c0_272 = arith.constant 0 : index
    %690 = vector.load %arg37[%689, %c0_272] : memref<64x8xf32, #tpu.memory_space<vmem>>, vector<8x8xf32>
    %691 = arith.addf %690, %677 : vector<8x8xf32>
    %692 = arith.negf %691 : vector<8x8xf32>
    %693 = math.exp %692 : vector<8x8xf32>
    %cst_273 = arith.constant 1.000000e+00 : f32
    %694 = vector.broadcast %cst_273 : f32 to vector<8x8xf32>
    %695 = arith.addf %694, %693 : vector<8x8xf32>
    %696 = arith.divf %694, %695 : vector<8x8xf32>
    %697 = arith.index_cast %669 : i32 to index
    %c0_274 = arith.constant 0 : index
    %698 = vector.load %arg38[%697, %c0_274] : memref<64x8xf32, #tpu.memory_space<vmem>>, vector<8x8xf32>
    %699 = arith.mulf %688, %680 : vector<8x8xf32>
    %700 = arith.addf %698, %699 : vector<8x8xf32>
    %701 = math.tanh %700 : vector<8x8xf32>
    %702 = vector.broadcast %671 : vector<8x1xf32> to vector<8x8xf32>
    %703 = arith.mulf %702, %696 : vector<8x8xf32>
    %cst_275 = arith.constant 1.000000e+00 : f32
    %704 = vector.broadcast %cst_275 : f32 to vector<8x8xf32>
    %705 = arith.subf %704, %703 : vector<8x8xf32>
    %706 = arith.mulf %705, %667 : vector<8x8xf32>
    %707 = arith.mulf %703, %701 : vector<8x8xf32>
    %708 = arith.addf %706, %707 : vector<8x8xf32>
    %709 = vector.broadcast %c2_i32_264 : i32 to vector<8x1xi32>
    %710 = arith.cmpi slt, %709, %0 : vector<8x1xi32>
    %711 = vector.shape_cast %710 : vector<8x1xi1> to vector<8x1xi1>
    %712 = vector.broadcast %711 : vector<8x1xi1> to vector<8x8xi1>
    %713 = arith.select %712, %708, %667 : vector<8x8xi1>, vector<8x8xf32>
    %c3_i32_276 = arith.constant 3 : i32
    %c8_i32_277 = arith.constant 8 : i32
    %714 = arith.muli %c3_i32_276, %c8_i32_277 : i32
    %715 = tpu.assume_multiple %714, 8 : i32
    %716 = arith.index_cast %715 : i32 to index
    %c0_278 = arith.constant 0 : index
    %717 = vector.load %arg39[%716, %c0_278] : memref<64x1xf32, #tpu.memory_space<vmem>>, vector<8x1xf32>
    %cst_279 = arith.constant dense<0.000000e+00> : vector<8x8xf32>
    %718 = tpu.matmul %713, %564, %cst_279 {dimension_numbers = #tpu.dot_dimension_numbers<[1], [0], [0], [1], [0, 0, 1, 1], [], []>} : vector<8x8xf32>, vector<8x8xf32>, vector<8x8xf32> -> vector<8x8xf32>
    %719 = vector.broadcast %570 : vector<1x8xf32> to vector<8x8xf32>
    %720 = arith.addf %718, %719 : vector<8x8xf32>
    %cst_280 = arith.constant dense<0.000000e+00> : vector<8x8xf32>
    %721 = tpu.matmul %713, %566, %cst_280 {dimension_numbers = #tpu.dot_dimension_numbers<[1], [0], [0], [1], [0, 0, 1, 1], [], []>} : vector<8x8xf32>, vector<8x8xf32>, vector<8x8xf32> -> vector<8x8xf32>
    %722 = vector.broadcast %572 : vector<1x8xf32> to vector<8x8xf32>
    %723 = arith.addf %721, %722 : vector<8x8xf32>
    %cst_281 = arith.constant dense<0.000000e+00> : vector<8x8xf32>
    %724 = tpu.matmul %713, %568, %cst_281 {dimension_numbers = #tpu.dot_dimension_numbers<[1], [0], [0], [1], [0, 0, 1, 1], [], []>} : vector<8x8xf32>, vector<8x8xf32>, vector<8x8xf32> -> vector<8x8xf32>
    %725 = vector.broadcast %574 : vector<1x8xf32> to vector<8x8xf32>
    %726 = arith.addf %724, %725 : vector<8x8xf32>
    %727 = arith.index_cast %715 : i32 to index
    %c0_282 = arith.constant 0 : index
    %728 = vector.load %arg36[%727, %c0_282] : memref<64x8xf32, #tpu.memory_space<vmem>>, vector<8x8xf32>
    %729 = arith.addf %728, %720 : vector<8x8xf32>
    %730 = arith.negf %729 : vector<8x8xf32>
    %731 = math.exp %730 : vector<8x8xf32>
    %cst_283 = arith.constant 1.000000e+00 : f32
    %732 = vector.broadcast %cst_283 : f32 to vector<8x8xf32>
    %733 = arith.addf %732, %731 : vector<8x8xf32>
    %734 = arith.divf %732, %733 : vector<8x8xf32>
    %735 = arith.index_cast %715 : i32 to index
    %c0_284 = arith.constant 0 : index
    %736 = vector.load %arg37[%735, %c0_284] : memref<64x8xf32, #tpu.memory_space<vmem>>, vector<8x8xf32>
    %737 = arith.addf %736, %723 : vector<8x8xf32>
    %738 = arith.negf %737 : vector<8x8xf32>
    %739 = math.exp %738 : vector<8x8xf32>
    %cst_285 = arith.constant 1.000000e+00 : f32
    %740 = vector.broadcast %cst_285 : f32 to vector<8x8xf32>
    %741 = arith.addf %740, %739 : vector<8x8xf32>
    %742 = arith.divf %740, %741 : vector<8x8xf32>
    %743 = arith.index_cast %715 : i32 to index
    %c0_286 = arith.constant 0 : index
    %744 = vector.load %arg38[%743, %c0_286] : memref<64x8xf32, #tpu.memory_space<vmem>>, vector<8x8xf32>
    %745 = arith.mulf %734, %726 : vector<8x8xf32>
    %746 = arith.addf %744, %745 : vector<8x8xf32>
    %747 = math.tanh %746 : vector<8x8xf32>
    %748 = vector.broadcast %717 : vector<8x1xf32> to vector<8x8xf32>
    %749 = arith.mulf %748, %742 : vector<8x8xf32>
    %cst_287 = arith.constant 1.000000e+00 : f32
    %750 = vector.broadcast %cst_287 : f32 to vector<8x8xf32>
    %751 = arith.subf %750, %749 : vector<8x8xf32>
    %752 = arith.mulf %751, %713 : vector<8x8xf32>
    %753 = arith.mulf %749, %747 : vector<8x8xf32>
    %754 = arith.addf %752, %753 : vector<8x8xf32>
    %755 = vector.broadcast %c3_i32_276 : i32 to vector<8x1xi32>
    %756 = arith.cmpi slt, %755, %0 : vector<8x1xi32>
    %757 = vector.shape_cast %756 : vector<8x1xi1> to vector<8x1xi1>
    %758 = vector.broadcast %757 : vector<8x1xi1> to vector<8x8xi1>
    %759 = arith.select %758, %754, %713 : vector<8x8xi1>, vector<8x8xf32>
    %c4_i32_288 = arith.constant 4 : i32
    %c8_i32_289 = arith.constant 8 : i32
    %760 = arith.muli %c4_i32_288, %c8_i32_289 : i32
    %761 = tpu.assume_multiple %760, 8 : i32
    %762 = arith.index_cast %761 : i32 to index
    %c0_290 = arith.constant 0 : index
    %763 = vector.load %arg39[%762, %c0_290] : memref<64x1xf32, #tpu.memory_space<vmem>>, vector<8x1xf32>
    %cst_291 = arith.constant dense<0.000000e+00> : vector<8x8xf32>
    %764 = tpu.matmul %759, %564, %cst_291 {dimension_numbers = #tpu.dot_dimension_numbers<[1], [0], [0], [1], [0, 0, 1, 1], [], []>} : vector<8x8xf32>, vector<8x8xf32>, vector<8x8xf32> -> vector<8x8xf32>
    %765 = vector.broadcast %570 : vector<1x8xf32> to vector<8x8xf32>
    %766 = arith.addf %764, %765 : vector<8x8xf32>
    %cst_292 = arith.constant dense<0.000000e+00> : vector<8x8xf32>
    %767 = tpu.matmul %759, %566, %cst_292 {dimension_numbers = #tpu.dot_dimension_numbers<[1], [0], [0], [1], [0, 0, 1, 1], [], []>} : vector<8x8xf32>, vector<8x8xf32>, vector<8x8xf32> -> vector<8x8xf32>
    %768 = vector.broadcast %572 : vector<1x8xf32> to vector<8x8xf32>
    %769 = arith.addf %767, %768 : vector<8x8xf32>
    %cst_293 = arith.constant dense<0.000000e+00> : vector<8x8xf32>
    %770 = tpu.matmul %759, %568, %cst_293 {dimension_numbers = #tpu.dot_dimension_numbers<[1], [0], [0], [1], [0, 0, 1, 1], [], []>} : vector<8x8xf32>, vector<8x8xf32>, vector<8x8xf32> -> vector<8x8xf32>
    %771 = vector.broadcast %574 : vector<1x8xf32> to vector<8x8xf32>
    %772 = arith.addf %770, %771 : vector<8x8xf32>
    %773 = arith.index_cast %761 : i32 to index
    %c0_294 = arith.constant 0 : index
    %774 = vector.load %arg36[%773, %c0_294] : memref<64x8xf32, #tpu.memory_space<vmem>>, vector<8x8xf32>
    %775 = arith.addf %774, %766 : vector<8x8xf32>
    %776 = arith.negf %775 : vector<8x8xf32>
    %777 = math.exp %776 : vector<8x8xf32>
    %cst_295 = arith.constant 1.000000e+00 : f32
    %778 = vector.broadcast %cst_295 : f32 to vector<8x8xf32>
    %779 = arith.addf %778, %777 : vector<8x8xf32>
    %780 = arith.divf %778, %779 : vector<8x8xf32>
    %781 = arith.index_cast %761 : i32 to index
    %c0_296 = arith.constant 0 : index
    %782 = vector.load %arg37[%781, %c0_296] : memref<64x8xf32, #tpu.memory_space<vmem>>, vector<8x8xf32>
    %783 = arith.addf %782, %769 : vector<8x8xf32>
    %784 = arith.negf %783 : vector<8x8xf32>
    %785 = math.exp %784 : vector<8x8xf32>
    %cst_297 = arith.constant 1.000000e+00 : f32
    %786 = vector.broadcast %cst_297 : f32 to vector<8x8xf32>
    %787 = arith.addf %786, %785 : vector<8x8xf32>
    %788 = arith.divf %786, %787 : vector<8x8xf32>
    %789 = arith.index_cast %761 : i32 to index
    %c0_298 = arith.constant 0 : index
    %790 = vector.load %arg38[%789, %c0_298] : memref<64x8xf32, #tpu.memory_space<vmem>>, vector<8x8xf32>
    %791 = arith.mulf %780, %772 : vector<8x8xf32>
    %792 = arith.addf %790, %791 : vector<8x8xf32>
    %793 = math.tanh %792 : vector<8x8xf32>
    %794 = vector.broadcast %763 : vector<8x1xf32> to vector<8x8xf32>
    %795 = arith.mulf %794, %788 : vector<8x8xf32>
    %cst_299 = arith.constant 1.000000e+00 : f32
    %796 = vector.broadcast %cst_299 : f32 to vector<8x8xf32>
    %797 = arith.subf %796, %795 : vector<8x8xf32>
    %798 = arith.mulf %797, %759 : vector<8x8xf32>
    %799 = arith.mulf %795, %793 : vector<8x8xf32>
    %800 = arith.addf %798, %799 : vector<8x8xf32>
    %801 = vector.broadcast %c4_i32_288 : i32 to vector<8x1xi32>
    %802 = arith.cmpi slt, %801, %0 : vector<8x1xi32>
    %803 = vector.shape_cast %802 : vector<8x1xi1> to vector<8x1xi1>
    %804 = vector.broadcast %803 : vector<8x1xi1> to vector<8x8xi1>
    %805 = arith.select %804, %800, %759 : vector<8x8xi1>, vector<8x8xf32>
    %c5_i32_300 = arith.constant 5 : i32
    %c8_i32_301 = arith.constant 8 : i32
    %806 = arith.muli %c5_i32_300, %c8_i32_301 : i32
    %807 = tpu.assume_multiple %806, 8 : i32
    %808 = arith.index_cast %807 : i32 to index
    %c0_302 = arith.constant 0 : index
    %809 = vector.load %arg39[%808, %c0_302] : memref<64x1xf32, #tpu.memory_space<vmem>>, vector<8x1xf32>
    %cst_303 = arith.constant dense<0.000000e+00> : vector<8x8xf32>
    %810 = tpu.matmul %805, %564, %cst_303 {dimension_numbers = #tpu.dot_dimension_numbers<[1], [0], [0], [1], [0, 0, 1, 1], [], []>} : vector<8x8xf32>, vector<8x8xf32>, vector<8x8xf32> -> vector<8x8xf32>
    %811 = vector.broadcast %570 : vector<1x8xf32> to vector<8x8xf32>
    %812 = arith.addf %810, %811 : vector<8x8xf32>
    %cst_304 = arith.constant dense<0.000000e+00> : vector<8x8xf32>
    %813 = tpu.matmul %805, %566, %cst_304 {dimension_numbers = #tpu.dot_dimension_numbers<[1], [0], [0], [1], [0, 0, 1, 1], [], []>} : vector<8x8xf32>, vector<8x8xf32>, vector<8x8xf32> -> vector<8x8xf32>
    %814 = vector.broadcast %572 : vector<1x8xf32> to vector<8x8xf32>
    %815 = arith.addf %813, %814 : vector<8x8xf32>
    %cst_305 = arith.constant dense<0.000000e+00> : vector<8x8xf32>
    %816 = tpu.matmul %805, %568, %cst_305 {dimension_numbers = #tpu.dot_dimension_numbers<[1], [0], [0], [1], [0, 0, 1, 1], [], []>} : vector<8x8xf32>, vector<8x8xf32>, vector<8x8xf32> -> vector<8x8xf32>
    %817 = vector.broadcast %574 : vector<1x8xf32> to vector<8x8xf32>
    %818 = arith.addf %816, %817 : vector<8x8xf32>
    %819 = arith.index_cast %807 : i32 to index
    %c0_306 = arith.constant 0 : index
    %820 = vector.load %arg36[%819, %c0_306] : memref<64x8xf32, #tpu.memory_space<vmem>>, vector<8x8xf32>
    %821 = arith.addf %820, %812 : vector<8x8xf32>
    %822 = arith.negf %821 : vector<8x8xf32>
    %823 = math.exp %822 : vector<8x8xf32>
    %cst_307 = arith.constant 1.000000e+00 : f32
    %824 = vector.broadcast %cst_307 : f32 to vector<8x8xf32>
    %825 = arith.addf %824, %823 : vector<8x8xf32>
    %826 = arith.divf %824, %825 : vector<8x8xf32>
    %827 = arith.index_cast %807 : i32 to index
    %c0_308 = arith.constant 0 : index
    %828 = vector.load %arg37[%827, %c0_308] : memref<64x8xf32, #tpu.memory_space<vmem>>, vector<8x8xf32>
    %829 = arith.addf %828, %815 : vector<8x8xf32>
    %830 = arith.negf %829 : vector<8x8xf32>
    %831 = math.exp %830 : vector<8x8xf32>
    %cst_309 = arith.constant 1.000000e+00 : f32
    %832 = vector.broadcast %cst_309 : f32 to vector<8x8xf32>
    %833 = arith.addf %832, %831 : vector<8x8xf32>
    %834 = arith.divf %832, %833 : vector<8x8xf32>
    %835 = arith.index_cast %807 : i32 to index
    %c0_310 = arith.constant 0 : index
    %836 = vector.load %arg38[%835, %c0_310] : memref<64x8xf32, #tpu.memory_space<vmem>>, vector<8x8xf32>
    %837 = arith.mulf %826, %818 : vector<8x8xf32>
    %838 = arith.addf %836, %837 : vector<8x8xf32>
    %839 = math.tanh %838 : vector<8x8xf32>
    %840 = vector.broadcast %809 : vector<8x1xf32> to vector<8x8xf32>
    %841 = arith.mulf %840, %834 : vector<8x8xf32>
    %cst_311 = arith.constant 1.000000e+00 : f32
    %842 = vector.broadcast %cst_311 : f32 to vector<8x8xf32>
    %843 = arith.subf %842, %841 : vector<8x8xf32>
    %844 = arith.mulf %843, %805 : vector<8x8xf32>
    %845 = arith.mulf %841, %839 : vector<8x8xf32>
    %846 = arith.addf %844, %845 : vector<8x8xf32>
    %847 = vector.broadcast %c5_i32_300 : i32 to vector<8x1xi32>
    %848 = arith.cmpi slt, %847, %0 : vector<8x1xi32>
    %849 = vector.shape_cast %848 : vector<8x1xi1> to vector<8x1xi1>
    %850 = vector.broadcast %849 : vector<8x1xi1> to vector<8x8xi1>
    %851 = arith.select %850, %846, %805 : vector<8x8xi1>, vector<8x8xf32>
    %c6_i32_312 = arith.constant 6 : i32
    %c8_i32_313 = arith.constant 8 : i32
    %852 = arith.muli %c6_i32_312, %c8_i32_313 : i32
    %853 = tpu.assume_multiple %852, 8 : i32
    %854 = arith.index_cast %853 : i32 to index
    %c0_314 = arith.constant 0 : index
    %855 = vector.load %arg39[%854, %c0_314] : memref<64x1xf32, #tpu.memory_space<vmem>>, vector<8x1xf32>
    %cst_315 = arith.constant dense<0.000000e+00> : vector<8x8xf32>
    %856 = tpu.matmul %851, %564, %cst_315 {dimension_numbers = #tpu.dot_dimension_numbers<[1], [0], [0], [1], [0, 0, 1, 1], [], []>} : vector<8x8xf32>, vector<8x8xf32>, vector<8x8xf32> -> vector<8x8xf32>
    %857 = vector.broadcast %570 : vector<1x8xf32> to vector<8x8xf32>
    %858 = arith.addf %856, %857 : vector<8x8xf32>
    %cst_316 = arith.constant dense<0.000000e+00> : vector<8x8xf32>
    %859 = tpu.matmul %851, %566, %cst_316 {dimension_numbers = #tpu.dot_dimension_numbers<[1], [0], [0], [1], [0, 0, 1, 1], [], []>} : vector<8x8xf32>, vector<8x8xf32>, vector<8x8xf32> -> vector<8x8xf32>
    %860 = vector.broadcast %572 : vector<1x8xf32> to vector<8x8xf32>
    %861 = arith.addf %859, %860 : vector<8x8xf32>
    %cst_317 = arith.constant dense<0.000000e+00> : vector<8x8xf32>
    %862 = tpu.matmul %851, %568, %cst_317 {dimension_numbers = #tpu.dot_dimension_numbers<[1], [0], [0], [1], [0, 0, 1, 1], [], []>} : vector<8x8xf32>, vector<8x8xf32>, vector<8x8xf32> -> vector<8x8xf32>
    %863 = vector.broadcast %574 : vector<1x8xf32> to vector<8x8xf32>
    %864 = arith.addf %862, %863 : vector<8x8xf32>
    %865 = arith.index_cast %853 : i32 to index
    %c0_318 = arith.constant 0 : index
    %866 = vector.load %arg36[%865, %c0_318] : memref<64x8xf32, #tpu.memory_space<vmem>>, vector<8x8xf32>
    %867 = arith.addf %866, %858 : vector<8x8xf32>
    %868 = arith.negf %867 : vector<8x8xf32>
    %869 = math.exp %868 : vector<8x8xf32>
    %cst_319 = arith.constant 1.000000e+00 : f32
    %870 = vector.broadcast %cst_319 : f32 to vector<8x8xf32>
    %871 = arith.addf %870, %869 : vector<8x8xf32>
    %872 = arith.divf %870, %871 : vector<8x8xf32>
    %873 = arith.index_cast %853 : i32 to index
    %c0_320 = arith.constant 0 : index
    %874 = vector.load %arg37[%873, %c0_320] : memref<64x8xf32, #tpu.memory_space<vmem>>, vector<8x8xf32>
    %875 = arith.addf %874, %861 : vector<8x8xf32>
    %876 = arith.negf %875 : vector<8x8xf32>
    %877 = math.exp %876 : vector<8x8xf32>
    %cst_321 = arith.constant 1.000000e+00 : f32
    %878 = vector.broadcast %cst_321 : f32 to vector<8x8xf32>
    %879 = arith.addf %878, %877 : vector<8x8xf32>
    %880 = arith.divf %878, %879 : vector<8x8xf32>
    %881 = arith.index_cast %853 : i32 to index
    %c0_322 = arith.constant 0 : index
    %882 = vector.load %arg38[%881, %c0_322] : memref<64x8xf32, #tpu.memory_space<vmem>>, vector<8x8xf32>
    %883 = arith.mulf %872, %864 : vector<8x8xf32>
    %884 = arith.addf %882, %883 : vector<8x8xf32>
    %885 = math.tanh %884 : vector<8x8xf32>
    %886 = vector.broadcast %855 : vector<8x1xf32> to vector<8x8xf32>
    %887 = arith.mulf %886, %880 : vector<8x8xf32>
    %cst_323 = arith.constant 1.000000e+00 : f32
    %888 = vector.broadcast %cst_323 : f32 to vector<8x8xf32>
    %889 = arith.subf %888, %887 : vector<8x8xf32>
    %890 = arith.mulf %889, %851 : vector<8x8xf32>
    %891 = arith.mulf %887, %885 : vector<8x8xf32>
    %892 = arith.addf %890, %891 : vector<8x8xf32>
    %893 = vector.broadcast %c6_i32_312 : i32 to vector<8x1xi32>
    %894 = arith.cmpi slt, %893, %0 : vector<8x1xi32>
    %895 = vector.shape_cast %894 : vector<8x1xi1> to vector<8x1xi1>
    %896 = vector.broadcast %895 : vector<8x1xi1> to vector<8x8xi1>
    %897 = arith.select %896, %892, %851 : vector<8x8xi1>, vector<8x8xf32>
    %c7_i32_324 = arith.constant 7 : i32
    %c8_i32_325 = arith.constant 8 : i32
    %898 = arith.muli %c7_i32_324, %c8_i32_325 : i32
    %899 = tpu.assume_multiple %898, 8 : i32
    %900 = arith.index_cast %899 : i32 to index
    %c0_326 = arith.constant 0 : index
    %901 = vector.load %arg39[%900, %c0_326] : memref<64x1xf32, #tpu.memory_space<vmem>>, vector<8x1xf32>
    %cst_327 = arith.constant dense<0.000000e+00> : vector<8x8xf32>
    %902 = tpu.matmul %897, %564, %cst_327 {dimension_numbers = #tpu.dot_dimension_numbers<[1], [0], [0], [1], [0, 0, 1, 1], [], []>} : vector<8x8xf32>, vector<8x8xf32>, vector<8x8xf32> -> vector<8x8xf32>
    %903 = vector.broadcast %570 : vector<1x8xf32> to vector<8x8xf32>
    %904 = arith.addf %902, %903 : vector<8x8xf32>
    %cst_328 = arith.constant dense<0.000000e+00> : vector<8x8xf32>
    %905 = tpu.matmul %897, %566, %cst_328 {dimension_numbers = #tpu.dot_dimension_numbers<[1], [0], [0], [1], [0, 0, 1, 1], [], []>} : vector<8x8xf32>, vector<8x8xf32>, vector<8x8xf32> -> vector<8x8xf32>
    %906 = vector.broadcast %572 : vector<1x8xf32> to vector<8x8xf32>
    %907 = arith.addf %905, %906 : vector<8x8xf32>
    %cst_329 = arith.constant dense<0.000000e+00> : vector<8x8xf32>
    %908 = tpu.matmul %897, %568, %cst_329 {dimension_numbers = #tpu.dot_dimension_numbers<[1], [0], [0], [1], [0, 0, 1, 1], [], []>} : vector<8x8xf32>, vector<8x8xf32>, vector<8x8xf32> -> vector<8x8xf32>
    %909 = vector.broadcast %574 : vector<1x8xf32> to vector<8x8xf32>
    %910 = arith.addf %908, %909 : vector<8x8xf32>
    %911 = arith.index_cast %899 : i32 to index
    %c0_330 = arith.constant 0 : index
    %912 = vector.load %arg36[%911, %c0_330] : memref<64x8xf32, #tpu.memory_space<vmem>>, vector<8x8xf32>
    %913 = arith.addf %912, %904 : vector<8x8xf32>
    %914 = arith.negf %913 : vector<8x8xf32>
    %915 = math.exp %914 : vector<8x8xf32>
    %cst_331 = arith.constant 1.000000e+00 : f32
    %916 = vector.broadcast %cst_331 : f32 to vector<8x8xf32>
    %917 = arith.addf %916, %915 : vector<8x8xf32>
    %918 = arith.divf %916, %917 : vector<8x8xf32>
    %919 = arith.index_cast %899 : i32 to index
    %c0_332 = arith.constant 0 : index
    %920 = vector.load %arg37[%919, %c0_332] : memref<64x8xf32, #tpu.memory_space<vmem>>, vector<8x8xf32>
    %921 = arith.addf %920, %907 : vector<8x8xf32>
    %922 = arith.negf %921 : vector<8x8xf32>
    %923 = math.exp %922 : vector<8x8xf32>
    %cst_333 = arith.constant 1.000000e+00 : f32
    %924 = vector.broadcast %cst_333 : f32 to vector<8x8xf32>
    %925 = arith.addf %924, %923 : vector<8x8xf32>
    %926 = arith.divf %924, %925 : vector<8x8xf32>
    %927 = arith.index_cast %899 : i32 to index
    %c0_334 = arith.constant 0 : index
    %928 = vector.load %arg38[%927, %c0_334] : memref<64x8xf32, #tpu.memory_space<vmem>>, vector<8x8xf32>
    %929 = arith.mulf %918, %910 : vector<8x8xf32>
    %930 = arith.addf %928, %929 : vector<8x8xf32>
    %931 = math.tanh %930 : vector<8x8xf32>
    %932 = vector.broadcast %901 : vector<8x1xf32> to vector<8x8xf32>
    %933 = arith.mulf %932, %926 : vector<8x8xf32>
    %cst_335 = arith.constant 1.000000e+00 : f32
    %934 = vector.broadcast %cst_335 : f32 to vector<8x8xf32>
    %935 = arith.subf %934, %933 : vector<8x8xf32>
    %936 = arith.mulf %935, %897 : vector<8x8xf32>
    %937 = arith.mulf %933, %931 : vector<8x8xf32>
    %938 = arith.addf %936, %937 : vector<8x8xf32>
    %939 = vector.broadcast %c7_i32_324 : i32 to vector<8x1xi32>
    %940 = arith.cmpi slt, %939, %0 : vector<8x1xi32>
    %941 = vector.shape_cast %940 : vector<8x1xi1> to vector<8x1xi1>
    %942 = vector.broadcast %941 : vector<8x1xi1> to vector<8x8xi1>
    %943 = arith.select %942, %938, %897 : vector<8x8xi1>, vector<8x8xf32>
    %c8_i32_336 = arith.constant 8 : i32
    %c0_337 = arith.constant 0 : index
    %c0_338 = arith.constant 0 : index
    %944 = vector.load %arg2[%c0_337, %c0_338] : memref<8x13xf32, #tpu.memory_space<vmem>>, vector<8x13xf32>
    %945 = tpu.iota {dimensions = array<i32: 0>} : vector<8x1xi32>
    %c4_i32_339 = arith.constant 4 : i32
    %946 = vector.broadcast %c4_i32_339 : i32 to vector<8x1xi32>
    %947 = arith.cmpi slt, %945, %946 : vector<8x1xi32>
    %948 = arith.extui %947 : vector<8x1xi1> to vector<8x1xi32>
    %949 = arith.sitofp %948 : vector<8x1xi32> to vector<8x1xf32>
    %c0_340 = arith.constant 0 : index
    %c0_341 = arith.constant 0 : index
    %950 = vector.load %arg20[%c0_340, %c0_341] : memref<1x8xf32, #tpu.memory_space<vmem>>, vector<1x8xf32>
    %c0_342 = arith.constant 0 : index
    %c0_343 = arith.constant 0 : index
    %951 = vector.load %arg22[%c0_342, %c0_343] : memref<1x8xf32, #tpu.memory_space<vmem>>, vector<1x8xf32>
    %952 = vector.broadcast %949 : vector<8x1xf32> to vector<8x8xf32>
    %953 = arith.mulf %943, %952 : vector<8x8xf32>
    %cst_344 = arith.constant dense<0.000000e+00> : vector<8xf32>
    %954 = vector.multi_reduction <add>, %953, %cst_344 [0] : vector<8x8xf32> to vector<8xf32>
    %955 = vector.shape_cast %954 : vector<8xf32> to vector<1x8xf32>
    %cst_345 = arith.constant 2.500000e-01 : f32
    %956 = vector.broadcast %cst_345 : f32 to vector<1x8xf32>
    %957 = arith.mulf %955, %956 : vector<1x8xf32>
    %958 = vector.broadcast %957 : vector<1x8xf32> to vector<8x8xf32>
    %959 = arith.subf %943, %958 : vector<8x8xf32>
    %960 = arith.mulf %959, %959 : vector<8x8xf32>
    %961 = vector.broadcast %949 : vector<8x1xf32> to vector<8x8xf32>
    %962 = arith.mulf %960, %961 : vector<8x8xf32>
    %cst_346 = arith.constant dense<0.000000e+00> : vector<8xf32>
    %963 = vector.multi_reduction <add>, %962, %cst_346 [0] : vector<8x8xf32> to vector<8xf32>
    %964 = vector.shape_cast %963 : vector<8xf32> to vector<1x8xf32>
    %cst_347 = arith.constant 2.500000e-01 : f32
    %965 = vector.broadcast %cst_347 : f32 to vector<1x8xf32>
    %966 = arith.mulf %964, %965 : vector<1x8xf32>
    %cst_348 = arith.constant 9.99999974E-6 : f32
    %967 = vector.broadcast %cst_348 : f32 to vector<1x8xf32>
    %968 = arith.addf %966, %967 : vector<1x8xf32>
    %969 = math.rsqrt %968 : vector<1x8xf32>
    %970 = vector.broadcast %969 : vector<1x8xf32> to vector<8x8xf32>
    %971 = arith.mulf %959, %970 : vector<8x8xf32>
    %972 = vector.broadcast %950 : vector<1x8xf32> to vector<8x8xf32>
    %973 = arith.mulf %971, %972 : vector<8x8xf32>
    %974 = vector.broadcast %951 : vector<1x8xf32> to vector<8x8xf32>
    %975 = arith.addf %973, %974 : vector<8x8xf32>
    %c0_349 = arith.constant 0 : index
    %c0_350 = arith.constant 0 : index
    %976 = vector.load %arg21[%c0_349, %c0_350] : memref<1x13xf32, #tpu.memory_space<vmem>>, vector<1x13xf32>
    %c0_351 = arith.constant 0 : index
    %c0_352 = arith.constant 0 : index
    %977 = vector.load %arg23[%c0_351, %c0_352] : memref<1x13xf32, #tpu.memory_space<vmem>>, vector<1x13xf32>
    %978 = vector.broadcast %949 : vector<8x1xf32> to vector<8x13xf32>
    %979 = arith.mulf %944, %978 : vector<8x13xf32>
    %cst_353 = arith.constant dense<0.000000e+00> : vector<13xf32>
    %980 = vector.multi_reduction <add>, %979, %cst_353 [0] : vector<8x13xf32> to vector<13xf32>
    %981 = vector.shape_cast %980 : vector<13xf32> to vector<1x13xf32>
    %cst_354 = arith.constant 2.500000e-01 : f32
    %982 = vector.broadcast %cst_354 : f32 to vector<1x13xf32>
    %983 = arith.mulf %981, %982 : vector<1x13xf32>
    %984 = vector.broadcast %983 : vector<1x13xf32> to vector<8x13xf32>
    %985 = arith.subf %944, %984 : vector<8x13xf32>
    %986 = arith.mulf %985, %985 : vector<8x13xf32>
    %987 = vector.broadcast %949 : vector<8x1xf32> to vector<8x13xf32>
    %988 = arith.mulf %986, %987 : vector<8x13xf32>
    %cst_355 = arith.constant dense<0.000000e+00> : vector<13xf32>
    %989 = vector.multi_reduction <add>, %988, %cst_355 [0] : vector<8x13xf32> to vector<13xf32>
    %990 = vector.shape_cast %989 : vector<13xf32> to vector<1x13xf32>
    %cst_356 = arith.constant 2.500000e-01 : f32
    %991 = vector.broadcast %cst_356 : f32 to vector<1x13xf32>
    %992 = arith.mulf %990, %991 : vector<1x13xf32>
    %cst_357 = arith.constant 9.99999974E-6 : f32
    %993 = vector.broadcast %cst_357 : f32 to vector<1x13xf32>
    %994 = arith.addf %992, %993 : vector<1x13xf32>
    %995 = math.rsqrt %994 : vector<1x13xf32>
    %996 = vector.broadcast %995 : vector<1x13xf32> to vector<8x13xf32>
    %997 = arith.mulf %985, %996 : vector<8x13xf32>
    %998 = vector.broadcast %976 : vector<1x13xf32> to vector<8x13xf32>
    %999 = arith.mulf %997, %998 : vector<8x13xf32>
    %1000 = vector.broadcast %977 : vector<1x13xf32> to vector<8x13xf32>
    %1001 = arith.addf %999, %1000 : vector<8x13xf32>
    %c0_358 = arith.constant 0 : index
    %c0_359 = arith.constant 0 : index
    %1002 = vector.load %arg24[%c0_358, %c0_359] : memref<8x256xf32, #tpu.memory_space<vmem>>, vector<8x256xf32>
    %cst_360 = arith.constant dense<0.000000e+00> : vector<8x256xf32>
    %1003 = tpu.matmul %975, %1002, %cst_360 {dimension_numbers = #tpu.dot_dimension_numbers<[1], [0], [0], [1], [0, 0, 1, 1], [], []>} : vector<8x8xf32>, vector<8x256xf32>, vector<8x256xf32> -> vector<8x256xf32>
    %c0_361 = arith.constant 0 : index
    %c0_362 = arith.constant 0 : index
    %1004 = vector.load %arg25[%c0_361, %c0_362] : memref<13x256xf32, #tpu.memory_space<vmem>>, vector<13x256xf32>
    %cst_363 = arith.constant dense<0.000000e+00> : vector<8x256xf32>
    %1005 = tpu.matmul %1001, %1004, %cst_363 {dimension_numbers = #tpu.dot_dimension_numbers<[1], [0], [0], [1], [0, 0, 1, 1], [], []>} : vector<8x13xf32>, vector<13x256xf32>, vector<8x256xf32> -> vector<8x256xf32>
    %1006 = arith.addf %1003, %1005 : vector<8x256xf32>
    %c0_364 = arith.constant 0 : index
    %c0_365 = arith.constant 0 : index
    %1007 = vector.load %arg26[%c0_364, %c0_365] : memref<1x256xf32, #tpu.memory_space<vmem>>, vector<1x256xf32>
    %1008 = vector.broadcast %1007 : vector<1x256xf32> to vector<8x256xf32>
    %1009 = arith.addf %1006, %1008 : vector<8x256xf32>
    %cst_366 = arith.constant 0.000000e+00 : f32
    %1010 = vector.broadcast %cst_366 : f32 to vector<8x256xf32>
    %1011 = arith.maximumf %1009, %1010 : vector<8x256xf32>
    %c0_367 = arith.constant 0 : index
    %c0_368 = arith.constant 0 : index
    %1012 = vector.load %arg27[%c0_367, %c0_368] : memref<256x128xf32, #tpu.memory_space<vmem>>, vector<256x128xf32>
    %cst_369 = arith.constant dense<0.000000e+00> : vector<8x128xf32>
    %1013 = tpu.matmul %1011, %1012, %cst_369 {dimension_numbers = #tpu.dot_dimension_numbers<[1], [0], [0], [1], [0, 0, 1, 1], [], []>} : vector<8x256xf32>, vector<256x128xf32>, vector<8x128xf32> -> vector<8x128xf32>
    %c0_370 = arith.constant 0 : index
    %c0_371 = arith.constant 0 : index
    %1014 = vector.load %arg28[%c0_370, %c0_371] : memref<1x128xf32, #tpu.memory_space<vmem>>, vector<1x128xf32>
    %1015 = vector.broadcast %1014 : vector<1x128xf32> to vector<8x128xf32>
    %1016 = arith.addf %1013, %1015 : vector<8x128xf32>
    %cst_372 = arith.constant 0.000000e+00 : f32
    %1017 = vector.broadcast %cst_372 : f32 to vector<8x128xf32>
    %1018 = arith.maximumf %1016, %1017 : vector<8x128xf32>
    %c0_373 = arith.constant 0 : index
    %c0_374 = arith.constant 0 : index
    %1019 = vector.load %arg29[%c0_373, %c0_374] : memref<128x1xf32, #tpu.memory_space<vmem>>, vector<128x1xf32>
    %cst_375 = arith.constant dense<0.000000e+00> : vector<8x1xf32>
    %1020 = tpu.matmul %1018, %1019, %cst_375 {dimension_numbers = #tpu.dot_dimension_numbers<[1], [0], [0], [1], [0, 0, 1, 1], [], []>} : vector<8x128xf32>, vector<128x1xf32>, vector<8x1xf32> -> vector<8x1xf32>
    %c0_376 = arith.constant 0 : index
    %c0_377 = arith.constant 0 : index
    %1021 = vector.load %arg30[%c0_376, %c0_377] : memref<1x1xf32, #tpu.memory_space<vmem>>, vector<1x1xf32>
    %1022 = vector.broadcast %1021 : vector<1x1xf32> to vector<8x1xf32>
    %1023 = arith.addf %1020, %1022 : vector<8x1xf32>
    %c0_378 = arith.constant 0 : index
    %c0_379 = arith.constant 0 : index
    %1024 = vector.load %arg31[%c0_378, %c0_379] : memref<8x1xf32, #tpu.memory_space<vmem>>, vector<8x1xf32>
    tpu.vector_store %arg31[%c0_378, %c0_379], %1023 {strides = array<i32>} : memref<8x1xf32, #tpu.memory_space<vmem>>, vector<8x1xf32>,
    return
  }
}

</mosaic_0001>

<bundles_post_ra>
// kernel: dien_forward.1
= control target key start
LH: loop header
LB: loop body
LE: loop exit
PB: predicated region body
PF: predicated region fallthrough
CT: control target
= control target key end

     0   :  { %s7335_s3 = smov 4   ;;  %v7336_v0 = vmov 0   ;;  %s7337_s10 = smov 5   ;;  %vm151_vm0 = vcmask 64512   ;;  %v7339_v7 = vmov 0.0   ;;  %vm7340_vm5 = vmmov 0   ;;  %s8292_s0 = inlined_call_operand.smem [shape: u32[32], index: -1, kind: input, shape index: {}] }
   0x1   :  { %s6183_s6 = sld [smem:[%s8292_s0 + %s7335_s3]]   ;;  %7149 = vset.pattern.permute.xlu0 %v7336_v0  ;;  %7150 = vset.pattern.permute.xlu1 %v7336_v0  ;;  %s7338_s14 = smov 3  }
   0x2   :  { %s7382_s9 = sld [smem:[%s8292_s0]]   ;;  %s7341_s18 = smov 6  }
   0x3   :  { %s7387_s13 = sld [smem:[%s8292_s0 + %s7337_s10]]   ;;  %s7342_s22 = smov 7  }
   0x4   :  { %s6182_s17 = sld [smem:[%s8292_s0 + %s7338_s14]]   ;;  %s7343_s26 = smov 10  }
   0x5   :  { %s7479_s21 = sld [smem:[%s8292_s0 + %s7341_s18]]   ;;  %s7344_s30 = smov 1  }
   0x6   :  { %s7489_s25 = sld [smem:[%s8292_s0 + %s7342_s22]]   ;;  %s7345_s4 = smov 9  }
   0x7   :  { %v6220_v1 = vld [vmem:[%s6183_s6 + $0x8] sm:$0xff]  ;;  %v143_v2 = vld [vmem:[%s6183_s6] sm:$0xff]  ;;  %v6231_v9 = vld [vmem:[%s6183_s6 + $0x10] sm:$0xff]  ;;  %s6189_s29 = sld [smem:[%s8292_s0 + %s7343_s26]]   ;;  %s7346_s8 = smov 8  }
   0x8   :  { %6684 = vmatprep.subr.mxu1 %v6220_v1  ;;  %v135_v3 = vld [vmem:[%s7382_s9] sm:$0xff]  ;;  %v136_v4 = vld [vmem:[%s7382_s9 + $0x8] sm:$0xff]  ;;  %6670 = vmatprep.subr.mxu0 %v143_v2  ;;  %v137_v5 = vld [vmem:[%s7382_s9 + $0x10] sm:$0xff]  ;;  %s6180_s3 = sld [smem:[%s8292_s0 + %s7344_s30]]   ;;  %s7347_s12 = smov 12  }
   0x9   :  { %6685 = vmatpush3.msra.mxu1 %v6220_v1  ;;  %6686 = vmatprep.mubr.msk.f32.mxu1 %vm151_vm0, %v135_v3  ;;  %v7397_v6 = vld [vmem:[%s7387_s13] sm:$0xff]  ;;  %v138_v8 = vld [vmem:[%s7382_s9 + $0x18] sm:$0xff]  ;;  %v140_v13 = vld [vmem:[%s7382_s9 + $0x28] sm:$0xff]  ;;  %s6188_s7 = sld [smem:[%s8292_s0 + %s7345_s4]]   ;;  %s7348_s16 = smov 16  }
   0xa   :  { %6687 = vmatmul.mubr.msk.f32.vlgmr.msra.gmra.mxu1 %vm151_vm0, %v136_v4  ;;  %6712 = vmatprep.subr.mxu1 %v7339_v7  ;;  %v7404_v10 = vld [vmem:[%s6182_s17] sm:$0xff]  ;;  %v141_v14 = vld [vmem:[%s7382_s9 + $0x30] sm:$0xff]  ;;  %v142_v16 = vld [vmem:[%s7382_s9 + $0x38] sm:$0xff]  ;;  %s6187_s11 = sld [smem:[%s8292_s0 + %s7346_s8]]   ;;  %s7349_s20 = smov 14  }
   0xb   :  { %6713 = vmatpush3.msra.mxu1 %v7397_v6  ;;  %6689 = vmatprep.mubr.msk.f32.mxu1 %vm151_vm0, %v137_v5  ;;  %v139_v11 = vld [vmem:[%s7382_s9 + $0x20] sm:$0xff]  ;;  %vm800_vm1 = vcmp.gt.s32.totalorder %v7404_v10, 0  ;;  %vm1048_vm2 = vcmp.gt.s32.totalorder %v7404_v10, 1  ;;  %vm1798_vm3 = vcmp.gt.s32.totalorder %v7404_v10, 4  ;;  %vm2298_vm4 = vcmp.gt.s32.totalorder %v7404_v10, 6  ;;  %v7440_v18 = vld [vmem:[%s7387_s13 + $0x8] sm:$0xff]  ;;  %s6191_s15 = sld [smem:[%s8292_s0 + %s7347_s12]]  }
   0xc   :  { %6671 = vmatpush3.msra.mxu0 %v143_v2  ;;  %6672 = vmatprep.mubr.msk.f32.mxu0 %vm151_vm0, %v135_v3  ;;  %v801_v12 = vsel %vm800_vm1, 1, %v7336_v0  ;;  %v1049_v15 = vsel %vm1048_vm2, 1, %v7336_v0  ;;  %v1799_v17 = vsel %vm1798_vm3, 1, %v7336_v0  ;;  %v2299_v19 = vsel %vm2298_vm4, 1, %v7336_v0  ;;  %v7453_v20 = vld [vmem:[%s7387_s13 + $0x10] sm:$0xff]  ;;  %s7823_s19 = sld [smem:[%s8292_s0 + %s7348_s16]]   ;;  %s7350_s24 = smov 11  }
   0xd   :  { %6673 = vmatmul.mubr.msk.f32.vlgmr.msra.gmra.mxu0 %vm151_vm0, %v136_v4  ;;  %6717 = vmatprep.subr.mxu1 %v7339_v7  ;;  %v6222_v21 = vld [vmem:[%s7479_s21 + $0x1] ss:$0 sm:$0xff]  ;;  %v6211_v24 = vld [vmem:[%s7479_s21] ss:$0 sm:$0xff]  ;;  %v6233_v57 = vld [vmem:[%s7479_s21 + $0x2] ss:$0 sm:$0xff]  ;;  %s7829_s23 = sld [smem:[%s8292_s0 + %s7349_s20]]  }
   0xe   :  { %6690 = vmatmul.mubr.msk.f32.gmra.mxu1 %vm151_vm0, %v138_v8  ;;  %6698 = vmatprep.subr.mxu0 %v6231_v9  ;;  %v7499_v49 = vld [vmem:[%s7489_s25] ss:$0 sm:$0xff]  ;;  %v7508_v60 = vld [vmem:[%s7489_s25 + $0x1] ss:$0 sm:$0xff]  ;;  %vm1298_vm7 = vcmp.gt.s32.totalorder %v7404_v10, 2  ;;  %vm1548_vm8 = vcmp.gt.s32.totalorder %v7404_v10, 3  ;;  %s6190_s27 = sld [smem:[%s8292_s0 + %s7350_s24]]  }
   0xf   :  { %6692 = vmatprep.mubr.msk.f32.mxu1 %vm151_vm0, %v139_v11  ;;  %6699 = vmatpush3.msra.mxu0 %v6231_v9  ;;  %vm2048_vm9 = vcmp.gt.s32.totalorder %v7404_v10, 5  ;;  %vm2548_vm10 = vcmp.gt.s32.totalorder %v7404_v10, 7  ;;  %s7351_s28 = smov 17   ;;  %s7352_s2 = smov 15  }
  0x10   :  { %6675 = vmatprep.mubr.msk.f32.mxu0 %vm151_vm0, %v137_v5  ;;  %803 = vperm.xlu0 %7149, %v801_v12   ;;  %s7884_s1 = sld [smem:[%s8292_s0 + %s7351_s28]]   ;;  %s7353_s6 = smov 13  }
  0x11   :  { %6676 = vmatmul.mubr.msk.f32.gmra.mxu0 %vm151_vm0, %v138_v8  ;;  %6732 = vmatprep.subr.mxu0 %v7339_v7  ;;  %s6194_s5 = sld [smem:[%s8292_s0 + %s7352_s2]]   ;;  %s7354_s10 = smov 18  }
  0x12   :  { %6693 = vmatmul.mubr.msk.f32.gmra.mxu1 %vm151_vm0, %v140_v13  ;;  %6678 = vmatprep.mubr.msk.f32.mxu0 %vm151_vm0, %v139_v11  ;;  %s6192_s9 = sld [smem:[%s8292_s0 + %s7353_s6]]   ;;  %s7355_s14 = smov 19  }
  0x13   :  { %6695 = vmatprep.mubr.msk.f32.mxu1 %vm151_vm0, %v141_v14  ;;  %s7908_s13 = sld [smem:[%s8292_s0 + %s7354_s10]]   ;;  %s7356_s18 = smov 25  }
  0x14   :  { %1051 = vperm.xlu0 %7149, %v1049_v15   ;;  %s7995_s17 = sld [smem:[%s8292_s0 + %s7355_s14]]   ;;  %s7357_s22 = smov 24  }
  0x15   :  { %6679 = vmatmul.mubr.msk.f32.gmra.mxu0 %vm151_vm0, %v140_v13  ;;  %s6204_s21 = sld [smem:[%s8292_s0 + %s7356_s18]]   ;;  %s7358_s26 = smov 2  }
  0x16   :  { %6696 = vmatmul.mubr.msk.f32.gmra.mxu1 %vm151_vm0, %v142_v16  ;;  %6681 = vmatprep.mubr.msk.f32.mxu0 %vm151_vm0, %v141_v14  ;;  %s7359_s30 = smov 21   ;;  %s7360_s4 = smov 23  }
  0x17   :  { %6714 = vmatprep.mubr.msk.f32.mxu1 %vm7340_vm5, %v7339_v7  ;;  %s7361_s8 = smov 27   ;;  %s7362_s12 = smov 20  }
  0x18   :  { %1801 = vperm.xlu0 %7149, %v1799_v17   ;;  %s7363_s16 = smov 22   ;;  %s7364_s20 = smov 29  }
  0x19   :  { %6682 = vmatmul.mubr.msk.f32.gmra.mxu0 %vm151_vm0, %v142_v16  ;;  %s7365_s24 = smov 26   ;;  %s7366_s28 = smov 30  }
  0x1a   :  { %6715 = vmatmul.mubr.f32.vlgmr.msra.gmra.mxu1 %v7339_v7  ;;  %6700 = vmatprep.mubr.msk.f32.mxu0 %vm151_vm0, %v135_v3  ;;  %s7367_s2 = smov 28   ;;  %s7368_s6 = smov 31  }
  0x1b   :  { %6718 = vmatpush3.msra.mxu1 %v7440_v18  ;;  %6719 = vmatprep.mubr.msk.f32.mxu1 %vm7340_vm5, %v7339_v7 }
  0x1c   :  { %6722 = vmatprep.subr.mxu1 %v7339_v7  ;;  %2301 = vperm.xlu0 %7149, %v2299_v19  }
  0x1d   :  { %6701 = vmatmul.mubr.msk.f32.vlgmr.msra.gmra.mxu0 %vm151_vm0, %v136_v4 }
  0x1e   :  { %6720 = vmatmul.mubr.f32.vlgmr.msra.gmra.mxu1 %v7339_v7  ;;  %6703 = vmatprep.mubr.msk.f32.mxu0 %vm151_vm0, %v137_v5 }
  0x1f   :  { %6723 = vmatpush3.msra.mxu1 %v7453_v20  ;;  %6724 = vmatprep.mubr.msk.f32.mxu1 %vm7340_vm5, %v7339_v7 }
  0x20   :  { %6727 = vmatprep.subr.mxu1 %v7339_v7  ;;  %6733 = vmatpush3.msra.mxu0 %v7440_v18 }
  0x21   :  { %6704 = vmatmul.mubr.msk.f32.gmra.mxu0 %vm151_vm0, %v138_v8  ;;  %6742 = vmatprep.subr.mxu0 %v7339_v7 }
  0x22   :  { %6725 = vmatmul.mubr.f32.vlgmr.msra.gmra.mxu1 %v7339_v7  ;;  %6706 = vmatprep.mubr.msk.f32.mxu0 %vm151_vm0, %v139_v11 }
  0x23   :  { %6728 = vmatpush3.msra.mxu1 %v7397_v6  ;;  %6729 = vmatprep.mubr.msk.f32.mxu1 %vm7340_vm5, %v7339_v7 }
  0x24   :  { %6737 = vmatprep.subr.mxu1 %v7339_v7 }
  0x25   :  { %6707 = vmatmul.mubr.msk.f32.gmra.mxu0 %vm151_vm0, %v140_v13 }
  0x26   :  { %6709 = vmatprep.mubr.msk.f32.mxu0 %vm151_vm0, %v141_v14 }
  0x29   :  { %6710 = vmatmul.mubr.msk.f32.gmra.mxu0 %vm151_vm0, %v142_v16 }
  0x2a   :  { %6734 = vmatprep.mubr.msk.f32.mxu0 %vm7340_vm5, %v7339_v7 }
  0xca   :  { %v6688_v22 = vpop.f32.mrf.mxu1 }
  0xcb   :  { %v371_v23 = vadd.f32 %v6688_v22, %v6222_v21 }
  0xcc   :  { %v365_v25 = vpop.f32.mrf.mxu1 }
  0xcd   :  { %405 = vst.msk [vmem:[#allocation3 + $0x8] sm:$0xff] %vm151_vm0, %v371_v23  ;;  %v366_v26 = vadd.f32 %v6222_v21, %v365_v25  ;;  %v6674_v27 = vpop.f32.mrf.mxu0 }
  0xce   :  { %v6691_v28 = vpop.f32.mrf.mxu1  ;;  %v248_v29 = vadd.f32 %v6674_v27, %v6211_v24 }
  0xcf   :  { %404 = vst.msk [vmem:[#allocation3] sm:$0xff] %vm151_vm0, %v366_v26  ;;  %v381_v30 = vadd.f32 %v6691_v28, %v6222_v21  ;;  %v242_v31 = vpop.f32.mrf.mxu0 }
  0xd0   :  { %282 = vst.msk [vmem:[#allocation2 + $0x8] sm:$0xff] %vm151_vm0, %v248_v29  ;;  %v375_v32 = vpop.f32.mrf.mxu1  ;;  %v243_v33 = vadd.f32 %v6211_v24, %v242_v31 }
  0xd1   :  { %407 = vst.msk [vmem:[#allocation3 + $0x18] sm:$0xff] %vm151_vm0, %v381_v30  ;;  %v376_v34 = vadd.f32 %v6222_v21, %v375_v32  ;;  %v6677_v35 = vpop.f32.mrf.mxu0 }
  0xd2   :  { %281 = vst.msk [vmem:[#allocation2] sm:$0xff] %vm151_vm0, %v243_v33  ;;  %v6694_v36 = vpop.f32.mrf.mxu1  ;;  %v258_v37 = vadd.f32 %v6677_v35, %v6211_v24  ;;  %v7522_v33 = vld [vmem:[%s7489_s25 + $0x2] ss:$0 sm:$0xff]  ;;  %s6203_s25 = sld [smem:[%s8292_s0 + %s7357_s22]]  }
  0xd3   :  { %406 = vst.msk [vmem:[#allocation3 + $0x10] sm:$0xff] %vm151_vm0, %v376_v34  ;;  %v391_v38 = vadd.f32 %v6694_v36, %v6222_v21  ;;  %v252_v39 = vpop.f32.mrf.mxu0 }
  0xd4   :  { %v385_v40 = vpop.f32.mrf.mxu1  ;;  %284 = vst.msk [vmem:[#allocation2 + $0x18] sm:$0xff] %vm151_vm0, %v258_v37  ;;  %v253_v41 = vadd.f32 %v6211_v24, %v252_v39 }
  0xd5   :  { %409 = vst.msk [vmem:[#allocation3 + $0x28] sm:$0xff] %vm151_vm0, %v391_v38  ;;  %v386_v42 = vadd.f32 %v6222_v21, %v385_v40  ;;  %v6680_v43 = vpop.f32.mrf.mxu0 }
  0xd6   :  { %v6697_v44 = vpop.f32.mrf.mxu1  ;;  %283 = vst.msk [vmem:[#allocation2 + $0x10] sm:$0xff] %vm151_vm0, %v253_v41  ;;  %v268_v45 = vadd.f32 %v6680_v43, %v6211_v24  ;;  %v784_v12 = vld [vmem:[#allocation3] sm:$0xff]  ;;  %v7525_v43 = vpop.permute.xlu0 %803 }
  0xd7   :  { %408 = vst.msk [vmem:[#allocation3 + $0x20] sm:$0xff] %vm151_vm0, %v386_v42  ;;  %v401_v46 = vadd.f32 %v6697_v44, %v6222_v21  ;;  %v262_v47 = vpop.f32.mrf.mxu0  ;;  %vm805_vm6 = vcmp.eq.s32.totalorder %v7525_v43, 1 }
  0xd8   :  { %v395_v48 = vpop.f32.mrf.mxu1  ;;  %286 = vst.msk [vmem:[#allocation2 + $0x28] sm:$0xff] %vm151_vm0, %v268_v45  ;;  %v263_v50 = vadd.f32 %v6211_v24, %v262_v47 }
  0xd9   :  { %411 = vst.msk [vmem:[#allocation3 + $0x38] sm:$0xff] %vm151_vm0, %v401_v46  ;;  %v396_v51 = vadd.f32 %v6222_v21, %v395_v48  ;;  %v6683_v52 = vpop.f32.mrf.mxu0  ;;  %v776_v58 = vld [vmem:[#allocation2] sm:$0xff]  ;;  %v1299_v48 = vsel %vm1298_vm7, 1, %v7336_v0 }
  0xda   :  { %v620_v53 = vpop.f32.mrf.mxu1  ;;  %285 = vst.msk [vmem:[#allocation2 + $0x20] sm:$0xff] %vm151_vm0, %v263_v50  ;;  %v278_v54 = vadd.f32 %v6683_v52, %v6211_v24  ;;  %1301 = vperm.xlu1 %7150, %v1299_v48   ;;  %v1549_v50 = vsel %vm1548_vm8, 1, %v7336_v0  ;;  %v2549_v52 = vsel %vm2548_vm10, 1, %v7336_v0 }
  0xdb   :  { %410 = vst.msk [vmem:[#allocation3 + $0x30] sm:$0xff] %vm151_vm0, %v396_v51  ;;  %v621_v55 = vadd.f32 %v7499_v49, %v620_v53  ;;  %v272_v56 = vpop.f32.mrf.mxu0  ;;  %v2049_v51 = vsel %vm2048_vm9, 1, %v7336_v0 }
  0xdc   :  { %v6716_v59 = vpop.f32.mrf.mxu1  ;;  %288 = vst.msk [vmem:[#allocation2 + $0x38] sm:$0xff] %vm151_vm0, %v278_v54  ;;  %v273_v61 = vadd.f32 %v6211_v24, %v272_v56  ;;  %v1022_v56 = vld [vmem:[#allocation2 + $0x8] sm:$0xff] }
  0xdd   :  { %v777_v62 = vadd.f32 %v776_v58, %v621_v55  ;;  %v6702_v63 = vpop.f32.mrf.mxu0 }
  0xde   :  { %v696_v1 = vpop.f32.mrf.mxu1  ;;  %287 = vst.msk [vmem:[#allocation2 + $0x30] sm:$0xff] %vm151_vm0, %v273_v61  ;;  %v494_v2 = vadd.f32 %v6702_v63, %v6233_v57  ;;  %1551 = vperm.xlu1 %7150, %v1549_v50  }
  0xdf   :  { %v6249_v3 = vmul.f32 -1.442695, %v777_v62  ;;  %v697_v4 = vadd.f32 %v7508_v60, %v696_v1  ;;  %v488_v5 = vpop.f32.mrf.mxu0 }
  0xe0   :  { %v6721_v8 = vpop.f32.mrf.mxu1  ;;  %528 = vst.msk [vmem:[#allocation4 + $0x8] sm:$0xff] %vm151_vm0, %v494_v2  ;;  %v489_v9 = vadd.f32 %v6233_v57, %v488_v5  ;;  %v1031_v2 = vld [vmem:[#allocation3 + $0x8] sm:$0xff] }
  0xe1   :  { %7151 = vpow2.f32 %v6249_v3  ;;  %v6705_v11 = vpop.f32.mrf.mxu0  ;;  %v785_v15 = vadd.f32 %v784_v12, %v697_v4 }
  0xe2   :  { %527 = vst.msk [vmem:[#allocation4] sm:$0xff] %vm151_vm0, %v489_v9  ;;  %v772_v13 = vpop.f32.mrf.mxu1  ;;  %v504_v14 = vadd.f32 %v6705_v11, %v6233_v57  ;;  %2051 = vperm.xlu1 %7150, %v2049_v51  }
  0xe3   :  { %v498_v16 = vpop.f32.mrf.mxu0  ;;  %v6250_v23 = vmul.f32 -1.442695, %v785_v15  ;;  %v773_v35 = vadd.f32 %v7522_v33, %v772_v13 }
  0xe4   :  { %v6726_v17 = vpop.f32.mrf.mxu1  ;;  %530 = vst.msk [vmem:[#allocation4 + $0x18] sm:$0xff] %vm151_vm0, %v504_v14  ;;  %v499_v19 = vadd.f32 %v6233_v57, %v498_v16 }
  0xe5   :  { %v6708_v21 = vpop.f32.mrf.mxu0  ;;  %7153 = vpow2.f32 %v6250_v23  ;;  %v7572_v23 = vpop.permute.xlu0 %1051 }
  0xe6   :  { %529 = vst.msk [vmem:[#allocation4 + $0x10] sm:$0xff] %vm151_vm0, %v499_v19  ;;  %v514_v22 = vadd.f32 %v6708_v21, %v6233_v57  ;;  %2551 = vperm.xlu1 %7150, %v2549_v52   ;;  %vm1053_vm11 = vcmp.eq.s32.totalorder %v7572_v23, 1 }
  0xe7   :  { %v508_v24 = vpop.f32.mrf.mxu0  ;;  %v1040_v14 = vld [vmem:[#allocation4 + $0x8] sm:$0xff] }
  0xe8   :  { %532 = vst.msk [vmem:[#allocation4 + $0x28] sm:$0xff] %vm151_vm0, %v514_v22  ;;  %v509_v25 = vadd.f32 %v6233_v57, %v508_v24 }
  0xe9   :  { %v6711_v26 = vpop.f32.mrf.mxu0  ;;  %v792_v38 = vld [vmem:[#allocation4] sm:$0xff] }
  0xea   :  { %531 = vst.msk [vmem:[#allocation4 + $0x20] sm:$0xff] %vm151_vm0, %v509_v25  ;;  %v524_v27 = vadd.f32 %v6711_v26, %v6233_v57 }
  0xeb   :  { %v518_v28 = vpop.f32.mrf.mxu0 }
  0xec   :  { %534 = vst.msk [vmem:[#allocation4 + $0x38] sm:$0xff] %vm151_vm0, %v524_v27  ;;  %v519_v29 = vadd.f32 %v6233_v57, %v518_v28 }
  0xed   :  { %v1290_v51 = vld [vmem:[#allocation4 + $0x10] sm:$0xff] }
  0xee   :  { %v7152_v30 = vpop.eup %7151  ;;  %533 = vst.msk [vmem:[#allocation4 + $0x30] sm:$0xff] %vm151_vm0, %v519_v29 }
  0xef   :  { %v781_v31 = vadd.f32 1.0, %v7152_v30  ;;  %v1272_v30 = vld [vmem:[#allocation2 + $0x10] sm:$0xff] }
  0xf1   :  { %7155 = vrcp.f32 %v781_v31 }
  0xf2   :  { %v7154_v32 = vpop.eup %7153 }
  0xf3   :  { %v789_v34 = vadd.f32 1.0, %v7154_v32 }
  0xf5   :  { %7157 = vrcp.f32 %v789_v34 }
  0xfe   :  { %v7156_v36 = vpop.eup %7155 }
  0xff   :  { %v793_v37 = vmul.f32 %v7156_v36, %v773_v35 }
 0x101   :  { %v794_v39 = vadd.f32 %v793_v37, %v792_v38 }
 0x102   :  { %v7158_v40 = vpop.eup %7157 }
 0x103   :  { %7159 = vtanh.f32 %v794_v39  ;;  %v796_v41 = vsub.f32 1.0, %v7158_v40  ;;  %v798_v45 = vmul.f32 0.0, %v7158_v40  ;;  %v1281_v39 = vld [vmem:[#allocation3 + $0x10] sm:$0xff] }
 0x110   :  { %v7160_v42 = vpop.eup %7159 }
 0x111   :  { %v797_v44 = vmul.f32 %v7160_v42, %v796_v41 }
 0x113   :  { %v799_v46 = vadd.f32 %v798_v45, %v797_v44 }
 0x115   :  { %v7530_v47 = vsel %vm805_vm6, %v799_v46, 0.0 }
 0x116   :  { %807 = vst.msk [vmem:[#allocation5] sm:$0xff] %vm151_vm0, %v7530_v47  ;;  %6730 = vmatmul.mubr.msk.f32.vlgmr.msra.gmra.mxu1 %vm151_vm0, %v7530_v47  ;;  %6735 = vmatmul.mubr.msk.f32.vlgmr.msra.gmra.mxu0 %vm151_vm0, %v7530_v47 }
 0x117   :  { %6738 = vmatpush3.msra.mxu1 %v7453_v20  ;;  %6739 = vmatprep.mubr.msk.f32.mxu1 %vm7340_vm5, %v7339_v7 }
 0x118   :  { %6743 = vmatpush3.msra.mxu0 %v7397_v6  ;;  %6747 = vmatprep.subr.mxu1 %v7339_v7 }
 0x119   :  { %6744 = vmatprep.mubr.msk.f32.mxu0 %vm7340_vm5, %v7339_v7  ;;  %6752 = vmatprep.subr.mxu0 %v7339_v7 }
 0x11a   :  { %6740 = vmatmul.mubr.msk.f32.vlgmr.msra.gmra.mxu1 %vm151_vm0, %v7530_v47 }
 0x11b   :  { %6748 = vmatpush3.msra.mxu1 %v7440_v18  ;;  %6749 = vmatprep.mubr.msk.f32.mxu1 %vm7340_vm5, %v7339_v7 }
 0x11c   :  { %6757 = vmatprep.subr.mxu1 %v7339_v7 }
 0x1d6   :  { %v877_v53 = vpop.f32.mrf.mxu1  ;;  %v947_v54 = vpop.f32.mrf.mxu0 }
 0x1d7   :  { %v878_v55 = vadd.f32 %v7499_v49, %v877_v53  ;;  %v948_v63 = vadd.f32 %v7508_v60, %v947_v54 }
 0x1d8   :  { %v6731_v57 = vpop.f32.mrf.mxu1  ;;  %v6736_v58 = vpop.f32.mrf.mxu0 }
 0x1d9   :  { %v1023_v59 = vadd.f32 %v1022_v56, %v878_v55  ;;  %v1032_v3 = vadd.f32 %v1031_v2, %v948_v63  ;;  %v7599_v56 = vpop.permute.xlu1 %1301 }
 0x1da   :  { %v1017_v61 = vpop.f32.mrf.mxu1  ;;  %vm1303_vm12 = vcmp.eq.s32.totalorder %v7599_v56, 1 }
 0x1db   :  { %v6254_v62 = vmul.f32 -1.442695, %v1023_v59  ;;  %v6255_v4 = vmul.f32 -1.442695, %v1032_v3  ;;  %v1018_v11 = vadd.f32 %v7522_v33, %v1017_v61  ;;  %v1522_v3 = vld [vmem:[#allocation2 + $0x18] sm:$0xff] }
 0x1dc   :  { %v6741_v1 = vpop.f32.mrf.mxu1 }
 0x1dd   :  { %7161 = vpow2.f32 %v6254_v62 }
 0x1de   :  { %7163 = vpow2.f32 %v6255_v4 }
 0x1ea   :  { %v7162_v0 = vpop.eup %7161 }
 0x1eb   :  { %v1027_v5 = vadd.f32 1.0, %v7162_v0  ;;  %v7164_v8 = vpop.eup %7163 }
 0x1ec   :  { %v1036_v9 = vadd.f32 1.0, %v7164_v8 }
 0x1ed   :  { %7165 = vrcp.f32 %v1027_v5 }
 0x1ee   :  { %7167 = vrcp.f32 %v1036_v9 }
 0x1fa   :  { %v7166_v12 = vpop.eup %7165 }
 0x1fb   :  { %v1041_v13 = vmul.f32 %v7166_v12, %v1018_v11  ;;  %v7168_v16 = vpop.eup %7167 }
 0x1fc   :  { %v1044_v17 = vsub.f32 1.0, %v7168_v16  ;;  %v1046_v22 = vmul.f32 %v7168_v16, %v7530_v47 }
 0x1fd   :  { %v1042_v15 = vadd.f32 %v1041_v13, %v1040_v14  ;;  %v1531_v13 = vld [vmem:[#allocation3 + $0x18] sm:$0xff] }
 0x1ff   :  { %7169 = vtanh.f32 %v1042_v15 }
 0x20c   :  { %v7170_v19 = vpop.eup %7169 }
 0x20d   :  { %v1045_v21 = vmul.f32 %v7170_v19, %v1044_v17 }
 0x20f   :  { %v1047_v24 = vadd.f32 %v1046_v22, %v1045_v21 }
 0x211   :  { %v1054_v25 = vsel %vm1053_vm11, %v1047_v24, 0.0  ;;  %v1057_v26 = vsel %vm1053_vm11, %v1047_v24, %v7530_v47 }
 0x212   :  { %1056 = vst.msk [vmem:[#allocation5 + $0x8] sm:$0xff] %vm151_vm0, %v1054_v25  ;;  %6745 = vmatmul.mubr.msk.f32.vlgmr.msra.gmra.mxu0 %vm151_vm0, %v1057_v26  ;;  %6750 = vmatmul.mubr.msk.f32.vlgmr.msra.gmra.mxu1 %vm151_vm0, %v1057_v26 }
 0x213   :  { %6753 = vmatpush3.msra.mxu0 %v7453_v20  ;;  %6754 = vmatprep.mubr.msk.f32.mxu0 %vm7340_vm5, %v7339_v7 }
 0x214   :  { %6758 = vmatpush3.msra.mxu1 %v7397_v6  ;;  %6762 = vmatprep.subr.mxu0 %v7339_v7 }
 0x215   :  { %6759 = vmatprep.mubr.msk.f32.mxu1 %vm7340_vm5, %v7339_v7  ;;  %6767 = vmatprep.subr.mxu1 %v7339_v7 }
 0x216   :  { %6755 = vmatmul.mubr.msk.f32.vlgmr.msra.gmra.mxu0 %vm151_vm0, %v1057_v26 }
 0x217   :  { %6763 = vmatpush3.msra.mxu0 %v7440_v18  ;;  %6764 = vmatprep.mubr.msk.f32.mxu0 %vm7340_vm5, %v7339_v7 }
 0x218   :  { %6772 = vmatprep.subr.mxu0 %v7339_v7 }
 0x2d2   :  { %v1127_v27 = vpop.f32.mrf.mxu0  ;;  %v1197_v28 = vpop.f32.mrf.mxu1 }
 0x2d3   :  { %v1128_v29 = vadd.f32 %v7499_v49, %v1127_v27  ;;  %v1198_v37 = vadd.f32 %v7508_v60, %v1197_v28 }
 0x2d4   :  { %v6746_v31 = vpop.f32.mrf.mxu0  ;;  %v6751_v32 = vpop.f32.mrf.mxu1 }
 0x2d5   :  { %v1273_v34 = vadd.f32 %v1272_v30, %v1128_v29  ;;  %v1282_v40 = vadd.f32 %v1281_v39, %v1198_v37 }
 0x2d6   :  { %v1267_v35 = vpop.f32.mrf.mxu0 }
 0x2d7   :  { %v6259_v36 = vmul.f32 -1.442695, %v1273_v34  ;;  %v6260_v41 = vmul.f32 -1.442695, %v1282_v40  ;;  %v1268_v47 = vadd.f32 %v7522_v33, %v1267_v35  ;;  %v7625_v34 = vpop.permute.xlu1 %1551 }
 0x2d8   :  { %v6756_v38 = vpop.f32.mrf.mxu0  ;;  %vm1553_vm13 = vcmp.eq.s32.totalorder %v7625_v34, 1 }
 0x2d9   :  { %7171 = vpow2.f32 %v6259_v36 }
 0x2da   :  { %7173 = vpow2.f32 %v6260_v41  ;;  %v1772_v41 = vld [vmem:[#allocation2 + $0x20] sm:$0xff] }
 0x2e6   :  { %v7172_v42 = vpop.eup %7171 }
 0x2e7   :  { %v1277_v44 = vadd.f32 1.0, %v7172_v42  ;;  %v7174_v45 = vpop.eup %7173 }
 0x2e8   :  { %v1286_v46 = vadd.f32 1.0, %v7174_v45 }
 0x2e9   :  { %7175 = vrcp.f32 %v1277_v44 }
 0x2ea   :  { %7177 = vrcp.f32 %v1286_v46 }
 0x2f6   :  { %v7176_v48 = vpop.eup %7175 }
 0x2f7   :  { %v1291_v50 = vmul.f32 %v7176_v48, %v1268_v47  ;;  %v7178_v53 = vpop.eup %7177 }
 0x2f8   :  { %v1294_v54 = vsub.f32 1.0, %v7178_v53  ;;  %v1296_v58 = vmul.f32 %v7178_v53, %v1057_v26 }
 0x2f9   :  { %v1292_v52 = vadd.f32 %v1291_v50, %v1290_v51  ;;  %v1781_v51 = vld [vmem:[#allocation3 + $0x20] sm:$0xff] }
 0x2fb   :  { %7179 = vtanh.f32 %v1292_v52 }
 0x308   :  { %v7180_v55 = vpop.eup %7179 }
 0x309   :  { %v1295_v57 = vmul.f32 %v7180_v55, %v1294_v54 }
 0x30b   :  { %v1297_v59 = vadd.f32 %v1296_v58, %v1295_v57 }
 0x30d   :  { %v1304_v61 = vsel %vm1303_vm12, %v1297_v59, 0.0  ;;  %v1307_v62 = vsel %vm1303_vm12, %v1297_v59, %v1057_v26  ;;  %v1540_v26 = vld [vmem:[#allocation4 + $0x18] sm:$0xff] }
 0x30e   :  { %1306 = vst.msk [vmem:[#allocation5 + $0x10] sm:$0xff] %vm151_vm0, %v1304_v61  ;;  %6760 = vmatmul.mubr.msk.f32.vlgmr.msra.gmra.mxu1 %vm151_vm0, %v1307_v62  ;;  %6765 = vmatmul.mubr.msk.f32.vlgmr.msra.gmra.mxu0 %vm151_vm0, %v1307_v62 }
 0x30f   :  { %6768 = vmatpush3.msra.mxu1 %v7453_v20  ;;  %6769 = vmatprep.mubr.msk.f32.mxu1 %vm7340_vm5, %v7339_v7 }
 0x310   :  { %6773 = vmatpush3.msra.mxu0 %v7397_v6  ;;  %6777 = vmatprep.subr.mxu1 %v7339_v7 }
 0x311   :  { %6774 = vmatprep.mubr.msk.f32.mxu0 %vm7340_vm5, %v7339_v7  ;;  %6782 = vmatprep.subr.mxu0 %v7339_v7 }
 0x312   :  { %6770 = vmatmul.mubr.msk.f32.vlgmr.msra.gmra.mxu1 %vm151_vm0, %v1307_v62 }
 0x313   :  { %6778 = vmatpush3.msra.mxu1 %v7440_v18  ;;  %6779 = vmatprep.mubr.msk.f32.mxu1 %vm7340_vm5, %v7339_v7 }
 0x314   :  { %6787 = vmatprep.subr.mxu1 %v7339_v7 }
 0x3ce   :  { %v1377_v63 = vpop.f32.mrf.mxu1  ;;  %v1447_v1 = vpop.f32.mrf.mxu0 }
 0x3cf   :  { %v1378_v2 = vadd.f32 %v7499_v49, %v1377_v63  ;;  %v1448_v11 = vadd.f32 %v7508_v60, %v1447_v1  ;;  %v1790_v63 = vld [vmem:[#allocation4 + $0x20] sm:$0xff] }
 0x3d0   :  { %v6761_v4 = vpop.f32.mrf.mxu1  ;;  %v6766_v0 = vpop.f32.mrf.mxu0 }
 0x3d1   :  { %v1523_v5 = vadd.f32 %v1522_v3, %v1378_v2  ;;  %v1532_v14 = vadd.f32 %v1531_v13, %v1448_v11 }
 0x3d2   :  { %v1517_v8 = vpop.f32.mrf.mxu1 }
 0x3d3   :  { %v6264_v9 = vmul.f32 -1.442695, %v1523_v5  ;;  %v6265_v15 = vmul.f32 -1.442695, %v1532_v14  ;;  %v1518_v22 = vadd.f32 %v7522_v33, %v1517_v8  ;;  %v7651_v8 = vpop.permute.xlu0 %1801 }
 0x3d4   :  { %v6771_v12 = vpop.f32.mrf.mxu1  ;;  %vm1803_vm14 = vcmp.eq.s32.totalorder %v7651_v8, 1 }
 0x3d5   :  { %7181 = vpow2.f32 %v6264_v9 }
 0x3d6   :  { %7183 = vpow2.f32 %v6265_v15 }
 0x3e2   :  { %v7182_v16 = vpop.eup %7181 }
 0x3e3   :  { %v1527_v17 = vadd.f32 1.0, %v7182_v16  ;;  %v7184_v19 = vpop.eup %7183  ;;  %v2022_v16 = vld [vmem:[#allocation2 + $0x28] sm:$0xff] }
 0x3e4   :  { %v1536_v21 = vadd.f32 1.0, %v7184_v19 }
 0x3e5   :  { %7185 = vrcp.f32 %v1527_v17 }
 0x3e6   :  { %7187 = vrcp.f32 %v1536_v21 }
 0x3f2   :  { %v7186_v24 = vpop.eup %7185 }
 0x3f3   :  { %v1541_v25 = vmul.f32 %v7186_v24, %v1518_v22  ;;  %v7188_v28 = vpop.eup %7187 }
 0x3f4   :  { %v1544_v29 = vsub.f32 1.0, %v7188_v28  ;;  %v1546_v32 = vmul.f32 %v7188_v28, %v1307_v62 }
 0x3f5   :  { %v1542_v27 = vadd.f32 %v1541_v25, %v1540_v26 }
 0x3f7   :  { %7189 = vtanh.f32 %v1542_v27  ;;  %v2031_v27 = vld [vmem:[#allocation3 + $0x28] sm:$0xff] }
 0x404   :  { %v7190_v30 = vpop.eup %7189 }
 0x405   :  { %v1545_v31 = vmul.f32 %v7190_v30, %v1544_v29 }
 0x407   :  { %v1547_v35 = vadd.f32 %v1546_v32, %v1545_v31 }
 0x409   :  { %v1554_v36 = vsel %vm1553_vm13, %v1547_v35, 0.0  ;;  %v1557_v37 = vsel %vm1553_vm13, %v1547_v35, %v1307_v62 }
 0x40a   :  { %1556 = vst.msk [vmem:[#allocation5 + $0x18] sm:$0xff] %vm151_vm0, %v1554_v36  ;;  %6775 = vmatmul.mubr.msk.f32.vlgmr.msra.gmra.mxu0 %vm151_vm0, %v1557_v37  ;;  %6780 = vmatmul.mubr.msk.f32.vlgmr.msra.gmra.mxu1 %vm151_vm0, %v1557_v37 }
 0x40b   :  { %6783 = vmatpush3.msra.mxu0 %v7453_v20  ;;  %6784 = vmatprep.mubr.msk.f32.mxu0 %vm7340_vm5, %v7339_v7 }
 0x40c   :  { %6788 = vmatpush3.msra.mxu1 %v7397_v6  ;;  %6792 = vmatprep.subr.mxu0 %v7339_v7 }
 0x40d   :  { %6789 = vmatprep.mubr.msk.f32.mxu1 %vm7340_vm5, %v7339_v7  ;;  %6797 = vmatprep.subr.mxu1 %v7339_v7 }
 0x40e   :  { %6785 = vmatmul.mubr.msk.f32.vlgmr.msra.gmra.mxu0 %vm151_vm0, %v1557_v37 }
 0x40f   :  { %6793 = vmatpush3.msra.mxu0 %v7440_v18  ;;  %6794 = vmatprep.mubr.msk.f32.mxu0 %vm7340_vm5, %v7339_v7 }
 0x410   :  { %6802 = vmatprep.subr.mxu0 %v7339_v7 }
 0x4ca   :  { %v1627_v38 = vpop.f32.mrf.mxu0  ;;  %v1697_v39 = vpop.f32.mrf.mxu1 }
 0x4cb   :  { %v1628_v40 = vadd.f32 %v7499_v49, %v1627_v38  ;;  %v1698_v48 = vadd.f32 %v7508_v60, %v1697_v39  ;;  %v2040_v39 = vld [vmem:[#allocation4 + $0x28] sm:$0xff] }
 0x4cc   :  { %v6776_v42 = vpop.f32.mrf.mxu0  ;;  %v6781_v44 = vpop.f32.mrf.mxu1 }
 0x4cd   :  { %v1773_v45 = vadd.f32 %v1772_v41, %v1628_v40  ;;  %v1782_v52 = vadd.f32 %v1781_v51, %v1698_v48 }
 0x4ce   :  { %v1767_v46 = vpop.f32.mrf.mxu0 }
 0x4cf   :  { %v6269_v47 = vmul.f32 -1.442695, %v1773_v45  ;;  %v6270_v53 = vmul.f32 -1.442695, %v1782_v52  ;;  %v1768_v59 = vadd.f32 %v7522_v33, %v1767_v46 }
 0x4d0   :  { %v6786_v50 = vpop.f32.mrf.mxu0 }
 0x4d1   :  { %7191 = vpow2.f32 %v6269_v47  ;;  %v7677_v47 = vpop.permute.xlu1 %2051 }
 0x4d2   :  { %7193 = vpow2.f32 %v6270_v53  ;;  %vm8293_vm15 = vcmp.eq.s32.totalorder %v7677_v47, 1 }
 0x4de   :  { %v7192_v54 = vpop.eup %7191 }
 0x4df   :  { %v1777_v55 = vadd.f32 1.0, %v7192_v54  ;;  %v7194_v57 = vpop.eup %7193 }
 0x4e0   :  { %v1786_v58 = vadd.f32 1.0, %v7194_v57 }
 0x4e1   :  { %7195 = vrcp.f32 %v1777_v55  ;;  %v2272_v55 = vld [vmem:[#allocation2 + $0x30] sm:$0xff] }
 0x4e2   :  { %7197 = vrcp.f32 %v1786_v58 }
 0x4ee   :  { %v7196_v61 = vpop.eup %7195 }
 0x4ef   :  { %v1791_v62 = vmul.f32 %v7196_v61, %v1768_v59  ;;  %v7198_v2 = vpop.eup %7197 }
 0x4f0   :  { %v1794_v3 = vsub.f32 1.0, %v7198_v2  ;;  %v1796_v5 = vmul.f32 %v7198_v2, %v1557_v37 }
 0x4f1   :  { %v1792_v1 = vadd.f32 %v1791_v62, %v1790_v63 }
 0x4f3   :  { %7199 = vtanh.f32 %v1792_v1  ;;  %v2281_v1 = vld [vmem:[#allocation3 + $0x30] sm:$0xff] }
 0x500   :  { %v7200_v4 = vpop.eup %7199 }
 0x501   :  { %v1795_v0 = vmul.f32 %v7200_v4, %v1794_v3 }
 0x503   :  { %v1797_v9 = vadd.f32 %v1796_v5, %v1795_v0 }
 0x505   :  { %v1804_v11 = vsel %vm1803_vm14, %v1797_v9, 0.0  ;;  %v1807_v12 = vsel %vm1803_vm14, %v1797_v9, %v1557_v37 }
 0x506   :  { %1806 = vst.msk [vmem:[#allocation5 + $0x20] sm:$0xff] %vm151_vm0, %v1804_v11  ;;  %6790 = vmatmul.mubr.msk.f32.vlgmr.msra.gmra.mxu1 %vm151_vm0, %v1807_v12  ;;  %6795 = vmatmul.mubr.msk.f32.vlgmr.msra.gmra.mxu0 %vm151_vm0, %v1807_v12 }
 0x507   :  { %6798 = vmatpush3.msra.mxu1 %v7453_v20  ;;  %6799 = vmatprep.mubr.msk.f32.mxu1 %vm7340_vm5, %v7339_v7 }
 0x508   :  { %6803 = vmatpush3.msra.mxu0 %v7397_v6  ;;  %6807 = vmatprep.subr.mxu1 %v7339_v7 }
 0x509   :  { %6804 = vmatprep.mubr.msk.f32.mxu0 %vm7340_vm5, %v7339_v7  ;;  %6812 = vmatprep.subr.mxu0 %v7339_v7 }
 0x50a   :  { %6800 = vmatmul.mubr.msk.f32.vlgmr.msra.gmra.mxu1 %vm151_vm0, %v1807_v12 }
 0x50b   :  { %6808 = vmatpush3.msra.mxu1 %v7440_v18  ;;  %6809 = vmatprep.mubr.msk.f32.mxu1 %vm7340_vm5, %v7339_v7 }
 0x50c   :  { %6817 = vmatprep.subr.mxu1 %v7339_v7 }
 0x5c6   :  { %v1877_v13 = vpop.f32.mrf.mxu1  ;;  %v1947_v14 = vpop.f32.mrf.mxu0 }
 0x5c7   :  { %v1878_v15 = vadd.f32 %v7499_v49, %v1877_v13  ;;  %v1948_v25 = vadd.f32 %v7508_v60, %v1947_v14  ;;  %v2290_v14 = vld [vmem:[#allocation4 + $0x30] sm:$0xff] }
 0x5c8   :  { %v6791_v17 = vpop.f32.mrf.mxu1  ;;  %v6796_v19 = vpop.f32.mrf.mxu0 }
 0x5c9   :  { %v2023_v21 = vadd.f32 %v2022_v16, %v1878_v15  ;;  %v2032_v28 = vadd.f32 %v2031_v27, %v1948_v25  ;;  %v7713_v25 = vld [vmem:[#allocation5] sm:$0xff] }
 0x5ca   :  { %v2017_v22 = vpop.f32.mrf.mxu1 }
 0x5cb   :  { %v6274_v24 = vmul.f32 -1.442695, %v2023_v21  ;;  %v6275_v29 = vmul.f32 -1.442695, %v2032_v28  ;;  %v2018_v36 = vadd.f32 %v7522_v33, %v2017_v22  ;;  %v7711_v21 = vpop.permute.xlu0 %2301 }
 0x5cc   :  { %v6801_v26 = vpop.f32.mrf.mxu1 }
 0x5cd   :  { %7201 = vpow2.f32 %v6274_v24  ;;  %v7715_v26 = vld [vmem:[%s6180_s3] sm:$0xff]  ;;  %s6200_s3 = sld [smem:[%s8292_s0 + %s7359_s30]]  }
 0x5ce   :  { %7203 = vpow2.f32 %v6275_v29 }
 0x5da   :  { %v7202_v30 = vpop.eup %7201 }
 0x5db   :  { %v2027_v31 = vadd.f32 1.0, %v7202_v30  ;;  %v7204_v32 = vpop.eup %7203  ;;  %v2567_v30 = vmul.f32 %v7715_v26, %v7713_v25 }
 0x5dc   :  { %v2036_v35 = vadd.f32 1.0, %v7204_v32  ;;  %v7733_v32 = vld [vmem:[#allocation5 + $0x10] sm:$0xff] }
 0x5dd   :  { %7205 = vrcp.f32 %v2027_v31  ;;  %v7726_v31 = vld [vmem:[#allocation5 + $0x8] sm:$0xff] }
 0x5de   :  { %7207 = vrcp.f32 %v2036_v35  ;;  %v2566_v35 = vld [vmem:[%s6188_s7] sm:$0xff]  ;;  %s6202_s7 = sld [smem:[%s8292_s0 + %s7360_s4]]  }
 0x5ea   :  { %v7206_v37 = vpop.eup %7205 }
 0x5eb   :  { %v2041_v38 = vmul.f32 %v7206_v37, %v2018_v36  ;;  %v7208_v41 = vpop.eup %7207  ;;  %v2568_v36 = vmul.f32 %v7715_v26, %v7726_v31  ;;  %v2569_v37 = vmul.f32 %v7715_v26, %v7733_v32 }
 0x5ec   :  { %v2044_v42 = vsub.f32 1.0, %v7208_v41  ;;  %v2046_v46 = vmul.f32 %v7208_v41, %v1807_v12 }
 0x5ed   :  { %v2042_v40 = vadd.f32 %v2041_v38, %v2040_v39  ;;  %v7743_v38 = vld [vmem:[#allocation5 + $0x18] sm:$0xff]  ;;  %v7748_v39 = vld [vmem:[#allocation5 + $0x20] sm:$0xff] }
 0x5ef   :  { %7209 = vtanh.f32 %v2042_v40  ;;  %v2571_v40 = vmul.f32 %v7715_v26, %v7748_v39 }
 0x5fc   :  { %v7210_v44 = vpop.eup %7209 }
 0x5fd   :  { %v2045_v45 = vmul.f32 %v7210_v44, %v2044_v42 }
 0x5ff   :  { %v2047_v48 = vadd.f32 %v2046_v46, %v2045_v45  ;;  %v2834_v46 = vld [vmem:[%s6187_s11] sm:$0xff]  ;;  %s8186_s11 = sld [smem:[%s8292_s0 + %s7361_s8]]  }
 0x601   :  { %v2054_v50 = vsel %vm8293_vm15, %v2047_v48, 0.0  ;;  %v2057_v51 = vsel %vm8293_vm15, %v2047_v48, %v1807_v12  ;;  %vm8294_vm15 = vcmp.eq.s32.totalorder %v7711_v21, 1 }
 0x602   :  { %2056 = vst.msk [vmem:[#allocation5 + $0x28] sm:$0xff] %vm151_vm0, %v2054_v50  ;;  %6805 = vmatmul.mubr.msk.f32.vlgmr.msra.gmra.mxu0 %vm151_vm0, %v2057_v51  ;;  %6810 = vmatmul.mubr.msk.f32.vlgmr.msra.gmra.mxu1 %vm151_vm0, %v2057_v51 }
 0x603   :  { %6813 = vmatpush3.msra.mxu0 %v7453_v20  ;;  %6814 = vmatprep.mubr.msk.f32.mxu0 %vm7340_vm5, %v7339_v7 }
 0x604   :  { %6818 = vmatpush3.msra.mxu1 %v7397_v6  ;;  %6822 = vmatprep.subr.mxu0 %v7339_v7  ;;  %v2575_v6 = vld [vmem:[%s6189_s29] sm:$0xff]  ;;  %s6181_s29 = sld [smem:[%s8292_s0 + %s7358_s26]]  }
 0x605   :  { %6819 = vmatprep.mubr.msk.f32.mxu1 %vm7340_vm5, %v7339_v7  ;;  %6827 = vmatprep.subr.mxu1 %v7339_v7 }
 0x606   :  { %6815 = vmatmul.mubr.msk.f32.vlgmr.msra.gmra.mxu0 %vm151_vm0, %v2057_v51 }
 0x607   :  { %6823 = vmatpush3.msra.mxu0 %v7440_v18  ;;  %6824 = vmatprep.mubr.msk.f32.mxu0 %vm7340_vm5, %v7339_v7 }
 0x608   :  { %6832 = vmatprep.subr.mxu0 %v2575_v6 }
 0x609   :  { %v7757_v41 = vld [vmem:[#allocation5 + $0x28] sm:$0xff] }
 0x60a   :  { %v2572_v44 = vmul.f32 %v7715_v26, %v7757_v41 }
 0x6c2   :  { %v2127_v52 = vpop.f32.mrf.mxu0  ;;  %v2197_v53 = vpop.f32.mrf.mxu1 }
 0x6c3   :  { %v2128_v54 = vadd.f32 %v7499_v49, %v2127_v52  ;;  %v2198_v62 = vadd.f32 %v7508_v60, %v2197_v53 }
 0x6c4   :  { %v6806_v57 = vpop.f32.mrf.mxu0  ;;  %v6811_v58 = vpop.f32.mrf.mxu1 }
 0x6c5   :  { %v2273_v59 = vadd.f32 %v2272_v55, %v2128_v54  ;;  %v2282_v2 = vadd.f32 %v2281_v1, %v2198_v62 }
 0x6c6   :  { %v2267_v61 = vpop.f32.mrf.mxu0 }
 0x6c7   :  { %v6279_v18 = vmul.f32 -1.442695, %v2273_v59  ;;  %v6280_v3 = vmul.f32 -1.442695, %v2282_v2  ;;  %v2268_v11 = vadd.f32 %v7522_v33, %v2267_v61  ;;  %v2531_v61 = vld [vmem:[#allocation3 + $0x38] sm:$0xff] }
 0x6c8   :  { %v6816_v63 = vpop.f32.mrf.mxu0 }
 0x6c9   :  { %7211 = vpow2.f32 %v6279_v18 }
 0x6ca   :  { %7213 = vpow2.f32 %v6280_v3 }
 0x6d6   :  { %v7212_v4 = vpop.eup %7211 }
 0x6d7   :  { %v2277_v0 = vadd.f32 1.0, %v7212_v4  ;;  %v7214_v5 = vpop.eup %7213 }
 0x6d8   :  { %v2286_v9 = vadd.f32 1.0, %v7214_v5  ;;  %v2540_v5 = vld [vmem:[#allocation4 + $0x38] sm:$0xff] }
 0x6d9   :  { %7215 = vrcp.f32 %v2277_v0 }
 0x6da   :  { %7217 = vrcp.f32 %v2286_v9 }
 0x6e6   :  { %v7216_v12 = vpop.eup %7215 }
 0x6e7   :  { %v2291_v13 = vmul.f32 %v7216_v12, %v2268_v11  ;;  %v7218_v16 = vpop.eup %7217 }
 0x6e8   :  { %v2294_v17 = vsub.f32 1.0, %v7218_v16  ;;  %v2296_v24 = vmul.f32 %v7218_v16, %v2057_v51 }
 0x6e9   :  { %v2292_v15 = vadd.f32 %v2291_v13, %v2290_v14  ;;  %v7787_v13 = vpop.permute.xlu1 %2551 }
 0x6eb   :  { %7219 = vtanh.f32 %v2292_v15 }
 0x6f8   :  { %v7220_v19 = vpop.eup %7219 }
 0x6f9   :  { %v2295_v22 = vmul.f32 %v7220_v19, %v2294_v17 }
 0x6fb   :  { %v2297_v27 = vadd.f32 %v2296_v24, %v2295_v22  ;;  %v2981_v22 = vld [vmem:[%s6191_s15 + $0x38] sm:$0xff]  ;;  %v2980_v24 = vld [vmem:[%s6191_s15 + $0x30] sm:$0xff] }
 0x6fd   :  { %v2304_v28 = vsel %vm8294_vm15, %v2297_v27, 0.0  ;;  %v7722_v29 = vsel %vm8294_vm15, %v2297_v27, %v2057_v51  ;;  %vm8295_vm15 = vcmp.eq.s32.totalorder %v7787_v13, 1  ;;  %v2979_v27 = vld [vmem:[%s6191_s15 + $0x28] sm:$0xff] }
 0x6fe   :  { %2306 = vst.msk [vmem:[#allocation5 + $0x30] sm:$0xff] %vm151_vm0, %v2304_v28  ;;  %6820 = vmatmul.mubr.msk.f32.vlgmr.msra.gmra.mxu1 %vm151_vm0, %v7722_v29  ;;  %6825 = vmatmul.mubr.msk.f32.vlgmr.msra.gmra.mxu0 %vm151_vm0, %v7722_v29  ;;  %v2978_v28 = vld [vmem:[%s6191_s15 + $0x20] sm:$0xff] }
 0x6ff   :  { %6834 = vmatprep.mubr.msk.f32.mxu0 %vm151_vm0, %v2567_v30  ;;  %6828 = vmatpush3.msra.mxu1 %v7453_v20  ;;  %v2570_v20 = vmul.f32 %v7715_v26, %v7743_v38  ;;  %v2975_v30 = vld [vmem:[%s6191_s15 + $0x8] sm:$0xff] }
 0x700   :  { %6829 = vmatprep.mubr.msk.f32.mxu1 %vm7340_vm5, %v7339_v7  ;;  %6833 = vmatpush3.msra.mxu0 %v2575_v6  ;;  %v2522_v6 = vld [vmem:[#allocation2 + $0x38] sm:$0xff] }
 0x701   :  { %6846 = vmatprep.subr.mxu1 %v2566_v35  ;;  %6860 = vmatprep.subr.mxu0 %v2834_v46 }
 0x702   :  { %6830 = vmatmul.mubr.msk.f32.vlgmr.msra.gmra.mxu1 %vm151_vm0, %v7722_v29  ;;  %6835 = vmatmul.mubr.msk.f32.vlgmr.msra.gmra.mxu0 %vm151_vm0, %v2568_v36  ;;  %v3330_v36 = vld [vmem:[%s7823_s19] sm:$0xff] }
 0x703   :  { %6837 = vmatprep.mubr.msk.f32.mxu0 %vm151_vm0, %v2569_v37  ;;  %6848 = vmatprep.mubr.msk.f32.mxu1 %vm151_vm0, %v7713_v25  ;;  %v3128_v37 = vld [vmem:[%s7829_s23 + $0x8] sm:$0xff] }
 0x704   :  { %6847 = vmatpush3.msra.mxu1 %v2566_v35  ;;  %6861 = vmatpush3.msra.mxu0 %v2834_v46  ;;  %v2974_v35 = vld [vmem:[%s6191_s15] sm:$0xff] }
 0x705   :  { %v7762_v42 = vld [vmem:[#allocation5 + $0x30] sm:$0xff]  ;;  %6874 = vmatprep.subr.mxu1 %v2981_v22  ;;  %6902 = vmatprep.subr.mxu0 %v3128_v37 }
 0x706   :  { %6838 = vmatmul.mubr.msk.f32.gmra.mxu0 %vm151_vm0, %v2570_v20  ;;  %6849 = vmatmul.mubr.msk.f32.vlgmr.msra.gmra.mxu1 %vm151_vm0, %v7726_v31  ;;  %v2573_v45 = vmul.f32 %v7715_v26, %v7762_v42 }
 0x707   :  { %6840 = vmatprep.mubr.msk.f32.mxu0 %vm151_vm0, %v2571_v40  ;;  %6851 = vmatprep.mubr.msk.f32.mxu1 %vm151_vm0, %v7733_v32 }
 0x708   :  { %6875 = vmatpush3.msra.mxu1 %v2981_v22 }
 0x709   :  { %6876 = vmatprep.subr.mxu1 %v2980_v24 }
 0x70a   :  { %6841 = vmatmul.mubr.msk.f32.gmra.mxu0 %vm151_vm0, %v2572_v44  ;;  %6852 = vmatmul.mubr.msk.f32.gmra.mxu1 %vm151_vm0, %v7743_v38 }
 0x70b   :  { %6843 = vmatprep.mubr.msk.f32.mxu0 %vm151_vm0, %v2573_v45  ;;  %6854 = vmatprep.mubr.msk.f32.mxu1 %vm151_vm0, %v7748_v39 }
 0x70c   :  { %6877 = vmatpush3.msra.mxu1 %v2980_v24 }
 0x70d   :  { %6878 = vmatprep.subr.mxu1 %v2979_v27 }
 0x70e   :  { %6855 = vmatmul.mubr.msk.f32.gmra.mxu1 %vm151_vm0, %v7757_v41 }
 0x70f   :  { %6857 = vmatprep.mubr.msk.f32.mxu1 %vm151_vm0, %v7762_v42  ;;  %6879 = vmatpush3.msra.mxu1 %v2979_v27  ;;  %v6349_v27 = vld [vmem:[%s7823_s19 + $0x10] sm:$0xff] }
 0x710   :  { %6880 = vmatprep.subr.mxu1 %v2978_v28 }
 0x711   :  { %6881 = vmatpush3.msra.mxu1 %v2978_v28 }
 0x7be   :  { %v2377_v48 = vpop.f32.mrf.mxu1  ;;  %v2447_v50 = vpop.f32.mrf.mxu0 }
 0x7bf   :  { %v2378_v51 = vadd.f32 %v7499_v49, %v2377_v48  ;;  %v2448_v58 = vadd.f32 %v7508_v60, %v2447_v50 }
 0x7c0   :  { %v6821_v52 = vpop.f32.mrf.mxu1  ;;  %v6826_v53 = vpop.f32.mrf.mxu0 }
 0x7c1   :  { %v2523_v54 = vadd.f32 %v2522_v6, %v2378_v51  ;;  %v2532_v18 = vadd.f32 %v2531_v61, %v2448_v58  ;;  %v6310_v61 = vld [vmem:[%s6190_s27] ss:$0 sm:$0xff]  ;;  %s6205_s27 = sld [smem:[%s8292_s0 + %s7365_s24]]  }
 0x7c2   :  { %v2517_v55 = vpop.f32.mrf.mxu1  ;;  %v6836_v20 = vpop.f32.mrf.mxu0 }
 0x7c3   :  { %v6284_v57 = vmul.f32 -1.442695, %v2523_v54  ;;  %v6285_v62 = vmul.f32 -1.442695, %v2532_v18  ;;  %v2518_v49 = vadd.f32 %v7522_v33, %v2517_v55 }
 0x7c4   :  { %v6831_v59 = vpop.f32.mrf.mxu1  ;;  %v2666_v40 = vpop.f32.mrf.mxu0 }
 0x7c5   :  { %7221 = vpow2.f32 %v6284_v57 }
 0x7c6   :  { %7223 = vpow2.f32 %v6285_v62  ;;  %v6839_v44 = vpop.f32.mrf.mxu0  ;;  %v6850_v45 = vpop.f32.mrf.mxu1 }
 0x7c7   :  { %v2801_v55 = vadd.f32 %v6850_v45, %v6836_v20 }
 0x7c8   :  { %v2676_v46 = vpop.f32.mrf.mxu0  ;;  %v2795_v48 = vpop.f32.mrf.mxu1 }
 0x7c9   :  { %v2796_v58 = vadd.f32 %v2795_v48, %v2666_v40 }
 0x7ca   :  { %v6842_v50 = vpop.f32.mrf.mxu0  ;;  %v6853_v51 = vpop.f32.mrf.mxu1 }
 0x7cc   :  { %v2686_v6 = vpop.f32.mrf.mxu0  ;;  %v2805_v53 = vpop.f32.mrf.mxu1 }
 0x7ce   :  { %v6856_v18 = vpop.f32.mrf.mxu1 }
 0x7d2   :  { %v7222_v63 = vpop.eup %7221 }
 0x7d3   :  { %v2527_v1 = vadd.f32 1.0, %v7222_v63  ;;  %v7224_v2 = vpop.eup %7223  ;;  %v2811_v63 = vadd.f32 %v6853_v51, %v6839_v44 }
 0x7d4   :  { %v2536_v3 = vadd.f32 1.0, %v7224_v2 }
 0x7d5   :  { %7225 = vrcp.f32 %v2527_v1 }
 0x7d6   :  { %7227 = vrcp.f32 %v2536_v3 }
 0x7e2   :  { %v7226_v4 = vpop.eup %7225 }
 0x7e3   :  { %v2541_v0 = vmul.f32 %v7226_v4, %v2518_v49  ;;  %v7228_v60 = vpop.eup %7227  ;;  %v2806_v49 = vadd.f32 %v2805_v53, %v2676_v46 }
 0x7e4   :  { %v2544_v11 = vsub.f32 1.0, %v7228_v60  ;;  %v2546_v14 = vmul.f32 %v7228_v60, %v7722_v29  ;;  %v2977_v29 = vld [vmem:[%s6191_s15 + $0x18] sm:$0xff]  ;;  %v2821_v60 = vadd.f32 %v6856_v18, %v6842_v50  ;;  %v6311_v18 = vld [vmem:[%s6192_s9] ss:$0 sm:$0xff]  ;;  %s6210_s9 = sld [smem:[%s8292_s0 + %s7368_s6]]  }
 0x7e5   :  { %v2542_v9 = vadd.f32 %v2541_v0, %v2540_v5  ;;  %6882 = vmatprep.subr.mxu1 %v2977_v29  ;;  %v2815_v5 = vpop.f32.mrf.mxu1 }
 0x7e6   :  { %6883 = vmatpush3.msra.mxu1 %v2977_v29 }
 0x7e7   :  { %7229 = vtanh.f32 %v2542_v9 }
 0x7f4   :  { %v7230_v12 = vpop.eup %7229 }
 0x7f5   :  { %v2545_v15 = vmul.f32 %v7230_v12, %v2544_v11 }
 0x7f7   :  { %v2547_v16 = vadd.f32 %v2546_v14, %v2545_v15 }
 0x7f9   :  { %v2554_v33 = vsel %vm8295_vm15, %v2547_v16, 0.0  ;;  %vm2989_vm15 = vcmask 523264  }
 0x7fa   :  { %2556 = vst.msk [vmem:[#allocation5 + $0x38] sm:$0xff] %vm151_vm0, %v2554_v33 }
 0x801   :  { %v7794_v17 = vld [vmem:[#allocation5 + $0x38] sm:$0xff] }
 0x802   :  { %6858 = vmatmul.mubr.msk.f32.gmra.mxu1 %vm151_vm0, %v7794_v17  ;;  %v2574_v19 = vmul.f32 %v7715_v26, %v7794_v17 }
 0x804   :  { %6844 = vmatmul.mubr.msk.f32.gmra.mxu0 %vm151_vm0, %v2574_v19  ;;  %v2816_v19 = vadd.f32 %v2815_v5, %v2686_v6 }
 0x805   :  { %6862 = vmatprep.mubr.msk.f32.mxu0 %vm151_vm0, %v7715_v26 }
 0x808   :  { %6863 = vmatmul.mubr.msk.f32.vlgmr.msra.gmra.mxu0 %vm151_vm0, %v7715_v26 }
 0x809   :  { %6865 = vmatprep.mubr.msk.f32.mxu0 %vm151_vm0, %v7715_v26  ;;  %6903 = vmatpush3.msra.mxu0 %v3128_v37 }
 0x80c   :  { %6866 = vmatmul.mubr.msk.f32.gmra.mxu0 %vm151_vm0, %v7715_v26 }
 0x80d   :  { %6868 = vmatprep.mubr.msk.f32.mxu0 %vm151_vm0, %v7715_v26 }
 0x810   :  { %6869 = vmatmul.mubr.msk.f32.gmra.mxu0 %vm151_vm0, %v7715_v26 }
 0x811   :  { %6871 = vmatprep.mubr.msk.f32.mxu0 %vm151_vm0, %v7715_v26 }
 0x814   :  { %6872 = vmatmul.mubr.msk.f32.gmra.mxu0 %vm151_vm0, %v7715_v26  ;;  %v2976_v26 = vld [vmem:[%s6191_s15 + $0x10] sm:$0xff]  ;;  %s6199_s15 = sld [smem:[%s8292_s0 + %s7362_s12]]  }
 0x815   :  { %6884 = vmatprep.subr.mxu1 %v2976_v26 }
 0x816   :  { %6885 = vmatpush3.msra.mxu1 %v2976_v26 }
 0x817   :  { %6886 = vmatprep.subr.mxu1 %v2975_v30 }
 0x818   :  { %6887 = vmatpush3.msra.mxu1 %v2975_v30 }
 0x819   :  { %6888 = vmatprep.subr.mxu1 %v2974_v35 }
 0x81a   :  { %6889 = vmatpush3.msra.mxu1 %v2974_v35 }
 0x81b   :  { %6918 = vmatprep.subr.mxu1 %v3330_v36 }
 0x8c2   :  { %v6859_v14 = vpop.f32.mrf.mxu1 }
 0x8c4   :  { %v6845_v52 = vpop.f32.mrf.mxu0  ;;  %v2825_v35 = vpop.f32.mrf.mxu1 }
 0x8c5   :  { %v2831_v29 = vadd.f32 %v6859_v14, %v6845_v52 }
 0x8c6   :  { %v2696_v54 = vpop.f32.mrf.mxu0 }
 0x8c7   :  { %v2826_v44 = vadd.f32 %v2825_v35, %v2696_v54  ;;  %v3127_v54 = vld [vmem:[%s7829_s23] sm:$0xff]  ;;  %s8243_s23 = sld [smem:[%s8292_s0 + %s7364_s20]]  }
 0x8c8   :  { %v6864_v57 = vpop.f32.mrf.mxu0  ;;  %6904 = vmatprep.subr.mxu0 %v3127_v54 }
 0x8c9   :  { %v2944_v59 = vadd.f32 %v6864_v57, %v2801_v55  ;;  %6905 = vmatpush3.msra.mxu0 %v3127_v54  ;;  %v6338_v57 = vld [vmem:[%s7823_s19 + $0x8] sm:$0xff]  ;;  %s6201_s19 = sld [smem:[%s8292_s0 + %s7363_s16]]  }
 0x8ca   :  { %v2904_v62 = vpop.f32.mrf.mxu0  ;;  %6932 = vmatprep.subr.mxu0 %v6338_v57 }
 0x8cb   :  { %v2943_v1 = vadd.f32 %v2904_v62, %v2796_v58  ;;  %v2959_v2 = vadd.f32 %v6310_v61, %v2944_v59  ;;  %v7887_v58 = vld [vmem:[%s7884_s1 + $0x8] sm:$0xff]  ;;  %v7895_v59 = vld [vmem:[%s7884_s1] sm:$0xff] }
 0x8cc   :  { %v6867_v3 = vpop.f32.mrf.mxu0 }
 0x8cd   :  { %v2958_v4 = vadd.f32 %v6310_v61, %v2943_v1  ;;  %v2946_v0 = vadd.f32 %v6867_v3, %v2811_v63  ;;  %v2967_v15 = vmax.f32 %v2959_v2, 0.0 }
 0x8ce   :  { %v2914_v9 = vpop.f32.mrf.mxu0 }
 0x8cf   :  { %v2966_v11 = vmax.f32 %v2958_v4, 0.0  ;;  %v2945_v12 = vadd.f32 %v2914_v9, %v2806_v49  ;;  %v2961_v16 = vadd.f32 %v6310_v61, %v2946_v0 }
 0x8d0   :  { %v6870_v33 = vpop.f32.mrf.mxu0 }
 0x8d1   :  { %v2960_v22 = vadd.f32 %v6310_v61, %v2945_v12  ;;  %v2948_v24 = vadd.f32 %v6870_v33, %v2821_v60  ;;  %6890 = vmatprep.mubr.msk.f32.mxu1 %vm2989_vm15, %v2966_v11  ;;  %v2969_v37 = vmax.f32 %v2961_v16, 0.0 }
 0x8d2   :  { %v2924_v28 = vpop.f32.mrf.mxu0  ;;  %6891 = vmatmul.mubr.msk.f32.vlgmr.msra.gmra.mxu1 %vm2989_vm15, %v2967_v15 }
 0x8d3   :  { %v2968_v26 = vmax.f32 %v2960_v22, 0.0  ;;  %v2947_v30 = vadd.f32 %v2924_v28, %v2816_v19  ;;  %6919 = vmatpush3.msra.mxu1 %v3330_v36  ;;  %v2963_v20 = vadd.f32 %v6310_v61, %v2948_v24  ;;  %v6329_v28 = vld [vmem:[%s7908_s13] ss:$0 sm:$0xff] }
 0x8d4   :  { %v6873_v40 = vpop.f32.mrf.mxu0  ;;  %6946 = vmatprep.subr.mxu1 %v6349_v27 }
 0x8d5   :  { %v2962_v45 = vadd.f32 %v6310_v61, %v2947_v30  ;;  %v2950_v46 = vadd.f32 %v6873_v40, %v2831_v29  ;;  %6893 = vmatprep.mubr.msk.f32.mxu1 %vm2989_vm15, %v2968_v26  ;;  %v2971_v6 = vmax.f32 %v2963_v20, 0.0 }
 0x8d6   :  { %v2934_v48 = vpop.f32.mrf.mxu0  ;;  %6894 = vmatmul.mubr.msk.f32.gmra.mxu1 %vm2989_vm15, %v2969_v37 }
 0x8d7   :  { %v2970_v50 = vmax.f32 %v2962_v45, 0.0  ;;  %v2949_v51 = vadd.f32 %v2934_v48, %v2826_v44  ;;  %v2965_v52 = vadd.f32 %v6310_v61, %v2950_v46 }
 0x8d9   :  { %v2964_v53 = vadd.f32 %v6310_v61, %v2949_v51  ;;  %6896 = vmatprep.mubr.msk.f32.mxu1 %vm2989_vm15, %v2970_v50  ;;  %v2973_v55 = vmax.f32 %v2965_v52, 0.0  ;;  %v68_v61 = vstv %s6194_s5  ;;  %s6207_s5 = sld [smem:[%s8292_s0 + %s7367_s2]]  }
 0x8da   :  { %6897 = vmatmul.mubr.msk.f32.gmra.mxu1 %vm2989_vm15, %v2971_v6  ;;  %69 = vst [vmem:[#allocation10] sm:$0x1] %v68_v61 }
 0x8db   :  { %v2972_v36 = vmax.f32 %v2964_v53, 0.0 }
 0x8dd   :  { %6899 = vmatprep.mubr.msk.f32.mxu1 %vm2989_vm15, %v2972_v36 }
 0x8de   :  { %6900 = vmatmul.mubr.msk.f32.gmra.mxu1 %vm2989_vm15, %v2973_v55  ;;  %vm3136_vm15 = vcmask 130048  }
 0x8df   :  { %6920 = vmatprep.mubr.msk.f32.mxu1 %vm151_vm0, %v7713_v25 }
 0x8e2   :  { %6921 = vmatmul.mubr.msk.f32.vlgmr.msra.gmra.mxu1 %vm151_vm0, %v7726_v31 }
 0x8e3   :  { %6923 = vmatprep.mubr.msk.f32.mxu1 %vm151_vm0, %v7733_v32  ;;  %6947 = vmatpush3.msra.mxu1 %v6349_v27 }
 0x8e4   :  { %6965 = vmatprep.subr.mxu1 %v7339_v7 }
 0x8e6   :  { %6924 = vmatmul.mubr.msk.f32.gmra.mxu1 %vm151_vm0, %v7743_v38 }
 0x8e7   :  { %6926 = vmatprep.mubr.msk.f32.mxu1 %vm151_vm0, %v7748_v39 }
 0x8ea   :  { %6927 = vmatmul.mubr.msk.f32.gmra.mxu1 %vm151_vm0, %v7757_v41 }
 0x8eb   :  { %6929 = vmatprep.mubr.msk.f32.mxu1 %vm151_vm0, %v7762_v42 }
 0x8ee   :  { %6930 = vmatmul.mubr.msk.f32.gmra.mxu1 %vm151_vm0, %v7794_v17 }
 0x8ef   :  { %6948 = vmatprep.mubr.msk.f32.mxu1 %vm151_vm0, %v7713_v25 }
 0x8f2   :  { %6949 = vmatmul.mubr.msk.f32.vlgmr.msra.gmra.mxu1 %vm151_vm0, %v7726_v31 }
 0x8f3   :  { %6951 = vmatprep.mubr.msk.f32.mxu1 %vm151_vm0, %v7733_v32  ;;  %6966 = vmatpush3.msra.mxu1 %v7887_v58 }
 0x8f4   :  { %6975 = vmatprep.subr.mxu1 %v7339_v7 }
 0x8f6   :  { %6952 = vmatmul.mubr.msk.f32.gmra.mxu1 %vm151_vm0, %v7743_v38 }
 0x8f7   :  { %6954 = vmatprep.mubr.msk.f32.mxu1 %vm151_vm0, %v7748_v39 }
 0x8fa   :  { %6955 = vmatmul.mubr.msk.f32.gmra.mxu1 %vm151_vm0, %v7757_v41 }
 0x8fb   :  { %6957 = vmatprep.mubr.msk.f32.mxu1 %vm151_vm0, %v7762_v42 }
 0x8fe   :  { %6958 = vmatmul.mubr.msk.f32.gmra.mxu1 %vm151_vm0, %v7794_v17 }
 0x8ff   :  { %6967 = vmatprep.mubr.msk.f32.mxu1 %vm7340_vm5, %v7339_v7 }
 0x902   :  { %6968 = vmatmul.mubr.f32.vlgmr.msra.gmra.mxu1 %v7339_v7 }
 0x903   :  { %6977 = vmatprep.mubr.msk.f32.mxu1 %vm7340_vm5, %v7339_v7  ;;  %6976 = vmatpush3.msra.mxu1 %v7895_v59 }
 0x904   :  { %6985 = vmatprep.subr.mxu1 %v7339_v7 }
 0x992   :  { %v6892_v62 = vpop.f32.mrf.mxu1 }
 0x993   :  { %v3086_v63 = vadd.f32 %v6892_v62, %v6311_v18 }
 0x994   :  { %v3080_v1 = vpop.f32.mrf.mxu1 }
 0x995   :  { %v3081_v2 = vadd.f32 %v6311_v18, %v3080_v1  ;;  %v3120_v4 = vmax.f32 %v3086_v63, 0.0 }
 0x996   :  { %v6895_v3 = vpop.f32.mrf.mxu1 }
 0x997   :  { %v3119_v49 = vmax.f32 %v3081_v2, 0.0  ;;  %v3096_v0 = vadd.f32 %v6895_v3, %v6311_v18 }
 0x998   :  { %v3090_v5 = vpop.f32.mrf.mxu1 }
 0x999   :  { %v3091_v9 = vadd.f32 %v6311_v18, %v3090_v5  ;;  %6906 = vmatprep.mubr.msk.f32.mxu0 %vm3136_vm15, %v3119_v49  ;;  %v3122_v12 = vmax.f32 %v3096_v0, 0.0 }
 0x99a   :  { %v6898_v60 = vpop.f32.mrf.mxu1  ;;  %6907 = vmatmul.mubr.msk.f32.vlgmr.msra.gmra.mxu0 %vm3136_vm15, %v3120_v4 }
 0x99b   :  { %v3121_v11 = vmax.f32 %v3091_v9, 0.0  ;;  %6933 = vmatpush3.msra.mxu0 %v6338_v57  ;;  %v3106_v14 = vadd.f32 %v6898_v60, %v6311_v18  ;;  %v6320_v60 = vld [vmem:[#allocation10] ss:$0 sm:$0xff] }
 0x99c   :  { %v3100_v15 = vpop.f32.mrf.mxu1  ;;  %6960 = vmatprep.subr.mxu0 %v7339_v7 }
 0x99d   :  { %v3101_v16 = vadd.f32 %v6311_v18, %v3100_v15  ;;  %6909 = vmatprep.mubr.msk.f32.mxu0 %vm3136_vm15, %v3121_v11  ;;  %v3124_v22 = vmax.f32 %v3106_v14, 0.0 }
 0x99e   :  { %v6901_v33 = vpop.f32.mrf.mxu1  ;;  %6910 = vmatmul.mubr.msk.f32.gmra.mxu0 %vm3136_vm15, %v3122_v12 }
 0x99f   :  { %v3123_v19 = vmax.f32 %v3101_v16, 0.0  ;;  %v3116_v24 = vadd.f32 %v6901_v33, %v6311_v18 }
 0x9a0   :  { %v3110_v27 = vpop.f32.mrf.mxu1 }
 0x9a1   :  { %v3111_v29 = vadd.f32 %v6311_v18, %v3110_v27  ;;  %6912 = vmatprep.mubr.msk.f32.mxu0 %vm3136_vm15, %v3123_v19  ;;  %v3126_v37 = vmax.f32 %v3116_v24, 0.0  ;;  %v7952_v18 = vld [vmem:[%s7884_s1 + $0x10] sm:$0xff] }
 0x9a2   :  { %6913 = vmatmul.mubr.msk.f32.gmra.mxu0 %vm3136_vm15, %v3124_v22  ;;  %v6922_v26 = vpop.f32.mrf.mxu1 }
 0x9a3   :  { %v3125_v30 = vmax.f32 %v3111_v29, 0.0  ;;  %v3410_v35 = vadd.f32 %v6922_v26, %v6329_v28 }
 0x9a4   :  { %v3404_v20 = vpop.f32.mrf.mxu1 }
 0x9a5   :  { %3444 = vst.msk [vmem:[#allocation6 + $0x8] sm:$0xff] %vm151_vm0, %v3410_v35  ;;  %v3405_v40 = vadd.f32 %v6329_v28, %v3404_v20  ;;  %6915 = vmatprep.mubr.msk.f32.mxu0 %vm3136_vm15, %v3125_v30 }
 0x9a6   :  { %6916 = vmatmul.mubr.msk.f32.gmra.mxu0 %vm3136_vm15, %v3126_v37  ;;  %v6925_v44 = vpop.f32.mrf.mxu1 }
 0x9a7   :  { %3443 = vst.msk [vmem:[#allocation6] sm:$0xff] %vm151_vm0, %v3405_v40  ;;  %v3420_v45 = vadd.f32 %v6925_v44, %v6329_v28  ;;  %6934 = vmatprep.mubr.msk.f32.mxu0 %vm151_vm0, %v7713_v25 }
 0x9a8   :  { %v3414_v46 = vpop.f32.mrf.mxu1 }
 0x9a9   :  { %3446 = vst.msk [vmem:[#allocation6 + $0x18] sm:$0xff] %vm151_vm0, %v3420_v45  ;;  %v3415_v48 = vadd.f32 %v6329_v28, %v3414_v46 }
 0x9aa   :  { %v6928_v50 = vpop.f32.mrf.mxu1  ;;  %6935 = vmatmul.mubr.msk.f32.vlgmr.msra.gmra.mxu0 %vm151_vm0, %v7726_v31 }
 0x9ab   :  { %3445 = vst.msk [vmem:[#allocation6 + $0x10] sm:$0xff] %vm151_vm0, %v3415_v48  ;;  %v3430_v51 = vadd.f32 %v6928_v50, %v6329_v28  ;;  %6937 = vmatprep.mubr.msk.f32.mxu0 %vm151_vm0, %v7733_v32  ;;  %6961 = vmatpush3.msra.mxu0 %v7895_v59  ;;  %v6351_v32 = vld [vmem:[%s7908_s13 + $0x2] ss:$0 sm:$0xff]  ;;  %v6340_v50 = vld [vmem:[%s7908_s13 + $0x1] ss:$0 sm:$0xff] }
 0x9ac   :  { %v3424_v6 = vpop.f32.mrf.mxu1  ;;  %6970 = vmatprep.subr.mxu0 %v7339_v7 }
 0x9ad   :  { %3448 = vst.msk [vmem:[#allocation6 + $0x28] sm:$0xff] %vm151_vm0, %v3430_v51  ;;  %v3425_v25 = vadd.f32 %v6329_v28, %v3424_v6 }
 0x9ae   :  { %v6931_v52 = vpop.f32.mrf.mxu1  ;;  %6938 = vmatmul.mubr.msk.f32.gmra.mxu0 %vm151_vm0, %v7743_v38 }
 0x9af   :  { %3447 = vst.msk [vmem:[#allocation6 + $0x20] sm:$0xff] %vm151_vm0, %v3425_v25  ;;  %v3440_v31 = vadd.f32 %v6931_v52, %v6329_v28  ;;  %6940 = vmatprep.mubr.msk.f32.mxu0 %vm151_vm0, %v7748_v39 }
 0x9b0   :  { %v3434_v53 = vpop.f32.mrf.mxu1 }
 0x9b1   :  { %3450 = vst.msk [vmem:[#allocation6 + $0x38] sm:$0xff] %vm151_vm0, %v3440_v31  ;;  %v3435_v36 = vadd.f32 %v6329_v28, %v3434_v53 }
 0x9b2   :  { %6941 = vmatmul.mubr.msk.f32.gmra.mxu0 %vm151_vm0, %v7757_v41  ;;  %v6950_v55 = vpop.f32.mrf.mxu1 }
 0x9b3   :  { %3449 = vst.msk [vmem:[#allocation6 + $0x30] sm:$0xff] %vm151_vm0, %v3435_v36  ;;  %v3656_v54 = vadd.f32 %v6950_v55, %v6351_v32  ;;  %6943 = vmatprep.mubr.msk.f32.mxu0 %vm151_vm0, %v7762_v42 }
 0x9b4   :  { %v3650_v38 = vpop.f32.mrf.mxu1 }
 0x9b5   :  { %3690 = vst.msk [vmem:[#allocation8 + $0x8] sm:$0xff] %vm151_vm0, %v3656_v54  ;;  %v3651_v39 = vadd.f32 %v6351_v32, %v3650_v38 }
 0x9b6   :  { %6944 = vmatmul.mubr.msk.f32.gmra.mxu0 %vm151_vm0, %v7794_v17  ;;  %v6953_v57 = vpop.f32.mrf.mxu1 }
 0x9b7   :  { %3689 = vst.msk [vmem:[#allocation8] sm:$0xff] %vm151_vm0, %v3651_v39  ;;  %v3666_v61 = vadd.f32 %v6953_v57, %v6351_v32  ;;  %6962 = vmatprep.mubr.msk.f32.mxu0 %vm7340_vm5, %v7339_v7 }
 0x9b8   :  { %v3660_v41 = vpop.f32.mrf.mxu1 }
 0x9b9   :  { %3692 = vst.msk [vmem:[#allocation8 + $0x18] sm:$0xff] %vm151_vm0, %v3666_v61  ;;  %v3661_v42 = vadd.f32 %v6351_v32, %v3660_v41 }
 0x9ba   :  { %v6956_v62 = vpop.f32.mrf.mxu1  ;;  %6963 = vmatmul.mubr.f32.vlgmr.msra.gmra.mxu0 %v7339_v7 }
 0x9bb   :  { %3691 = vst.msk [vmem:[#allocation8 + $0x10] sm:$0xff] %vm151_vm0, %v3661_v42  ;;  %v3676_v63 = vadd.f32 %v6956_v62, %v6351_v32  ;;  %6971 = vmatpush3.msra.mxu0 %v7952_v18  ;;  %6972 = vmatprep.mubr.msk.f32.mxu0 %vm7340_vm5, %v7339_v7 }
 0x9bc   :  { %v3670_v17 = vpop.f32.mrf.mxu1  ;;  %6980 = vmatprep.subr.mxu0 %v7339_v7 }
 0x9bd   :  { %3694 = vst.msk [vmem:[#allocation8 + $0x28] sm:$0xff] %vm151_vm0, %v3676_v63  ;;  %v3671_v1 = vadd.f32 %v6351_v32, %v3670_v17 }
 0x9be   :  { %v6959_v2 = vpop.f32.mrf.mxu1  ;;  %6973 = vmatmul.mubr.f32.vlgmr.msra.gmra.mxu0 %v7339_v7 }
 0x9bf   :  { %3693 = vst.msk [vmem:[#allocation8 + $0x20] sm:$0xff] %vm151_vm0, %v3671_v1  ;;  %v3686_v3 = vadd.f32 %v6959_v2, %v6351_v32  ;;  %6981 = vmatpush3.msra.mxu0 %v7887_v58  ;;  %6982 = vmatprep.mubr.msk.f32.mxu0 %vm7340_vm5, %v7339_v7 }
 0x9c0   :  { %v3680_v49 = vpop.f32.mrf.mxu1  ;;  %6990 = vmatprep.subr.mxu0 %v7339_v7 }
 0x9c1   :  { %3696 = vst.msk [vmem:[#allocation8 + $0x38] sm:$0xff] %vm151_vm0, %v3686_v3  ;;  %v3681_v4 = vadd.f32 %v6351_v32, %v3680_v49 }
 0x9c2   :  { %v7970_v0 = vpop.f32.mrf.mxu1 }
 0x9c3   :  { %3695 = vst.msk [vmem:[#allocation8 + $0x30] sm:$0xff] %vm151_vm0, %v3681_v4 }
 0x9c4   :  { %v6969_v5 = vpop.f32.mrf.mxu1 }
 0xa5a   :  { %v6908_v9 = vpop.f32.mrf.mxu0 }
 0xa5b   :  { %v3233_v12 = vadd.f32 %v6908_v9, %v6320_v60 }
 0xa5c   :  { %v3227_v11 = vpop.f32.mrf.mxu0 }
 0xa5d   :  { %v3228_v14 = vadd.f32 %v6320_v60, %v3227_v11  ;;  %v3267_v19 = vsel %vm1048_vm2, %v3233_v12, -4.2949673e+09  ;;  %vm8296_vm2 = vcmp.eq.s32.totalorder %v7677_v47, 1  ;;  %v7334_v47 = vld [vmem:[%s7884_s1 + $0x8] sm:$0xff] }
 0xa5e   :  { %v6911_v15 = vpop.f32.mrf.mxu0 }
 0xa5f   :  { %v3266_v16 = vsel %vm800_vm1, %v3228_v14, -4.2949673e+09  ;;  %v3243_v22 = vadd.f32 %v6911_v15, %v6320_v60  ;;  %vm3314_vm1 = vcmask 7168  }
 0xa60   :  { %v3237_v33 = vpop.f32.mrf.mxu0  ;;  %v3268_v27 = vmax.f32 %v3266_v16, %v3267_v19 }
 0xa61   :  { %v3238_v24 = vadd.f32 %v6320_v60, %v3237_v33  ;;  %v3271_v35 = vsel %vm1548_vm8, %v3243_v22, -4.2949673e+09  ;;  %vm8298_vm8 = vcmp.eq.s32.totalorder %v7787_v13, 1 }
 0xa62   :  { %v6914_v28 = vpop.f32.mrf.mxu0 }
 0xa63   :  { %v3269_v29 = vsel %vm1298_vm7, %v3238_v24, -4.2949673e+09  ;;  %v3253_v37 = vadd.f32 %v6914_v28, %v6320_v60  ;;  %v8001_v24 = vld [vmem:[%s7995_s17] ss:$0 sm:$0xff]  ;;  %vm5758_vm7 = vcmask 105472  }
 0xa64   :  { %v3270_v26 = vmax.f32 %v3268_v27, %v3269_v29  ;;  %v3247_v30 = vpop.f32.mrf.mxu0 }
 0xa65   :  { %v3248_v20 = vadd.f32 %v6320_v60, %v3247_v30  ;;  %v3275_v51 = vsel %vm2048_vm9, %v3253_v37, -4.2949673e+09  ;;  %v3936_v37 = vld [vmem:[#allocation6] sm:$0xff] }
 0xa66   :  { %v3272_v40 = vmax.f32 %v3270_v26, %v3271_v35  ;;  %v6917_v44 = vpop.f32.mrf.mxu0 }
 0xa67   :  { %v3273_v45 = vsel %vm1798_vm3, %v3248_v20, -4.2949673e+09  ;;  %v3263_v6 = vadd.f32 %v6917_v44, %v6320_v60  ;;  %vm8297_vm3 = vcmp.eq.s32.totalorder %v7711_v21, 1  ;;  %v5711_v21 = vlaneseq }
 0xa68   :  { %v3274_v46 = vmax.f32 %v3272_v40, %v3273_v45  ;;  %v3257_v48 = vpop.f32.mrf.mxu0 }
 0xa69   :  { %v3258_v25 = vadd.f32 %v6320_v60, %v3257_v48  ;;  %v3279_v54 = vsel %vm2548_vm10, %v3263_v6, -4.2949673e+09 }
 0xa6a   :  { %v3276_v52 = vmax.f32 %v3274_v46, %v3275_v51  ;;  %v6936_v31 = vpop.f32.mrf.mxu0 }
 0xa6b   :  { %v3277_v53 = vsel %vm2298_vm4, %v3258_v25, -4.2949673e+09  ;;  %v3533_v32 = vadd.f32 %v6936_v31, %v6340_v50  ;;  %vm5804_vm4 = vcmask 1044480  }
 0xa6c   :  { %v3278_v36 = vmax.f32 %v3276_v52, %v3277_v53  ;;  %v3527_v55 = vpop.f32.mrf.mxu0 }
 0xa6d   :  { %3567 = vst.msk [vmem:[#allocation7 + $0x8] sm:$0xff] %vm151_vm0, %v3533_v32  ;;  %v3528_v38 = vadd.f32 %v6340_v50, %v3527_v55 }
 0xa6e   :  { %v3280_v39 = vmax.f32 %v3278_v36, %v3279_v54  ;;  %v6939_v57 = vpop.f32.mrf.mxu0 }
 0xa6f   :  { %3566 = vst.msk [vmem:[#allocation7] sm:$0xff] %vm151_vm0, %v3528_v38  ;;  %v3543_v61 = vadd.f32 %v6939_v57, %v6340_v50 }
 0xa70   :  { %v3281_v41 = vsub.f32 %v3266_v16, %v3280_v39  ;;  %v3284_v42 = vsub.f32 %v3267_v19, %v3280_v39  ;;  %v3287_v62 = vsub.f32 %v3269_v29, %v3280_v39  ;;  %v3537_v63 = vpop.f32.mrf.mxu0  ;;  %v3290_v17 = vsub.f32 %v3271_v35, %v3280_v39 }
 0xa71   :  { %3569 = vst.msk [vmem:[#allocation7 + $0x18] sm:$0xff] %vm151_vm0, %v3543_v61  ;;  %v3538_v3 = vadd.f32 %v6340_v50, %v3537_v63  ;;  %v3293_v4 = vsub.f32 %v3273_v45, %v3280_v39  ;;  %v3296_v11 = vsub.f32 %v3275_v51, %v3280_v39  ;;  %v3299_v16 = vsub.f32 %v3277_v53, %v3280_v39 }
 0xa72   :  { %v3282_v1 = vmul.f32 1.442695, %v3281_v41  ;;  %v3285_v2 = vmul.f32 1.442695, %v3284_v42  ;;  %v6942_v10 = vpop.f32.mrf.mxu0  ;;  %v3288_v49 = vmul.f32 1.442695, %v3287_v62  ;;  %v3302_v19 = vsub.f32 %v3279_v54, %v3280_v39 }
 0xa73   :  { %v3553_v5 = vadd.f32 %v6942_v10, %v6340_v50  ;;  %3568 = vst.msk [vmem:[#allocation7 + $0x10] sm:$0xff] %vm151_vm0, %v3538_v3  ;;  %v3291_v60 = vmul.f32 1.442695, %v3290_v17  ;;  %v3294_v15 = vmul.f32 1.442695, %v3293_v4 }
 0xa74   :  { %7231 = vpow2.f32 %v3282_v1  ;;  %v3547_v9 = vpop.f32.mrf.mxu0  ;;  %v3297_v27 = vmul.f32 1.442695, %v3296_v11  ;;  %v3300_v26 = vmul.f32 1.442695, %v3299_v16  ;;  %v3303_v35 = vmul.f32 1.442695, %v3302_v19 }
 0xa75   :  { %7233 = vpow2.f32 %v3285_v2  ;;  %3571 = vst.msk [vmem:[#allocation7 + $0x28] sm:$0xff] %vm151_vm0, %v3553_v5  ;;  %v3548_v12 = vadd.f32 %v6340_v50, %v3547_v9  ;;  %v8007_v42 = vld [vmem:[%s7995_s17 + $0x2] ss:$0 sm:$0xff] }
 0xa76   :  { %v6945_v14 = vpop.f32.mrf.mxu0  ;;  %7235 = vpow2.f32 %v3288_v49 }
 0xa77   :  { %3570 = vst.msk [vmem:[#allocation7 + $0x20] sm:$0xff] %vm151_vm0, %v3548_v12  ;;  %v3563_v33 = vadd.f32 %v6945_v14, %v6340_v50  ;;  %7237 = vpow2.f32 %v3291_v60 }
 0xa78   :  { %v3557_v22 = vpop.f32.mrf.mxu0  ;;  %7239 = vpow2.f32 %v3294_v15 }
 0xa79   :  { %3573 = vst.msk [vmem:[#allocation7 + $0x38] sm:$0xff] %vm151_vm0, %v3563_v33  ;;  %v3558_v28 = vadd.f32 %v6340_v50, %v3557_v22  ;;  %7241 = vpow2.f32 %v3297_v27  ;;  %v8019_v27 = vld [vmem:[%s7995_s17 + $0x1] ss:$0 sm:$0xff] }
 0xa7a   :  { %v3780_v29 = vpop.f32.mrf.mxu0  ;;  %7243 = vpow2.f32 %v3300_v26 }
 0xa7b   :  { %3572 = vst.msk [vmem:[#allocation7 + $0x30] sm:$0xff] %vm151_vm0, %v3558_v28  ;;  %v3781_v30 = vadd.f32 %v8001_v24, %v3780_v29  ;;  %7245 = vpow2.f32 %v3303_v35  ;;  %v3857_v28 = vadd.f32 %v8019_v27, %v7970_v0  ;;  %v3944_v29 = vld [vmem:[#allocation7] sm:$0xff] }
 0xa7c   :  { %v6964_v20 = vpop.f32.mrf.mxu0 }
 0xa7d   :  { %v3937_v40 = vadd.f32 %v3936_v37, %v3781_v30  ;;  %v3945_v26 = vadd.f32 %v3944_v29, %v3857_v28  ;;  %v3952_v20 = vld [vmem:[#allocation8] sm:$0xff] }
 0xa7e   :  { %v3932_v44 = vpop.f32.mrf.mxu0 }
 0xa7f   :  { %v6367_v45 = vmul.f32 -1.442695, %v3937_v40  ;;  %v3933_v62 = vadd.f32 %v8007_v42, %v3932_v44  ;;  %v6368_v30 = vmul.f32 -1.442695, %v3945_v26  ;;  %v4432_v26 = vld [vmem:[#allocation6 + $0x10] sm:$0xff] }
 0xa80   :  { %v6974_v46 = vpop.f32.mrf.mxu0 }
 0xa81   :  { %v7232_v48 = vpop.eup %7231  ;;  %7247 = vpow2.f32 %v6367_v45 }
 0xa82   :  { %v7234_v50 = vpop.eup %7233 }
 0xa83   :  { %v3305_v51 = vadd.f32 %v7234_v50, %v7232_v48  ;;  %v7236_v6 = vpop.eup %7235 }
 0xa84   :  { %v7238_v52 = vpop.eup %7237 }
 0xa85   :  { %v3306_v25 = vadd.f32 %v7236_v6, %v3305_v51  ;;  %v7240_v53 = vpop.eup %7239 }
 0xa86   :  { %v7242_v36 = vpop.eup %7241 }
 0xa87   :  { %v3307_v31 = vadd.f32 %v7238_v52, %v3306_v25  ;;  %v7244_v54 = vpop.eup %7243 }
 0xa88   :  { %v7246_v38 = vpop.eup %7245 }
 0xa89   :  { %v3308_v32 = vadd.f32 %v7240_v53, %v3307_v31 }
 0xa8b   :  { %v3309_v55 = vadd.f32 %v7242_v36, %v3308_v32  ;;  %v4183_v32 = vld [vmem:[#allocation6 + $0x8] sm:$0xff] }
 0xa8d   :  { %v3310_v39 = vadd.f32 %v7244_v54, %v3309_v55 }
 0xa8e   :  { %v7248_v57 = vpop.eup %7247 }
 0xa8f   :  { %v3311_v61 = vadd.f32 %v7246_v38, %v3310_v39  ;;  %v3941_v41 = vadd.f32 1.0, %v7248_v57 }
 0xa91   :  { %7249 = vrcp.f32 %v3311_v61 }
 0xa92   :  { %7251 = vrcp.f32 %v3941_v41 }
 0xa93   :  { %7253 = vpow2.f32 %v6368_v30  ;;  %v4441_v30 = vld [vmem:[#allocation7 + $0x10] sm:$0xff] }
 0xa9e   :  { %v7250_v63 = vpop.eup %7249 }
 0xa9f   :  { %v7252_v17 = vpop.eup %7251  ;;  %v3326_v1 = vmul.f32 %v7250_v63, %v7244_v54  ;;  %v3316_v2 = vmul.f32 %v7250_v63, %v7234_v50  ;;  %v3313_v3 = vmul.f32 %v7250_v63, %v7232_v48  ;;  %v3320_v10 = vmul.f32 %v7250_v63, %v7238_v52 }
 0xaa0   :  { %v3953_v49 = vmul.f32 %v7252_v17, %v3933_v62  ;;  %v3318_v4 = vmul.f32 %v7250_v63, %v7236_v6  ;;  %v3324_v5 = vmul.f32 %v7250_v63, %v7242_v36  ;;  %v3322_v9 = vmul.f32 %v7250_v63, %v7240_v53  ;;  %v7254_v35 = vpop.eup %7253  ;;  %v4192_v36 = vld [vmem:[#allocation7 + $0x8] sm:$0xff] }
 0xaa1   :  { %3327 = vst.msk [vmem:[#allocation9 + $0x30] sm:$0xff] %vm3314_vm1, %v3326_v1  ;;  %3317 = vst.msk [vmem:[#allocation9 + $0x8] sm:$0xff] %vm3314_vm1, %v3316_v2  ;;  %v3328_v60 = vmul.f32 %v7250_v63, %v7246_v38  ;;  %v3949_v37 = vadd.f32 1.0, %v7254_v35 }
 0xaa2   :  { %3315 = vst.msk [vmem:[#allocation9] sm:$0xff] %vm3314_vm1, %v3313_v3  ;;  %3321 = vst.msk [vmem:[#allocation9 + $0x18] sm:$0xff] %vm3314_vm1, %v3320_v10  ;;  %v3954_v40 = vadd.f32 %v3953_v49, %v3952_v20 }
 0xaa3   :  { %3319 = vst.msk [vmem:[#allocation9 + $0x10] sm:$0xff] %vm3314_vm1, %v3318_v4  ;;  %3325 = vst.msk [vmem:[#allocation9 + $0x28] sm:$0xff] %vm3314_vm1, %v3324_v5  ;;  %7255 = vrcp.f32 %v3949_v37  ;;  %v4201_v4 = vld [vmem:[#allocation8 + $0x8] sm:$0xff] }
 0xaa4   :  { %3323 = vst.msk [vmem:[#allocation9 + $0x20] sm:$0xff] %vm3314_vm1, %v3322_v9  ;;  %3329 = vst.msk [vmem:[#allocation9 + $0x38] sm:$0xff] %vm3314_vm1, %v3328_v60  ;;  %7257 = vtanh.f32 %v3954_v40 }
 0xaa8   :  { %v3968_v11 = vld [vmem:[#allocation9 + $0x8] sm:$0xff]  ;;  %v5213_v22 = vld [vmem:[#allocation9 + $0x30] sm:$0xff] }
 0xaa9   :  { %v3707_v12 = vld [vmem:[#allocation9] sm:$0xff]  ;;  %4207 = vperm.xlu1 %7150, %v3968_v11   ;;  %v4466_v14 = vld [vmem:[#allocation9 + $0x18] sm:$0xff] }
 0xaaa   :  { %3958 = vperm.xlu0 %7149, %v3707_v12   ;;  %v4217_v15 = vld [vmem:[#allocation9 + $0x10] sm:$0xff]  ;;  %v4964_v16 = vld [vmem:[#allocation9 + $0x28] sm:$0xff] }
 0xaab   :  { %v4715_v33 = vld [vmem:[#allocation9 + $0x20] sm:$0xff]  ;;  %v5462_v19 = vld [vmem:[#allocation9 + $0x38] sm:$0xff] }
 0xaad   :  { %4705 = vperm.xlu1 %7150, %v4466_v14  }
 0xaae   :  { %4456 = vperm.xlu0 %7149, %v4217_v15  }
 0xab0   :  { %v7256_v44 = vpop.eup %7255 }
 0xab1   :  { %5203 = vperm.xlu1 %7150, %v4964_v16   ;;  %v7258_v48 = vpop.eup %7257 }
 0xab2   :  { %4954 = vperm.xlu0 %7149, %v4715_v33  }
 0xab5   :  { %5701 = vperm.xlu1 %7150, %v5462_v19  }
 0xab6   :  { %5452 = vperm.xlu0 %7149, %v5213_v22  }
 0xb24   :  { %v4208_v60 = vpop.permute.xlu1 %4207 }
 0xb25   :  { %v3959_v45 = vpop.permute.xlu0 %3958 }
 0xb26   :  { %v3961_v46 = vmul.f32 %v7256_v44, %v3959_v45 }
 0xb28   :  { %v3962_v50 = vsub.f32 1.0, %v3961_v46  ;;  %v3964_v51 = vmul.f32 %v7258_v48, %v3961_v46 }
 0xb2a   :  { %v3963_v6 = vmul.f32 0.0, %v3962_v50 }
 0xb2c   :  { %v3965_v25 = vadd.f32 %v3964_v51, %v3963_v6 }
 0xb2e   :  { %v3966_v0 = vsel %vm805_vm6, %v3965_v25, 0.0 }
 0xb2f   :  { %6978 = vmatmul.mubr.msk.f32.vlgmr.msra.gmra.mxu1 %vm151_vm0, %v3966_v0  ;;  %6983 = vmatmul.mubr.msk.f32.vlgmr.msra.gmra.mxu0 %vm151_vm0, %v3966_v0 }
 0xb30   :  { %6986 = vmatpush3.msra.mxu1 %v7952_v18  ;;  %6987 = vmatprep.mubr.msk.f32.mxu1 %vm7340_vm5, %v7339_v7 }
 0xb31   :  { %6991 = vmatpush3.msra.mxu0 %v7895_v59  ;;  %6995 = vmatprep.subr.mxu1 %v7339_v7 }
 0xb32   :  { %6992 = vmatprep.mubr.msk.f32.mxu0 %vm7340_vm5, %v7339_v7  ;;  %7000 = vmatprep.subr.mxu0 %v7339_v7 }
 0xb33   :  { %6988 = vmatmul.mubr.msk.f32.vlgmr.msra.gmra.mxu1 %vm151_vm0, %v3966_v0 }
 0xb34   :  { %6996 = vmatpush3.msra.mxu1 %v7887_v58  ;;  %6997 = vmatprep.mubr.msk.f32.mxu1 %vm7340_vm5, %v7339_v7 }
 0xb35   :  { %7005 = vmatprep.subr.mxu1 %v7339_v7 }
 0xbef   :  { %v4038_v43 = vpop.f32.mrf.mxu1  ;;  %v4108_v52 = vpop.f32.mrf.mxu0 }
 0xbf0   :  { %v4039_v31 = vadd.f32 %v8001_v24, %v4038_v43  ;;  %v4109_v53 = vadd.f32 %v8019_v27, %v4108_v52 }
 0xbf1   :  { %v6979_v55 = vpop.f32.mrf.mxu1  ;;  %v6984_v54 = vpop.f32.mrf.mxu0 }
 0xbf2   :  { %v4184_v38 = vadd.f32 %v4183_v32, %v4039_v31  ;;  %v4193_v39 = vadd.f32 %v4192_v36, %v4109_v53  ;;  %v4450_v31 = vld [vmem:[#allocation8 + $0x10] sm:$0xff]  ;;  %v4457_v36 = vpop.permute.xlu0 %4456 }
 0xbf3   :  { %v4178_v57 = vpop.f32.mrf.mxu1 }
 0xbf4   :  { %v6372_v61 = vmul.f32 -1.442695, %v4184_v38  ;;  %v6373_v62 = vmul.f32 -1.442695, %v4193_v39  ;;  %v4179_v3 = vadd.f32 %v8007_v42, %v4178_v57 }
 0xbf5   :  { %v6989_v41 = vpop.f32.mrf.mxu1 }
 0xbf6   :  { %7259 = vpow2.f32 %v6372_v61 }
 0xbf7   :  { %7261 = vpow2.f32 %v6373_v62 }
 0xc03   :  { %v7260_v63 = vpop.eup %7259 }
 0xc04   :  { %v4188_v17 = vadd.f32 1.0, %v7260_v63  ;;  %v7262_v1 = vpop.eup %7261 }
 0xc05   :  { %v4197_v2 = vadd.f32 1.0, %v7262_v1  ;;  %v4681_v1 = vld [vmem:[#allocation6 + $0x18] sm:$0xff] }
 0xc06   :  { %7263 = vrcp.f32 %v4188_v17 }
 0xc07   :  { %7265 = vrcp.f32 %v4197_v2  ;;  %v4690_v2 = vld [vmem:[#allocation7 + $0x18] sm:$0xff] }
 0xc13   :  { %v7264_v10 = vpop.eup %7263 }
 0xc14   :  { %v4202_v49 = vmul.f32 %v7264_v10, %v4179_v3  ;;  %v7266_v9 = vpop.eup %7265 }
 0xc15   :  { %v4210_v11 = vmul.f32 %v7266_v9, %v4208_v60 }
 0xc16   :  { %v4203_v5 = vadd.f32 %v4202_v49, %v4201_v4 }
 0xc17   :  { %v4211_v12 = vsub.f32 1.0, %v4210_v11 }
 0xc18   :  { %7267 = vtanh.f32 %v4203_v5 }
 0xc19   :  { %v4212_v15 = vmul.f32 %v4211_v12, %v3966_v0 }
 0xc25   :  { %v7268_v14 = vpop.eup %7267 }
 0xc26   :  { %v4213_v16 = vmul.f32 %v7268_v14, %v4210_v11 }
 0xc28   :  { %v4214_v33 = vadd.f32 %v4213_v16, %v4212_v15 }
 0xc2a   :  { %v4215_v19 = vsel %vm1053_vm11, %v4214_v33, %v3966_v0 }
 0xc2b   :  { %6993 = vmatmul.mubr.msk.f32.vlgmr.msra.gmra.mxu0 %vm151_vm0, %v4215_v19  ;;  %6998 = vmatmul.mubr.msk.f32.vlgmr.msra.gmra.mxu1 %vm151_vm0, %v4215_v19 }
 0xc2c   :  { %7001 = vmatpush3.msra.mxu0 %v7952_v18  ;;  %7002 = vmatprep.mubr.msk.f32.mxu0 %vm7340_vm5, %v7339_v7 }
 0xc2d   :  { %7006 = vmatpush3.msra.mxu1 %v7895_v59  ;;  %7010 = vmatprep.subr.mxu0 %v7339_v7 }
 0xc2e   :  { %7007 = vmatprep.mubr.msk.f32.mxu1 %vm7340_vm5, %v7339_v7  ;;  %7015 = vmatprep.subr.mxu1 %v7339_v7 }
 0xc2f   :  { %7003 = vmatmul.mubr.msk.f32.vlgmr.msra.gmra.mxu0 %vm151_vm0, %v4215_v19 }
 0xc30   :  { %7011 = vmatpush3.msra.mxu0 %v7887_v58  ;;  %7012 = vmatprep.mubr.msk.f32.mxu0 %vm7340_vm5, %v7339_v7 }
 0xc31   :  { %7020 = vmatprep.subr.mxu0 %v7339_v7 }
 0xceb   :  { %v4287_v23 = vpop.f32.mrf.mxu0  ;;  %v4357_v22 = vpop.f32.mrf.mxu1 }
 0xcec   :  { %v4288_v28 = vadd.f32 %v8001_v24, %v4287_v23  ;;  %v4358_v29 = vadd.f32 %v8019_v27, %v4357_v22  ;;  %v4699_v22 = vld [vmem:[#allocation8 + $0x18] sm:$0xff] }
 0xced   :  { %v6994_v35 = vpop.f32.mrf.mxu0  ;;  %v6999_v37 = vpop.f32.mrf.mxu1 }
 0xcee   :  { %v4433_v20 = vadd.f32 %v4432_v26, %v4288_v28  ;;  %v4442_v40 = vadd.f32 %v4441_v30, %v4358_v29  ;;  %v4706_v26 = vpop.permute.xlu1 %4705 }
 0xcef   :  { %v4427_v44 = vpop.f32.mrf.mxu0 }
 0xcf0   :  { %v6377_v45 = vmul.f32 -1.442695, %v4433_v20  ;;  %v6378_v48 = vmul.f32 -1.442695, %v4442_v40  ;;  %v4428_v0 = vadd.f32 %v8007_v42, %v4427_v44 }
 0xcf1   :  { %v7004_v46 = vpop.f32.mrf.mxu0 }
 0xcf2   :  { %7269 = vpow2.f32 %v6377_v45 }
 0xcf3   :  { %7271 = vpow2.f32 %v6378_v48 }
 0xcff   :  { %v7270_v50 = vpop.eup %7269 }
 0xd00   :  { %v4437_v51 = vadd.f32 1.0, %v7270_v50  ;;  %v7272_v6 = vpop.eup %7271 }
 0xd01   :  { %v4446_v25 = vadd.f32 1.0, %v7272_v6  ;;  %v4939_v6 = vld [vmem:[#allocation7 + $0x20] sm:$0xff] }
 0xd02   :  { %7273 = vrcp.f32 %v4437_v51  ;;  %v4930_v51 = vld [vmem:[#allocation6 + $0x20] sm:$0xff] }
 0xd03   :  { %7275 = vrcp.f32 %v4446_v25 }
 0xd0f   :  { %v7274_v43 = vpop.eup %7273 }
 0xd10   :  { %v4451_v52 = vmul.f32 %v7274_v43, %v4428_v0  ;;  %v7276_v32 = vpop.eup %7275 }
 0xd11   :  { %v4459_v55 = vmul.f32 %v7276_v32, %v4457_v36 }
 0xd12   :  { %v4452_v53 = vadd.f32 %v4451_v52, %v4450_v31 }
 0xd13   :  { %v4460_v54 = vsub.f32 1.0, %v4459_v55 }
 0xd14   :  { %7277 = vtanh.f32 %v4452_v53 }
 0xd15   :  { %v4461_v39 = vmul.f32 %v4460_v54, %v4215_v19 }
 0xd21   :  { %v7278_v38 = vpop.eup %7277 }
 0xd22   :  { %v4462_v57 = vmul.f32 %v7278_v38, %v4459_v55 }
 0xd24   :  { %v4463_v61 = vadd.f32 %v4462_v57, %v4461_v39 }
 0xd26   :  { %v4464_v41 = vsel %vm1303_vm12, %v4463_v61, %v4215_v19 }
 0xd27   :  { %7008 = vmatmul.mubr.msk.f32.vlgmr.msra.gmra.mxu1 %vm151_vm0, %v4464_v41  ;;  %7013 = vmatmul.mubr.msk.f32.vlgmr.msra.gmra.mxu0 %vm151_vm0, %v4464_v41 }
 0xd28   :  { %7016 = vmatpush3.msra.mxu1 %v7952_v18  ;;  %7017 = vmatprep.mubr.msk.f32.mxu1 %vm7340_vm5, %v7339_v7 }
 0xd29   :  { %7021 = vmatpush3.msra.mxu0 %v7895_v59  ;;  %7025 = vmatprep.subr.mxu1 %v7339_v7 }
 0xd2a   :  { %7022 = vmatprep.mubr.msk.f32.mxu0 %vm7340_vm5, %v7339_v7  ;;  %7030 = vmatprep.subr.mxu0 %v7339_v7 }
 0xd2b   :  { %7018 = vmatmul.mubr.msk.f32.vlgmr.msra.gmra.mxu1 %vm151_vm0, %v4464_v41 }
 0xd2c   :  { %7026 = vmatpush3.msra.mxu1 %v7887_v58  ;;  %7027 = vmatprep.mubr.msk.f32.mxu1 %vm7340_vm5, %v7339_v7 }
 0xd2d   :  { %7035 = vmatprep.subr.mxu1 %v7339_v7 }
 0xde7   :  { %v4536_v56 = vpop.f32.mrf.mxu1  ;;  %v4606_v62 = vpop.f32.mrf.mxu0 }
 0xde8   :  { %v4537_v63 = vadd.f32 %v8001_v24, %v4536_v56  ;;  %v4607_v17 = vadd.f32 %v8019_v27, %v4606_v62  ;;  %v4948_v56 = vld [vmem:[#allocation8 + $0x20] sm:$0xff] }
 0xde9   :  { %v7009_v3 = vpop.f32.mrf.mxu1  ;;  %v7014_v10 = vpop.f32.mrf.mxu0 }
 0xdea   :  { %v4682_v49 = vadd.f32 %v4681_v1, %v4537_v63  ;;  %v4691_v4 = vadd.f32 %v4690_v2, %v4607_v17  ;;  %v4955_v17 = vpop.permute.xlu0 %4954 }
 0xdeb   :  { %v4676_v5 = vpop.f32.mrf.mxu1 }
 0xdec   :  { %v6382_v9 = vmul.f32 -1.442695, %v4682_v49  ;;  %v6383_v11 = vmul.f32 -1.442695, %v4691_v4  ;;  %v4677_v33 = vadd.f32 %v8007_v42, %v4676_v5 }
 0xded   :  { %v7019_v60 = vpop.f32.mrf.mxu1 }
 0xdee   :  { %7279 = vpow2.f32 %v6382_v9 }
 0xdef   :  { %7281 = vpow2.f32 %v6383_v11  ;;  %v5179_v11 = vld [vmem:[#allocation6 + $0x28] sm:$0xff] }
 0xdfb   :  { %v7280_v12 = vpop.eup %7279 }
 0xdfc   :  { %v4686_v14 = vadd.f32 1.0, %v7280_v12  ;;  %v7282_v15 = vpop.eup %7281  ;;  %v5188_v12 = vld [vmem:[#allocation7 + $0x28] sm:$0xff] }
 0xdfd   :  { %v4695_v16 = vadd.f32 1.0, %v7282_v15 }
 0xdfe   :  { %7283 = vrcp.f32 %v4686_v14 }
 0xdff   :  { %7285 = vrcp.f32 %v4695_v16 }
 0xe0b   :  { %v7284_v19 = vpop.eup %7283 }
 0xe0c   :  { %v4700_v23 = vmul.f32 %v7284_v19, %v4677_v33  ;;  %v7286_v29 = vpop.eup %7285 }
 0xe0d   :  { %v4708_v30 = vmul.f32 %v7286_v29, %v4706_v26 }
 0xe0e   :  { %v4701_v28 = vadd.f32 %v4700_v23, %v4699_v22 }
 0xe0f   :  { %v4709_v35 = vsub.f32 1.0, %v4708_v30 }
 0xe10   :  { %7287 = vtanh.f32 %v4701_v28 }
 0xe11   :  { %v4710_v20 = vmul.f32 %v4709_v35, %v4464_v41 }
 0xe1d   :  { %v7288_v37 = vpop.eup %7287 }
 0xe1e   :  { %v4711_v40 = vmul.f32 %v7288_v37, %v4708_v30 }
 0xe20   :  { %v4712_v44 = vadd.f32 %v4711_v40, %v4710_v20  ;;  %v5197_v40 = vld [vmem:[#allocation8 + $0x28] sm:$0xff] }
 0xe22   :  { %v4713_v45 = vsel %vm1553_vm13, %v4712_v44, %v4464_v41 }
 0xe23   :  { %7023 = vmatmul.mubr.msk.f32.vlgmr.msra.gmra.mxu0 %vm151_vm0, %v4713_v45  ;;  %7028 = vmatmul.mubr.msk.f32.vlgmr.msra.gmra.mxu1 %vm151_vm0, %v4713_v45 }
 0xe24   :  { %7031 = vmatpush3.msra.mxu0 %v7952_v18  ;;  %7032 = vmatprep.mubr.msk.f32.mxu0 %vm7340_vm5, %v7339_v7 }
 0xe25   :  { %7036 = vmatpush3.msra.mxu1 %v7895_v59  ;;  %7040 = vmatprep.subr.mxu0 %v7339_v7 }
 0xe26   :  { %7037 = vmatprep.mubr.msk.f32.mxu1 %vm7340_vm5, %v7339_v7  ;;  %7045 = vmatprep.subr.mxu1 %v7339_v7 }
 0xe27   :  { %7033 = vmatmul.mubr.msk.f32.vlgmr.msra.gmra.mxu0 %vm151_vm0, %v4713_v45 }
 0xe28   :  { %7041 = vmatpush3.msra.mxu0 %v7887_v58  ;;  %7042 = vmatprep.mubr.msk.f32.mxu0 %vm7340_vm5, %v7339_v7 }
 0xe29   :  { %7050 = vmatprep.subr.mxu0 %v7339_v7 }
 0xee3   :  { %v4785_v34 = vpop.f32.mrf.mxu0  ;;  %v4855_v46 = vpop.f32.mrf.mxu1 }
 0xee4   :  { %v4786_v48 = vadd.f32 %v8001_v24, %v4785_v34  ;;  %v4856_v50 = vadd.f32 %v8019_v27, %v4855_v46  ;;  %v5204_v34 = vpop.permute.xlu1 %5203 }
 0xee5   :  { %v7024_v25 = vpop.f32.mrf.mxu0  ;;  %v7029_v0 = vpop.f32.mrf.mxu1 }
 0xee6   :  { %v4931_v43 = vadd.f32 %v4930_v51, %v4786_v48  ;;  %v4940_v52 = vadd.f32 %v4939_v6, %v4856_v50 }
 0xee7   :  { %v4925_v31 = vpop.f32.mrf.mxu0 }
 0xee8   :  { %v6387_v53 = vmul.f32 -1.442695, %v4931_v43  ;;  %v6388_v36 = vmul.f32 -1.442695, %v4940_v52  ;;  %v4926_v57 = vadd.f32 %v8007_v42, %v4925_v31  ;;  %v7333_v43 = vld [vmem:[%s7884_s1] sm:$0xff]  ;;  %s6209_s1 = sld [smem:[%s8292_s0 + %s7366_s28]]  }
 0xee9   :  { %v7034_v32 = vpop.f32.mrf.mxu0 }
 0xeea   :  { %7289 = vpow2.f32 %v6387_v53 }
 0xeeb   :  { %7291 = vpow2.f32 %v6388_v36  ;;  %v5428_v36 = vld [vmem:[#allocation6 + $0x30] sm:$0xff] }
 0xef7   :  { %v7290_v55 = vpop.eup %7289 }
 0xef8   :  { %v4935_v54 = vadd.f32 1.0, %v7290_v55  ;;  %v7292_v38 = vpop.eup %7291  ;;  %v5437_v55 = vld [vmem:[#allocation7 + $0x30] sm:$0xff] }
 0xef9   :  { %v4944_v39 = vadd.f32 1.0, %v7292_v38 }
 0xefa   :  { %7293 = vrcp.f32 %v4935_v54 }
 0xefb   :  { %7295 = vrcp.f32 %v4944_v39 }
 0xf07   :  { %v7294_v61 = vpop.eup %7293 }
 0xf08   :  { %v4949_v41 = vmul.f32 %v7294_v61, %v4926_v57  ;;  %v7296_v63 = vpop.eup %7295 }
 0xf09   :  { %v4957_v1 = vmul.f32 %v7296_v63, %v4955_v17 }
 0xf0a   :  { %v4950_v62 = vadd.f32 %v4949_v41, %v4948_v56 }
 0xf0b   :  { %v4958_v2 = vsub.f32 1.0, %v4957_v1 }
 0xf0c   :  { %7297 = vtanh.f32 %v4950_v62 }
 0xf0d   :  { %v4959_v10 = vmul.f32 %v4958_v2, %v4713_v45 }
 0xf19   :  { %v7298_v3 = vpop.eup %7297 }
 0xf1a   :  { %v4960_v49 = vmul.f32 %v7298_v3, %v4957_v1 }
 0xf1c   :  { %v4961_v4 = vadd.f32 %v4960_v49, %v4959_v10 }
 0xf1e   :  { %v4962_v5 = vsel %vm1803_vm14, %v4961_v4, %v4713_v45  ;;  %v5446_v4 = vld [vmem:[#allocation8 + $0x30] sm:$0xff] }
 0xf1f   :  { %7038 = vmatmul.mubr.msk.f32.vlgmr.msra.gmra.mxu1 %vm151_vm0, %v4962_v5  ;;  %7043 = vmatmul.mubr.msk.f32.vlgmr.msra.gmra.mxu0 %vm151_vm0, %v4962_v5 }
 0xf20   :  { %7046 = vmatpush3.msra.mxu1 %v7952_v18  ;;  %7047 = vmatprep.mubr.msk.f32.mxu1 %vm7340_vm5, %v7339_v7 }
 0xf21   :  { %7051 = vmatpush3.msra.mxu0 %v7895_v59  ;;  %7055 = vmatprep.subr.mxu1 %v7339_v7 }
 0xf22   :  { %7052 = vmatprep.mubr.msk.f32.mxu0 %vm7340_vm5, %v7339_v7  ;;  %7060 = vmatprep.subr.mxu0 %v7339_v7 }
 0xf23   :  { %7048 = vmatmul.mubr.msk.f32.vlgmr.msra.gmra.mxu1 %vm151_vm0, %v4962_v5 }
 0xf24   :  { %7056 = vmatpush3.msra.mxu1 %v7887_v58  ;;  %7057 = vmatprep.mubr.msk.f32.mxu1 %vm7340_vm5, %v7339_v7 }
 0xf25   :  { %7065 = vmatprep.subr.mxu1 %v7339_v7 }
 0xfdf   :  { %v5034_v8 = vpop.f32.mrf.mxu1  ;;  %v5104_v9 = vpop.f32.mrf.mxu0 }
 0xfe0   :  { %v5035_v59 = vadd.f32 %v8001_v24, %v5034_v8  ;;  %v5105_v60 = vadd.f32 %v8019_v27, %v5104_v9  ;;  %v5453_v9 = vpop.permute.xlu0 %5452 }
 0xfe1   :  { %v7039_v14 = vpop.f32.mrf.mxu1  ;;  %v7044_v15 = vpop.f32.mrf.mxu0 }
 0xfe2   :  { %v5180_v16 = vadd.f32 %v5179_v11, %v5035_v59  ;;  %v5189_v33 = vadd.f32 %v5188_v12, %v5105_v60 }
 0xfe3   :  { %v5174_v19 = vpop.f32.mrf.mxu1 }
 0xfe4   :  { %v6392_v23 = vmul.f32 -1.442695, %v5180_v16  ;;  %v6393_v22 = vmul.f32 -1.442695, %v5189_v33  ;;  %v5175_v35 = vadd.f32 %v8007_v42, %v5174_v19  ;;  %v5800_v33 = vld [vmem:[%s6204_s21 + $0x18] sm:$0x1f] }
 0xfe5   :  { %v7049_v58 = vpop.f32.mrf.mxu1  ;;  %v5799_v19 = vld [vmem:[%s6204_s21 + $0x10] sm:$0x1f] }
 0xfe6   :  { %7299 = vpow2.f32 %v6392_v23  ;;  %v5798_v23 = vld [vmem:[%s6204_s21 + $0x8] sm:$0xff] }
 0xfe7   :  { %7301 = vpow2.f32 %v6393_v22  ;;  %v5796_v22 = vld [vmem:[%s6203_s25 + $0x8] sm:$0xff] }
 0xff3   :  { %v7300_v28 = vpop.eup %7299 }
 0xff4   :  { %v5184_v29 = vadd.f32 1.0, %v7300_v28  ;;  %v7302_v26 = vpop.eup %7301  ;;  %v5795_v28 = vld [vmem:[%s6203_s25] sm:$0xff] }
 0xff5   :  { %v5193_v30 = vadd.f32 1.0, %v7302_v26  ;;  %v5710_v26 = vld [vmem:[%s6181_s29] sm:$0xff] }
 0xff6   :  { %7303 = vrcp.f32 %v5184_v29  ;;  %v5797_v29 = vld [vmem:[%s6204_s21] sm:$0xff] }
 0xff7   :  { %7305 = vrcp.f32 %v5193_v30 }
0x1003   :  { %v7304_v37 = vpop.eup %7303 }
0x1004   :  { %v5198_v20 = vmul.f32 %v7304_v37, %v5175_v35  ;;  %v7306_v45 = vpop.eup %7305 }
0x1005   :  { %v5206_v46 = vmul.f32 %v7306_v45, %v5204_v34 }
0x1006   :  { %v5199_v44 = vadd.f32 %v5198_v20, %v5197_v40 }
0x1007   :  { %v5207_v48 = vsub.f32 1.0, %v5206_v46 }
0x1008   :  { %7307 = vtanh.f32 %v5199_v44 }
0x1009   :  { %v5208_v51 = vmul.f32 %v5207_v48, %v4962_v5 }
0x1015   :  { %v7308_v50 = vpop.eup %7307 }
0x1016   :  { %v5209_v6 = vmul.f32 %v7308_v50, %v5206_v46 }
0x1018   :  { %v5210_v25 = vadd.f32 %v5209_v6, %v5208_v51 }
0x101a   :  { %v5211_v0 = vsel %vm8296_vm2, %v5210_v25, %v4962_v5 }
0x101b   :  { %7053 = vmatmul.mubr.msk.f32.vlgmr.msra.gmra.mxu0 %vm151_vm0, %v5211_v0  ;;  %7058 = vmatmul.mubr.msk.f32.vlgmr.msra.gmra.mxu1 %vm151_vm0, %v5211_v0 }
0x101c   :  { %7061 = vmatpush3.msra.mxu0 %v7952_v18  ;;  %7062 = vmatprep.mubr.msk.f32.mxu0 %vm7340_vm5, %v7339_v7 }
0x101d   :  { %7066 = vmatpush3.msra.mxu1 %v7333_v43  ;;  %7070 = vmatprep.subr.mxu0 %v7339_v7 }
0x101e   :  { %7067 = vmatprep.mubr.msk.f32.mxu1 %vm7340_vm5, %v7339_v7  ;;  %7075 = vmatprep.subr.mxu1 %v7339_v7 }
0x101f   :  { %7063 = vmatmul.mubr.msk.f32.vlgmr.msra.gmra.mxu0 %vm151_vm0, %v5211_v0 }
0x1020   :  { %7071 = vmatpush3.msra.mxu0 %v7334_v47  ;;  %7072 = vmatprep.mubr.msk.f32.mxu0 %vm7340_vm5, %v7339_v7 }
0x1021   :  { %6409 = vmatprep.subr.msk.mxu0 %vm5804_vm4, %v5800_v33  ;;  %v5998_v33 = vld [vmem:[%s8186_s11 + $0xd0] sm:$0xff] }
0x10db   :  { %v5283_v52 = vpop.f32.mrf.mxu0  ;;  %v5353_v31 = vpop.f32.mrf.mxu1 }
0x10dc   :  { %v5284_v53 = vadd.f32 %v8001_v24, %v5283_v52  ;;  %v5354_v32 = vadd.f32 %v8019_v27, %v5353_v31 }
0x10dd   :  { %v7054_v54 = vpop.f32.mrf.mxu0  ;;  %v7059_v38 = vpop.f32.mrf.mxu1 }
0x10de   :  { %v5429_v39 = vadd.f32 %v5428_v36, %v5284_v53  ;;  %v5438_v57 = vadd.f32 %v5437_v55, %v5354_v32  ;;  %v6407_v55 = vld [vmem:[%s6200_s3] ss:$0 sm:$0xff] }
0x10df   :  { %v5423_v61 = vpop.f32.mrf.mxu0  ;;  %v6408_v38 = vld [vmem:[%s6202_s7] ss:$0 sm:$0xff] }
0x10e0   :  { %v6397_v41 = vmul.f32 -1.442695, %v5429_v39  ;;  %v6398_v62 = vmul.f32 -1.442695, %v5438_v57  ;;  %v5424_v3 = vadd.f32 %v8007_v42, %v5423_v61  ;;  %v6003_v61 = vld [vmem:[%s8186_s11 + $0xf8] sm:$0xff] }
0x10e1   :  { %v7064_v56 = vpop.f32.mrf.mxu0 }
0x10e2   :  { %7309 = vpow2.f32 %v6397_v41  ;;  %v5987_v41 = vld [vmem:[%s8186_s11 + $0x78] sm:$0xff]  ;;  %v6002_v56 = vld [vmem:[%s8186_s11 + $0xf0] sm:$0xff] }
0x10e3   :  { %7311 = vpow2.f32 %v6398_v62 }
0x10ef   :  { %v7310_v63 = vpop.eup %7309 }
0x10f0   :  { %v5433_v17 = vadd.f32 1.0, %v7310_v63  ;;  %v7312_v1 = vpop.eup %7311 }
0x10f1   :  { %v5442_v2 = vadd.f32 1.0, %v7312_v1 }
0x10f2   :  { %7313 = vrcp.f32 %v5433_v17  ;;  %v5986_v17 = vld [vmem:[%s8186_s11 + $0x70] sm:$0xff] }
0x10f3   :  { %7315 = vrcp.f32 %v5442_v2 }
0x10ff   :  { %v7314_v10 = vpop.eup %7313 }
0x1100   :  { %v5447_v49 = vmul.f32 %v7314_v10, %v5424_v3  ;;  %v7316_v8 = vpop.eup %7315  ;;  %v6001_v3 = vld [vmem:[%s8186_s11 + $0xe8] sm:$0xff]  ;;  %v5677_v10 = vld [vmem:[#allocation6 + $0x38] sm:$0xff] }
0x1101   :  { %v5455_v59 = vmul.f32 %v7316_v8, %v5453_v9  ;;  %v5985_v8 = vld [vmem:[%s8186_s11 + $0x68] sm:$0xff] }
0x1102   :  { %v5448_v5 = vadd.f32 %v5447_v49, %v5446_v4  ;;  %v5686_v49 = vld [vmem:[#allocation7 + $0x38] sm:$0xff] }
0x1103   :  { %v5456_v60 = vsub.f32 1.0, %v5455_v59 }
0x1104   :  { %7317 = vtanh.f32 %v5448_v5 }
0x1105   :  { %v5457_v12 = vmul.f32 %v5456_v60, %v5211_v0  ;;  %v6000_v60 = vld [vmem:[%s8186_s11 + $0xe0] sm:$0xff] }
0x1111   :  { %v7318_v11 = vpop.eup %7317 }
0x1112   :  { %v5458_v14 = vmul.f32 %v7318_v11, %v5455_v59 }
0x1114   :  { %v5459_v15 = vadd.f32 %v5458_v14, %v5457_v12  ;;  %v5999_v12 = vld [vmem:[%s8186_s11 + $0xd8] sm:$0xff] }
0x1116   :  { %v8144_v16 = vsel %vm8297_vm3, %v5459_v15, %v5211_v0  ;;  %v5983_v15 = vld [vmem:[%s8186_s11 + $0x58] sm:$0xff] }
0x1117   :  { %7068 = vmatmul.mubr.msk.f32.vlgmr.msra.gmra.mxu1 %vm151_vm0, %v8144_v16  ;;  %7073 = vmatmul.mubr.msk.f32.vlgmr.msra.gmra.mxu0 %vm151_vm0, %v8144_v16 }
0x1118   :  { %7076 = vmatpush3.msra.mxu1 %v7952_v18  ;;  %7077 = vmatprep.mubr.msk.f32.mxu1 %vm7340_vm5, %v7339_v7  ;;  %v8166_v18 = vshrl.u32 %v5711_v21, 7 }
0x1119   :  { %5875 = vmatprep.mubr.f32.mxu0 %v7339_v7  ;;  %6410 = vmatpush1.msk.msra.mxu0 %vm5804_vm4, %v5799_v19  ;;  %v5982_v19 = vld [vmem:[%s8186_s11 + $0x50] sm:$0xff] }
0x111a   :  { %vm5713_vm6 = vcmp.lt.s32.totalorder %v8166_v18, 4  ;;  %5915 = vmatprep.subr.mxu1 %v5796_v22  ;;  %5841 = vmatprep.subr.mxu0 %v5798_v23  ;;  %v5997_v23 = vld [vmem:[%s8186_s11 + $0xc8] sm:$0xff] }
0x111b   :  { %7078 = vmatmul.mubr.msk.f32.vlgmr.msra.gmra.mxu1 %vm151_vm0, %v8144_v16  ;;  %v8170_v58 = vsel %vm5713_vm6, 1.0, %v7339_v7  ;;  %5842 = vmatpush1.msra.mxu0 %v5797_v29  ;;  %v5981_v22 = vld [vmem:[%s8186_s11 + $0x48] sm:$0xff]  ;;  %v5980_v29 = vld [vmem:[%s8186_s11 + $0x40] sm:$0xff] }
0x111c   :  { %5949 = vmatprep.mubr.f32.mxu1 %v7339_v7  ;;  %5916 = vmatpush1.msra.mxu1 %v5795_v28  ;;  %v5757_v30 = vmul.f32 %v8170_v58, %v5710_v26  ;;  %v5996_v28 = vld [vmem:[%s8186_s11 + $0xc0] sm:$0xff] }
0x111d   :  { %7080 = vmatprep.subr.mxu1 %v7339_v7  ;;  %6618 = vmatprep.subr.mxu0 %v6003_v61 }
0x111e   :  { %v5759_v35 = vsel %vm5758_vm7, %v5757_v30, 0.0  ;;  %v5979_v30 = vld [vmem:[%s8186_s11 + $0x38] sm:$0xff] }
0x111f   :  { %v5760_v37 = vrot.slane %v5759_v35, 4 }
0x1121   :  { %v5761_v20 = vadd.f32 %v5760_v37, %v5759_v35  ;;  %v5994_v35 = vld [vmem:[%s8186_s11 + $0xb0] sm:$0xff] }
0x1122   :  { %v5978_v37 = vld [vmem:[%s8186_s11 + $0x30] sm:$0xff] }
0x1123   :  { %v5762_v40 = vrot.slane %v5761_v20, 2 }
0x1125   :  { %v5763_v44 = vadd.f32 %v5762_v40, %v5761_v20  ;;  %v5993_v20 = vld [vmem:[%s8186_s11 + $0xa8] sm:$0xff] }
0x1127   :  { %v5764_v45 = vrot.slane %v5763_v44, 1 }
0x1129   :  { %v5765_v34 = vadd.f32 %v5764_v45, %v5763_v44 }
0x112b   :  { %v5766_v46 = vmul.f32 0.25, %v5765_v34 }
0x112d   :  { %v5767_v48 = vsub.f32 %v5710_v26, %v5766_v46  ;;  %v5995_v26 = vld [vmem:[%s8186_s11 + $0xb8] sm:$0xff] }
0x112f   :  { %v5768_v50 = vmul.f32 %v5767_v48, %v5767_v48 }
0x1131   :  { %v5769_v51 = vmul.f32 %v8170_v58, %v5768_v50 }
0x1133   :  { %v5770_v6 = vsel %vm5758_vm7, %v5769_v51, 0.0  ;;  %v5695_v51 = vld [vmem:[#allocation8 + $0x38] sm:$0xff] }
0x1134   :  { %v5771_v25 = vrot.slane %v5770_v6, 4 }
0x1136   :  { %v5772_v0 = vadd.f32 %v5771_v25, %v5770_v6 }
0x1138   :  { %v5773_v43 = vrot.slane %v5772_v0, 2 }
0x113a   :  { %v5774_v47 = vadd.f32 %v5773_v43, %v5772_v0  ;;  %v5702_v0 = vpop.permute.xlu1 %5701 }
0x113c   :  { %v5775_v52 = vrot.slane %v5774_v47, 1 }
0x113e   :  { %v5776_v31 = vadd.f32 %v5775_v52, %v5774_v47 }
0x1140   :  { %v5777_v53 = vmul.f32 0.25, %v5776_v31 }
0x1142   :  { %v5778_v32 = vadd.f32 1e-05, %v5777_v53 }
0x1144   :  { %7319 = vrsqrt.f32 %v5778_v32 }
0x1151   :  { %v7320_v36 = vpop.eup %7319 }
0x1152   :  { %v5780_v54 = vmul.f32 %v7320_v36, %v5767_v48 }
0x1154   :  { %v5787_v39 = vmul.f32 %v6407_v55, %v5780_v54 }
0x1156   :  { %v5794_v57 = vadd.f32 %v6408_v38, %v5787_v39  ;;  %v5977_v38 = vld [vmem:[%s8186_s11 + $0x28] sm:$0xff] }
0x1158   :  { %6411 = vmatmul.mubr.msk.f32.vlgmr.msra.gmra.mxu0 %vm5758_vm7, %v5794_v57 }
0x1159   :  { %6619 = vmatpush3.msra.mxu0 %v5987_v41 }
0x115a   :  { %6620 = vmatprep.subr.mxu0 %v6002_v56 }
0x115b   :  { %6621 = vmatpush3.msra.mxu0 %v5986_v17 }
0x115c   :  { %6622 = vmatprep.subr.mxu0 %v6001_v3 }
0x115d   :  { %6623 = vmatpush3.msra.mxu0 %v5985_v8 }
0x115e   :  { %6624 = vmatprep.subr.mxu0 %v6000_v60  ;;  %v6406_v60 = vld [vmem:[%s6201_s19] ss:$0 sm:$0xff] }
0x11d7   :  { %v5532_v62 = vpop.f32.mrf.mxu1  ;;  %v5602_v63 = vpop.f32.mrf.mxu0 }
0x11d8   :  { %v5533_v1 = vadd.f32 %v8001_v24, %v5532_v62  ;;  %v5603_v2 = vadd.f32 %v8019_v27, %v5602_v63  ;;  %v5984_v27 = vld [vmem:[%s8186_s11 + $0x60] sm:$0xff] }
0x11d9   :  { %v7069_v4 = vpop.f32.mrf.mxu1  ;;  %v7074_v5 = vpop.f32.mrf.mxu0  ;;  %6625 = vmatpush3.msra.mxu0 %v5984_v27 }
0x11da   :  { %v5678_v9 = vadd.f32 %v5677_v10, %v5533_v1  ;;  %v5687_v59 = vadd.f32 %v5686_v49, %v5603_v2  ;;  %6626 = vmatprep.subr.mxu0 %v5999_v12  ;;  %v5976_v12 = vld [vmem:[%s8186_s11 + $0x20] sm:$0xff] }
0x11db   :  { %v5672_v24 = vpop.f32.mrf.mxu1  ;;  %6627 = vmatpush3.msra.mxu0 %v5983_v15  ;;  %v5975_v15 = vld [vmem:[%s8186_s11 + $0x18] sm:$0xff] }
0x11dc   :  { %v6402_v11 = vmul.f32 -1.442695, %v5678_v9  ;;  %v6403_v21 = vmul.f32 -1.442695, %v5687_v59  ;;  %6628 = vmatprep.subr.mxu0 %v5998_v33  ;;  %v5673_v46 = vadd.f32 %v8007_v42, %v5672_v24  ;;  %v6405_v9 = vld [vmem:[%s6199_s15] ss:$0 sm:$0xff] }
0x11dd   :  { %v7079_v14 = vpop.f32.mrf.mxu1  ;;  %6629 = vmatpush3.msra.mxu0 %v5982_v19  ;;  %v5974_v33 = vld [vmem:[%s8186_s11 + $0x10] sm:$0xff]  ;;  %v5989_v19 = vld [vmem:[%s8186_s11 + $0x88] sm:$0xff] }
0x11de   :  { %7321 = vpow2.f32 %v6402_v11  ;;  %6630 = vmatprep.subr.mxu0 %v5997_v23  ;;  %v5992_v11 = vld [vmem:[%s8186_s11 + $0xa0] sm:$0xff]  ;;  %v5991_v14 = vld [vmem:[%s8186_s11 + $0x98] sm:$0xff]  ;;  %v5973_v23 = vld [vmem:[%s8186_s11 + $0x8] sm:$0xff] }
0x11df   :  { %7323 = vpow2.f32 %v6403_v21  ;;  %6631 = vmatpush3.msra.mxu0 %v5981_v22  ;;  %v5990_v21 = vld [vmem:[%s8186_s11 + $0x90] sm:$0xff]  ;;  %v5988_v22 = vld [vmem:[%s8186_s11 + $0x80] sm:$0xff] }
0x11e0   :  { %6632 = vmatprep.subr.mxu0 %v5996_v28  ;;  %v5972_v28 = vld [vmem:[%s8186_s11] sm:$0xff] }
0x11e1   :  { %6633 = vmatpush3.msra.mxu0 %v5980_v29  ;;  %v6097_v29 = vld [vmem:[%s8243_s23 + $0x78] sm:$0xff] }
0x11e2   :  { %6634 = vmatprep.subr.mxu0 %v5995_v26  ;;  %v6096_v26 = vld [vmem:[%s8243_s23 + $0x70] sm:$0xff] }
0x11e3   :  { %6635 = vmatpush3.msra.mxu0 %v5979_v30  ;;  %v6095_v30 = vld [vmem:[%s8243_s23 + $0x68] sm:$0xff] }
0x11e4   :  { %6636 = vmatprep.subr.mxu0 %v5994_v35  ;;  %v6094_v35 = vld [vmem:[%s8243_s23 + $0x60] sm:$0xff] }
0x11e5   :  { %6637 = vmatpush3.msra.mxu0 %v5978_v37  ;;  %v6093_v37 = vld [vmem:[%s8243_s23 + $0x58] sm:$0xff] }
0x11e6   :  { %6638 = vmatprep.subr.mxu0 %v5993_v20  ;;  %v6092_v20 = vld [vmem:[%s8243_s23 + $0x50] sm:$0xff] }
0x11e7   :  { %6639 = vmatpush3.msra.mxu0 %v5977_v38  ;;  %v6084_v38 = vld [vmem:[%s8243_s23 + $0x10] sm:$0xff] }
0x11e8   :  { %6640 = vmatprep.subr.mxu0 %v5992_v11 }
0x11e9   :  { %6641 = vmatpush3.msra.mxu0 %v5976_v12 }
0x11ea   :  { %6642 = vmatprep.subr.mxu0 %v5991_v14 }
0x11eb   :  { %v7322_v40 = vpop.eup %7321  ;;  %6643 = vmatpush3.msra.mxu0 %v5975_v15 }
0x11ec   :  { %v5682_v44 = vadd.f32 1.0, %v7322_v40  ;;  %v7324_v45 = vpop.eup %7323  ;;  %6644 = vmatprep.subr.mxu0 %v5990_v21  ;;  %v6091_v40 = vld [vmem:[%s8243_s23 + $0x48] sm:$0xff] }
0x11ed   :  { %v5691_v34 = vadd.f32 1.0, %v7324_v45  ;;  %6645 = vmatpush3.msra.mxu0 %v5974_v33  ;;  %v6089_v45 = vld [vmem:[%s8243_s23 + $0x38] sm:$0xff] }
0x11ee   :  { %7325 = vrcp.f32 %v5682_v44  ;;  %6646 = vmatprep.subr.mxu0 %v5989_v19  ;;  %v6090_v44 = vld [vmem:[%s8243_s23 + $0x40] sm:$0xff] }
0x11ef   :  { %7327 = vrcp.f32 %v5691_v34  ;;  %6647 = vmatpush3.msra.mxu0 %v5973_v23  ;;  %v6088_v34 = vld [vmem:[%s8243_s23 + $0x30] sm:$0xff] }
0x11f0   :  { %6648 = vmatprep.subr.mxu0 %v5988_v22 }
0x11f1   :  { %6649 = vmatpush3.msra.mxu0 %v5972_v28 }
0x11fb   :  { %v7326_v48 = vpop.eup %7325 }
0x11fc   :  { %v5696_v50 = vmul.f32 %v7326_v48, %v5673_v46  ;;  %v7328_v25 = vpop.eup %7327  ;;  %v6087_v46 = vld [vmem:[%s8243_s23 + $0x28] sm:$0xff]  ;;  %v5960_v48 = vsub.s32 0, %v8166_v18 }
0x11fd   :  { %v5704_v43 = vmul.f32 %v7328_v25, %v5702_v0 }
0x11fe   :  { %v5697_v6 = vadd.f32 %v5696_v50, %v5695_v51  ;;  %v5956_v50 = vld [vmem:[%s6205_s27] sm:$0x3]  ;;  %v5964_v51 = vsub.s32 1, %v8166_v18  ;;  %v6085_v18 = vld [vmem:[%s8243_s23 + $0x18] sm:$0xff] }
0x11ff   :  { %v5705_v47 = vsub.f32 1.0, %v5704_v43  ;;  %v5961_v0 = vrot.slane %v5956_v50, %v5960_v48 }
0x1200   :  { %7329 = vtanh.f32 %v5697_v6 }
0x1201   :  { %v5706_v31 = vmul.f32 %v5705_v47, %v8144_v16  ;;  %v5965_v47 = vrot.slane %v5956_v50, %v5964_v51 }
0x120d   :  { %v7330_v52 = vpop.eup %7329 }
0x120e   :  { %v5707_v53 = vmul.f32 %v7330_v52, %v5704_v43 }
0x1210   :  { %v5708_v32 = vadd.f32 %v5707_v53, %v5706_v31 }
0x1212   :  { %v5709_v36 = vsel %vm8298_vm8, %v5708_v32, %v8144_v16 }
0x1213   :  { %v5718_v42 = vmul.f32 %v8170_v58, %v5709_v36 }
0x1215   :  { %v5719_v55 = vsel %vm151_vm0, %v5718_v42, 0.0 }
0x1216   :  { %v5720_v54 = vrot.slane %v5719_v55, 4 }
0x1218   :  { %v5721_v39 = vadd.f32 %v5720_v54, %v5719_v55  ;;  %v5877_v6 = vpop.f32.mrf.mxu0  ;;  %v6086_v54 = vld [vmem:[%s8243_s23 + $0x20] sm:$0xff] }
0x121a   :  { %v5722_v57 = vrot.slane %v5721_v39, 2  ;;  %v5879_v52 = vpop.f32.mrf.mxu0 }
0x121c   :  { %v5723_v61 = vadd.f32 %v5722_v57, %v5721_v39  ;;  %v6083_v39 = vld [vmem:[%s8243_s23 + $0x8] sm:$0xff]  ;;  %v6082_v57 = vld [vmem:[%s8243_s23] sm:$0xff] }
0x121e   :  { %v5724_v41 = vrot.slane %v5723_v61, 1 }
0x1220   :  { %v5725_v56 = vadd.f32 %v5724_v41, %v5723_v61  ;;  %v70_v61 = vstv %s6209_s1 }
0x1221   :  { %71 = vst [vmem:[#allocation11] sm:$0x1] %v70_v61 }
0x1222   :  { %v5726_v62 = vmul.f32 0.25, %v5725_v56  ;;  %v6413_v56 = vld [vmem:[%s6207_s5] ss:$0 sm:$0xff] }
0x1224   :  { %v5727_v63 = vsub.f32 %v5709_v36, %v5726_v62 }
0x1226   :  { %v5728_v17 = vmul.f32 %v5727_v63, %v5727_v63 }
0x1228   :  { %v5729_v1 = vmul.f32 %v8170_v58, %v5728_v17 }
0x122a   :  { %v5730_v13 = vsel %vm151_vm0, %v5729_v1, 0.0 }
0x122b   :  { %v5731_v16 = vrot.slane %v5730_v13, 4 }
0x122d   :  { %v5732_v2 = vadd.f32 %v5731_v16, %v5730_v13 }
0x122f   :  { %v5733_v3 = vrot.slane %v5732_v2, 2 }
0x1231   :  { %v5734_v10 = vadd.f32 %v5733_v3, %v5732_v2 }
0x1233   :  { %v5735_v49 = vrot.slane %v5734_v10, 1 }
0x1235   :  { %v5736_v4 = vadd.f32 %v5735_v49, %v5734_v10 }
0x1237   :  { %v5737_v5 = vmul.f32 0.25, %v5736_v4 }
0x1239   :  { %v5738_v8 = vadd.f32 1e-05, %v5737_v5 }
0x123b   :  { %7331 = vrsqrt.f32 %v5738_v8 }
0x1248   :  { %v7332_v58 = vpop.eup %7331 }
0x1249   :  { %v5740_v59 = vmul.f32 %v7332_v58, %v5727_v63 }
0x124b   :  { %v5747_v24 = vmul.f32 %v6405_v9, %v5740_v59 }
0x124d   :  { %v5754_v27 = vadd.f32 %v6406_v60, %v5747_v24 }
0x124f   :  { %6412 = vmatmul.mubr.msk.f32.vlgmr.msra.gmra.mxu1 %vm151_vm0, %v5754_v27 }
0x1250   :  { %7112 = vmatprep.mubr.msk.f32.mxu1 %vm7340_vm5, %v7339_v7  ;;  %7081 = vmatpush3.msra.mxu1 %v6097_v29 }
0x1251   :  { %7082 = vmatprep.subr.mxu1 %v7339_v7 }
0x1252   :  { %7083 = vmatpush3.msra.mxu1 %v6096_v26 }
0x1253   :  { %7084 = vmatprep.subr.mxu1 %v7339_v7 }
0x1254   :  { %7085 = vmatpush3.msra.mxu1 %v6095_v30 }
0x1255   :  { %7086 = vmatprep.subr.mxu1 %v7339_v7 }
0x1256   :  { %7087 = vmatpush3.msra.mxu1 %v6094_v35 }
0x1257   :  { %7088 = vmatprep.subr.mxu1 %v7339_v7 }
0x1258   :  { %7089 = vmatpush3.msra.mxu1 %v6093_v37 }
0x1259   :  { %7090 = vmatprep.subr.mxu1 %v7339_v7 }
0x125a   :  { %7091 = vmatpush3.msra.mxu1 %v6092_v20 }
0x125b   :  { %7092 = vmatprep.subr.mxu1 %v7339_v7 }
0x125c   :  { %7093 = vmatpush3.msra.mxu1 %v6091_v40 }
0x125d   :  { %7094 = vmatprep.subr.mxu1 %v7339_v7 }
0x125e   :  { %7095 = vmatpush3.msra.mxu1 %v6090_v44 }
0x125f   :  { %7096 = vmatprep.subr.mxu1 %v7339_v7 }
0x1260   :  { %7097 = vmatpush3.msra.mxu1 %v6089_v45 }
0x1261   :  { %7098 = vmatprep.subr.mxu1 %v7339_v7 }
0x1262   :  { %7099 = vmatpush3.msra.mxu1 %v6088_v34 }
0x1263   :  { %7100 = vmatprep.subr.mxu1 %v7339_v7 }
0x1264   :  { %7101 = vmatpush3.msra.mxu1 %v6087_v46 }
0x1265   :  { %7102 = vmatprep.subr.mxu1 %v7339_v7 }
0x1266   :  { %7103 = vmatpush3.msra.mxu1 %v6086_v54 }
0x1267   :  { %7104 = vmatprep.subr.mxu1 %v7339_v7 }
0x1268   :  { %7105 = vmatpush3.msra.mxu1 %v6085_v18 }
0x1269   :  { %7106 = vmatprep.subr.mxu1 %v7339_v7 }
0x126a   :  { %7107 = vmatpush3.msra.mxu1 %v6084_v38 }
0x126b   :  { %7108 = vmatprep.subr.mxu1 %v7339_v7 }
0x126c   :  { %7109 = vmatpush3.msra.mxu1 %v6083_v39 }
0x126d   :  { %7110 = vmatprep.subr.mxu1 %v7339_v7  ;;  %v6414_v7 = vld [vmem:[#allocation11] ss:$0 sm:$0xff] }
0x126e   :  { %7111 = vmatpush3.msra.mxu1 %v6082_v57 }
0x130f   :  { %v5951_v25 = vpop.f32.mrf.mxu1 }
0x1310   :  { %v5952_v43 = vadd.f32 %v5951_v25, %v5877_v6 }
0x1311   :  { %v5953_v31 = vpop.f32.mrf.mxu1 }
0x1312   :  { %v5954_v53 = vadd.f32 %v5953_v31, %v5879_v52  ;;  %v5968_v32 = vadd.f32 %v5961_v0, %v5952_v43 }
0x1314   :  { %v5969_v36 = vadd.f32 %v5965_v47, %v5954_v53  ;;  %v5970_v55 = vmax.f32 %v5968_v32, 0.0 }
0x1316   :  { %v5971_v42 = vmax.f32 %v5969_v36, 0.0 }
0x1318   :  { %6075 = vmatprep.mubr.f32.mxu0 %v5971_v42 }
0x1319   :  { %6076 = vmatmul.mubr.f32.vlgmr.msra.gmra.mxu0 %v5970_v55 }
0x13d9   :  { %v6650_v41 = vpop.f32.mrf.mxu0 }
0x13db   :  { %v6651_v62 = vpop.f32.mrf.mxu0 }
0x13dc   :  { %v6652_v63 = vadd.f32 %v6651_v62, %v6650_v41 }
0x13de   :  { %v6078_v17 = vadd.f32 %v6652_v63, %v6413_v56 }
0x13e0   :  { %v6081_v1 = vmax.f32 %v6078_v17, 0.0 }
0x13e2   :  { %7113 = vmatmul.mubr.f32.vlgmr.msra.gmra.mxu1 %v6081_v1 }
0x14a2   :  { %v6171_v13 = vpop.f32.mrf.mxu1 }
0x14a3   :  { %v6172_v16 = vadd.f32 %v6414_v7, %v6171_v13 }
0x14a4   :  { %v7114_v2 = vpop.f32.mrf.mxu1 }
0x14a5   :  { %6175 = vst.msk [vmem:[%s6210_s9] sm:$0xff] %vm3314_vm1, %v6172_v16 }

</bundles_post_ra>
